<compile_context>
chip_gen: v7x
topology: tpu7x:2x2x1
jax: 0.10.0
libtpu: 0.0.40
codegen_flags: <defaults>
</compile_context>

<pallas_src>
import functools

import jax
import jax.numpy as jnp
from jax.experimental import pallas as pl
from jax.experimental.pallas import tpu as pltpu

NEG_INF = -1e9


# --------------------------- hardware-aware budget ---------------------------

def _vmem_budget_bytes():
    """Usable VMEM budget per kernel, derived from the chip generation."""
    cap = None
    try:
        info = pltpu.get_tpu_info()
        cap = int(getattr(info, "vmem_capacity_bytes", 0)) or None
    except Exception:
        cap = None
    if cap is None:
        cap = 64 * 1024 * 1024          # conservative (v7x-sized) fallback
    # ~3/4 of physical, capped at 96 MiB: v5e/v6e (128 MiB) -> 96 MiB,
    # v7x (64 MiB per TC) -> 48 MiB.
    return min((cap * 3) // 4, 96 * 1024 * 1024)


_VMEM_BUDGET = _vmem_budget_bytes()


def _pick_tile(dim, target, align):
    """Largest tile <= target that divides dim (multiple of align), else dim."""
    if dim <= target:
        return dim
    t = (target // align) * align
    while t >= align:
        if dim % t == 0:
            return t
        t -= align
    return dim


# ----------------------------- tiled matmul ----------------------------------

def _linear_kernel(*refs, activation, transpose_rhs, fuse_ln, multi_k, eps):
    if fuse_ln:
        if multi_k:
            x_ref, w_ref, b_ref, r_ref, g_ref, bb_ref, o_ref, acc_ref = refs
        else:
            x_ref, w_ref, b_ref, r_ref, g_ref, bb_ref, o_ref = refs
            acc_ref = None
    else:
        if multi_k:
            x_ref, w_ref, b_ref, o_ref, acc_ref = refs
        else:
            x_ref, w_ref, b_ref, o_ref = refs
            acc_ref = None

    def matmul():
        x = x_ref[...]
        w = w_ref[...]
        if transpose_rhs:
            # contract the last (d_model) axis of both operands -> no w.T copy
            return jax.lax.dot_general(
                x, w, (((1,), (1,)), ((), ())),
                preferred_element_type=jnp.float32)
        return jnp.dot(x, w, preferred_element_type=jnp.float32)

    def epilogue(y):
        y = y + b_ref[...].astype(jnp.float32)
        if activation == "gelu":
            # TODO(synk): HF BART uses exact (erf) GELU; tanh approximation here.
            y = jax.nn.gelu(y, approximate=True)
        if fuse_ln:
            y = y + r_ref[...].astype(jnp.float32)
            mean = jnp.mean(y, axis=-1, keepdims=True)
            var = jnp.mean(jnp.square(y - mean), axis=-1, keepdims=True)
            y = (y - mean) * jax.lax.rsqrt(var + eps)
            y = y * g_ref[...].astype(jnp.float32) + bb_ref[...].astype(jnp.float32)
        o_ref[...] = y.astype(o_ref.dtype)

    if multi_k:
        @pl.when(pl.program_id(2) == 0)
        def _init():
            acc_ref[...] = jnp.zeros_like(acc_ref)

        acc_ref[...] += matmul()

        @pl.when(pl.program_id(2) == pl.num_programs(2) - 1)
        def _finish():
            epilogue(acc_ref[...])
    else:
        epilogue(matmul())


def linear(x, w, b, activation=None, *, transpose_rhs=False, out_dtype=None,
           ln_residual=None, ln_gamma=None, ln_beta=None, ln_eps=1e-5):
    """y = act(x @ w + b), optionally followed by LayerNorm(y + ln_residual).

    x:(M,K); w:(K,N) or (N,K) if transpose_rhs.  The fused LayerNorm requires a
    single N tile (tn == N), which holds for every d_model-sized projection.
    """
    M, K = x.shape
    if transpose_rhs:
        N, Kw = w.shape
    else:
        Kw, N = w.shape
    assert Kw == K
    out_dtype = out_dtype or x.dtype
    fuse_ln = ln_residual is not None

    x_isz = jnp.dtype(x.dtype).itemsize
    w_isz = jnp.dtype(w.dtype).itemsize
    o_isz = jnp.dtype(out_dtype).itemsize
    budget = int(_VMEM_BUDGET * 0.8)

    tm = _pick_tile(M, 256, 8)
    if fuse_ln:
        tn = N                      # LayerNorm needs the full feature axis
    else:
        tn_target = 512 if _VMEM_BUDGET >= 64 * 1024 * 1024 else 256
        tn = _pick_tile(N, tn_target, 128)

    def footprint(tk_):
        vm = 2 * (tm * tk_ * x_isz + tk_ * tn * w_isz + tm * tn * o_isz + tn * 4)
        if fuse_ln:
            vm += 2 * tm * tn * jnp.dtype(ln_residual.dtype).itemsize + 4 * tn * 4
        if tk_ < K:
            vm += tm * tn * 4       # f32 accumulator scratch
        return vm

    # Prefer the full-K tile (no reduction grid axis / no accumulator scratch);
    # otherwise fall back to the largest fitting 128-aligned K tile.
    tk = K
    if footprint(K) > budget:
        for cand in (2048, 1024, 512, 256, 128):
            if cand < K and K % cand == 0 and footprint(cand) <= budget:
                tk = cand
                break
        else:
            tk = _pick_tile(K, 512, 128)
    multi_k = tk < K

    if multi_k:
        grid = (M // tm, N // tn, K // tk)
        x_spec = pl.BlockSpec((tm, tk), lambda i, j, k: (i, k))
        if transpose_rhs:
            w_spec = pl.BlockSpec((tn, tk), lambda i, j, k: (j, k))
        else:
            w_spec = pl.BlockSpec((tk, tn), lambda i, j, k: (k, j))
        b_spec = pl.BlockSpec((1, tn), lambda i, j, k: (0, j))
        r_spec = pl.BlockSpec((tm, tn), lambda i, j, k: (i, j))
        v_spec = pl.BlockSpec((1, tn), lambda i, j, k: (0, j))
        o_spec = pl.BlockSpec((tm, tn), lambda i, j, k: (i, j))
        scratch = [pltpu.VMEM((tm, tn), jnp.float32)]
        dims = ("parallel", "parallel", "arbitrary")
    else:
        grid = (M // tm, N // tn)
        x_spec = pl.BlockSpec((tm, K), lambda i, j: (i, 0))
        if transpose_rhs:
            w_spec = pl.BlockSpec((tn, K), lambda i, j: (j, 0))
        else:
            w_spec = pl.BlockSpec((K, tn), lambda i, j: (0, j))
        b_spec = pl.BlockSpec((1, tn), lambda i, j: (0, j))
        r_spec = pl.BlockSpec((tm, tn), lambda i, j: (i, j))
        v_spec = pl.BlockSpec((1, tn), lambda i, j: (0, j))
        o_spec = pl.BlockSpec((tm, tn), lambda i, j: (i, j))
        scratch = []
        dims = ("parallel", "parallel")

    in_specs = [x_spec, w_spec, b_spec]
    args = [x, w, b.reshape(1, N)]
    if fuse_ln:
        in_specs += [r_spec, v_spec, v_spec]
        args += [ln_residual, ln_gamma.reshape(1, N), ln_beta.reshape(1, N)]

    cost = pl.CostEstimate(
        flops=2 * M * N * K,
        transcendentals=(M * N if activation == "gelu" else 0),
        bytes_accessed=(M * K + N * K) * x_isz + M * N * o_isz
        + (M * N * x_isz if fuse_ln else 0))

    return pl.pallas_call(
        functools.partial(_linear_kernel, activation=activation,
                          transpose_rhs=transpose_rhs, fuse_ln=fuse_ln,
                          multi_k=multi_k, eps=ln_eps),
        out_shape=jax.ShapeDtypeStruct((M, N), out_dtype),
        grid=grid,
        in_specs=in_specs,
        out_specs=o_spec,
        scratch_shapes=scratch,
        compiler_params=pltpu.CompilerParams(
            dimension_semantics=dims,
            vmem_limit_bytes=_VMEM_BUDGET),
        cost_estimate=cost,
    )(*args)


# ------------------------------ layer norm -----------------------------------
# Standalone LN is only used for the post-embedding LayerNorms; the residual
# LNs are fused into the wo / fc2 matmul epilogues above.

def _layernorm_kernel(x_ref, g_ref, b_ref, o_ref, *, eps):
    x = x_ref[...].astype(jnp.float32)
    mean = jnp.mean(x, axis=-1, keepdims=True)
    var = jnp.mean(jnp.square(x - mean), axis=-1, keepdims=True)
    y = (x - mean) * jax.lax.rsqrt(var + eps)
    y = y * g_ref[...].astype(jnp.float32) + b_ref[...].astype(jnp.float32)
    o_ref[...] = y.astype(o_ref.dtype)


def layer_norm(x, gamma, beta, eps=1e-5):
    M, D = x.shape
    tm = _pick_tile(M, 512, 8)
    return pl.pallas_call(
        functools.partial(_layernorm_kernel, eps=eps),
        out_shape=jax.ShapeDtypeStruct((M, D), x.dtype),
        grid=(M // tm,),
        in_specs=[pl.BlockSpec((tm, D), lambda i: (i, 0)),
                  pl.BlockSpec((1, D), lambda i: (0, 0)),
                  pl.BlockSpec((1, D), lambda i: (0, 0))],
        out_specs=pl.BlockSpec((tm, D), lambda i: (i, 0)),
        compiler_params=pltpu.CompilerParams(
            dimension_semantics=("parallel",)),
    )(x, gamma.reshape(1, D), beta.reshape(1, D))


# ------------------------------- attention -----------------------------------

def _mha_kernel(*refs, heads_per_block, head_dim, causal, has_mask, scale):
    if has_mask:
        q_ref, k_ref, v_ref, m_ref, o_ref = refs
    else:
        q_ref, k_ref, v_ref, o_ref = refs

    tq = q_ref.shape[1]
    sk = k_ref.shape[1]

    if has_mask:
        mask = m_ref[0].astype(jnp.float32)          # (1, Sk) additive pad mask

    if causal:
        q_start = pl.program_id(2) * tq
        row = jax.lax.broadcasted_iota(jnp.int32, (tq, sk), 0) + q_start
        col = jax.lax.broadcasted_iota(jnp.int32, (tq, sk), 1)
        causal_ok = col <= row

    for h in range(heads_per_block):
        sl = slice(h * head_dim, (h + 1) * head_dim)
        q = q_ref[0, :, sl]                          # (tq, Dh)
        k = k_ref[0, :, sl]                          # (Sk, Dh)
        v = v_ref[0, :, sl]                          # (Sk, Dh)
        # contract last dims directly (no explicit k.T); scale in f32
        s = jax.lax.dot_general(q, k, (((1,), (1,)), ((), ())),
                                preferred_element_type=jnp.float32)
        s = s * scale
        if has_mask:
            s = s + mask
        if causal:
            s = jnp.where(causal_ok, s, NEG_INF)
        s = s - jnp.max(s, axis=-1, keepdims=True)
        p = jnp.exp(s)
        p = p * pl.reciprocal(jnp.sum(p, axis=-1, keepdims=True), approx=True)
        o = jnp.dot(p.astype(v.dtype), v, preferred_element_type=jnp.float32)
        o_ref[0, :, sl] = o.astype(o_ref.dtype)      # direct per-head store


def mh_attention(q_arr, q_off, kv_arr, k_off, v_off, pad_add, *,
                 num_heads, head_dim, causal):
    """Multi-head attention.

    q_arr:(B,Sq,*) / kv_arr:(B,Sk,*) hold the projected Q / K / V at lane
    offsets q_off / k_off / v_off; heads are sliced by the BlockSpec index_map
    (no transposes in HBM).  pad_add:(B,1,Sk) additive f32 mask, or None.
    """
    B, Sq, _ = q_arr.shape
    Sk = kv_arr.shape[1]
    D = num_heads * head_dim

    # pack heads into 256-lane slabs where possible (lane-dense I/O, fewer
    # grid steps); guaranteed 128-aligned for BART head sizes
    hp = max(1, min(num_heads, 256 // max(1, head_dim)))
    while num_heads % hp:
        hp -= 1
    lane_blk = hp * head_dim
    assert lane_blk % 128 == 0, "head packing must produce 128-aligned lanes"
    n_groups = num_heads // hp
    qo, ko, vo = q_off // lane_blk, k_off // lane_blk, v_off // lane_blk

    tq = _pick_tile(Sq, 256, 8)        # bound the live (tq, Sk) score tile
    n_q = Sq // tq
    scale = 1.0 / (head_dim ** 0.5)
    has_mask = pad_add is not None

    in_specs = [
        pl.BlockSpec((1, tq, lane_blk), lambda b, g, qi: (b, qi, g + qo)),
        pl.BlockSpec((1, Sk, lane_blk), lambda b, g, qi: (b, 0, g + ko)),
        pl.BlockSpec((1, Sk, lane_blk), lambda b, g, qi: (b, 0, g + vo)),
    ]
    args = [q_arr, kv_arr, kv_arr]
    if has_mask:
        in_specs.append(pl.BlockSpec((1, 1, Sk), lambda b, g, qi: (b, 0, 0)))
        args.append(pad_add)

    itemsize = jnp.dtype(q_arr.dtype).itemsize
    cost = pl.CostEstimate(
        flops=4 * B * num_heads * Sq * Sk * head_dim,
        transcendentals=B * num_heads * Sq * Sk,
        bytes_accessed=(2 * B * Sq * D + 2 * B * Sk * D) * itemsize
        + (B * Sk * 4 if has_mask else 0))

    return pl.pallas_call(
        functools.partial(_mha_kernel, heads_per_block=hp, head_dim=head_dim,
                          causal=causal, has_mask=has_mask, scale=scale),
        out_shape=jax.ShapeDtypeStruct((B, Sq, D), q_arr.dtype),
        grid=(B, n_groups, n_q),
        in_specs=in_specs,
        out_specs=pl.BlockSpec((1, tq, lane_blk), lambda b, g, qi: (b, qi, g)),
        compiler_params=pltpu.CompilerParams(
            dimension_semantics=("parallel", "parallel", "parallel"),
            vmem_limit_bytes=_VMEM_BUDGET),
        cost_estimate=cost,
    )(*args)


# ------------------------------- model glue ----------------------------------

def bart_forward(params, input_ids, input_mask, summary_ids, summary_mask,
                 *, num_heads):
    del summary_mask  # unused, matching the PyTorch forward (HF not given it)
    B, Ss = input_ids.shape
    St = summary_ids.shape[1]
    tok_emb = params["tok_emb"]
    D = tok_emb.shape[1]
    Dh = D // num_heads

    pad_add = ((1.0 - input_mask.astype(jnp.float32)) * NEG_INF).reshape(B, 1, Ss)

    def self_attn_block(x2d, S, lp, ln, pad, causal):
        qkv = linear(x2d, lp["w_qkv"], lp["b_qkv"]).reshape(B, S, 3 * D)
        a = mh_attention(qkv, 0, qkv, D, 2 * D, pad,
                         num_heads=num_heads, head_dim=Dh, causal=causal)
        # wo projection with fused residual-add + LayerNorm epilogue
        return linear(a.reshape(B * S, D), lp["wo"], lp["bo"],
                      ln_residual=x2d, ln_gamma=ln["g"], ln_beta=ln["b"])

    def cross_attn_block(y2d, enc, lp, ln, pad):
        St_ = y2d.shape[0] // B
        Ss_ = enc.shape[1]
        q = linear(y2d, lp["wq"], lp["bq"]).reshape(B, St_, D)
        kv = linear(enc.reshape(B * Ss_, D), lp["w_kv"], lp["b_kv"]
                    ).reshape(B, Ss_, 2 * D)
        c = mh_attention(q, 0, kv, 0, D, pad,
                         num_heads=num_heads, head_dim=Dh, causal=False)
        return linear(c.reshape(B * St_, D), lp["wo"], lp["bo"],
                      ln_residual=y2d, ln_gamma=ln["g"], ln_beta=ln["b"])

    def ffn_block(x2d, lp, ln):
        h = linear(x2d, lp["fc1"]["w"], lp["fc1"]["b"], activation="gelu")
        return linear(h, lp["fc2"]["w"], lp["fc2"]["b"],
                      ln_residual=x2d, ln_gamma=ln["g"], ln_beta=ln["b"])

    # ---- encoder ----
    # TODO(synk): HF BART learned positions use a +2 offset quirk; synthetic
    # init so plain positions are used here.
    x = tok_emb[input_ids] + params["pos_emb"][:Ss][None]
    x2d = layer_norm(x.reshape(B * Ss, D),
                     params["enc_ln_emb"]["g"], params["enc_ln_emb"]["b"])
    for lp in params["enc_layers"]:
        x2d = self_attn_block(x2d, Ss, lp["self_attn"], lp["ln1"], pad_add,
                              causal=False)
        x2d = ffn_block(x2d, lp, lp["ln2"])
    enc_out = x2d.reshape(B, Ss, D)

    # ---- decoder ----
    y = tok_emb[summary_ids] + params["pos_emb"][:St][None]
    y2d = layer_norm(y.reshape(B * St, D),
                     params["dec_ln_emb"]["g"], params["dec_ln_emb"]["b"])
    for lp in params["dec_layers"]:
        # causal decoder self-attention: no padding mask input at all
        y2d = self_attn_block(y2d, St, lp["self_attn"], lp["ln1"], None,
                              causal=True)
        y2d = cross_attn_block(y2d, enc_out, lp["cross_attn"], lp["ln_cross"],
                               pad_add)
        y2d = ffn_block(y2d, lp, lp["ln2"])

    # ---- tied LM head: contract tok_emb on d_model (no .T materialization),
    #      vocab zero-padded to a multiple of 512 so the N tiling never falls
    #      back to the full vocab, + final_logits_bias ----
    V = tok_emb.shape[0]
    Vp = ((V + 511) // 512) * 512
    lm_w = tok_emb if Vp == V else jnp.pad(tok_emb, ((0, Vp - V), (0, 0)))
    lm_b = params["final_logits_bias"]
    lm_b = lm_b if Vp == V else jnp.pad(lm_b, (0, Vp - V))
    logits = linear(y2d, lm_w, lm_b, transpose_rhs=True, out_dtype=jnp.float32)
    logits = logits[:, :V].reshape(B, St, V)
    return {"logits": logits, "encoder_last_hidden_state": enc_out}


# ------------------------------ parameter init --------------------------------

def init_params(key, *, vocab, d_model, ffn, max_pos, n_enc, n_dec,
                dtype=jnp.bfloat16):
    keys = iter(jax.random.split(key, 512))

    def w(shape, scale=0.02):
        return (scale * jax.random.normal(next(keys), shape, jnp.float32)
                ).astype(dtype)

    def dense(din, dout):
        return {"w": w((din, dout)), "b": jnp.zeros((dout,), jnp.float32)}

    def self_attn(d):
        return {"w_qkv": w((d, 3 * d)), "b_qkv": jnp.zeros((3 * d,), jnp.float32),
                "wo": w((d, d)), "bo": jnp.zeros((d,), jnp.float32)}

    def cross_attn(d):
        return {"wq": w((d, d)), "bq": jnp.zeros((d,), jnp.float32),
                "w_kv": w((d, 2 * d)), "b_kv": jnp.zeros((2 * d,), jnp.float32),
                "wo": w((d, d)), "bo": jnp.zeros((d,), jnp.float32)}

    def ln(d):
        return {"g": jnp.ones((d,), jnp.float32),
                "b": jnp.zeros((d,), jnp.float32)}

    def enc_layer(d):
        return {"self_attn": self_attn(d), "ln1": ln(d),
                "fc1": dense(d, ffn), "fc2": dense(ffn, d), "ln2": ln(d)}

    def dec_layer(d):
        return {"self_attn": self_attn(d), "ln1": ln(d),
                "cross_attn": cross_attn(d), "ln_cross": ln(d),
                "fc1": dense(d, ffn), "fc2": dense(ffn, d), "ln2": ln(d)}

    return {
        "tok_emb": w((vocab, d_model)),
        "pos_emb": w((max_pos, d_model)),
        "enc_ln_emb": ln(d_model),
        "dec_ln_emb": ln(d_model),
        "enc_layers": [enc_layer(d_model) for _ in range(n_enc)],
        "dec_layers": [dec_layer(d_model) for _ in range(n_dec)],
        "final_logits_bias": jnp.zeros((vocab,), jnp.float32),
    }


# ----------------------------------- main --------------------------------------

if __name__ == "__main__":
    B, S_SRC, S_TGT = 2, 8, 8
    # d_model chosen so head_dim and the fused-QKV lane blocks are 128-aligned.
    D_MODEL, N_HEADS, FFN, VOCAB, MAX_POS = 256, 2, 512, 512, 64

    key = jax.random.PRNGKey(0)
    kp, ki, ks = jax.random.split(key, 3)
    params = init_params(kp, vocab=VOCAB, d_model=D_MODEL, ffn=FFN,
                         max_pos=MAX_POS, n_enc=2, n_dec=2)

    input_ids = jax.random.randint(ki, (B, S_SRC), 0, VOCAB)
    summary_ids = jax.random.randint(ks, (B, S_TGT), 0, VOCAB)
    input_mask = jnp.ones((B, S_SRC), jnp.int32).at[:, -2:].set(0)
    summary_mask = jnp.ones((B, S_TGT), jnp.int32)

    fwd = jax.jit(functools.partial(bart_forward, num_heads=N_HEADS))
    out = fwd(params, input_ids, input_mask, summary_ids, summary_mask)
    jax.block_until_ready(out)

    assert out["logits"].shape == (B, S_TGT, VOCAB)
    assert out["encoder_last_hidden_state"].shape == (B, S_SRC, D_MODEL)
    assert bool(jnp.all(jnp.isfinite(out["logits"])))
    print("KERNEL_OK")
</pallas_src>

<mosaic_0001>
module attributes {stable_mosaic.version = 11 : i64} {
  func.func @_linear_kernel(%arg0: i32, %arg1: i32, %arg2: memref<16x256xbf16, #tpu.memory_space<vmem>>, %arg3: memref<256x256xbf16, #tpu.memory_space<vmem>>, %arg4: memref<1x256xf32, #tpu.memory_space<vmem>>, %arg5: memref<16x256xbf16, #tpu.memory_space<vmem>>) attributes {dimension_semantics = [#tpu.dimension_semantics<parallel>, #tpu.dimension_semantics<parallel>], iteration_bounds = array<i64: 1, 3>, scalar_prefetch = 0 : i64, scratch_operands = 0 : i64, tpu.core_type = #tpu.core_type<tc>, window_params = [{transform_indices = @transform_0, window_bounds = array<i64: 16, 256>}, {transform_indices = @transform_1, window_bounds = array<i64: 256, 256>}, {transform_indices = @transform_2, window_bounds = array<i64: 1, 256>}, {transform_indices = @transform_3, window_bounds = array<i64: 16, 256>}]} {
    %c0 = arith.constant 0 : index
    %c0_0 = arith.constant 0 : index
    %0 = vector.load %arg2[%c0, %c0_0] : memref<16x256xbf16, #tpu.memory_space<vmem>>, vector<16x256xbf16>
    %c0_1 = arith.constant 0 : index
    %c0_2 = arith.constant 0 : index
    %1 = vector.load %arg3[%c0_1, %c0_2] : memref<256x256xbf16, #tpu.memory_space<vmem>>, vector<256x256xbf16>
    %cst = arith.constant dense<0.000000e+00> : vector<16x256xf32>
    %2 = tpu.matmul %0, %1, %cst {dimension_numbers = #tpu.dot_dimension_numbers<[1], [0], [0], [1], [0, 0, 1, 1], [], []>} : vector<16x256xbf16>, vector<256x256xbf16>, vector<16x256xf32> -> vector<16x256xf32>
    %c0_3 = arith.constant 0 : index
    %c0_4 = arith.constant 0 : index
    %3 = vector.load %arg4[%c0_3, %c0_4] : memref<1x256xf32, #tpu.memory_space<vmem>>, vector<1x256xf32>
    %4 = vector.broadcast %3 : vector<1x256xf32> to vector<16x256xf32>
    %5 = arith.addf %2, %4 : vector<16x256xf32>
    %6 = arith.truncf %5 : vector<16x256xf32> to vector<16x256xbf16>
    %c0_5 = arith.constant 0 : index
    %c0_6 = arith.constant 0 : index
    %7 = vector.load %arg5[%c0_5, %c0_6] : memref<16x256xbf16, #tpu.memory_space<vmem>>, vector<16x256xbf16>
    tpu.vector_store %arg5[%c0_5, %c0_6], %6 {strides = array<i32>} : memref<16x256xbf16, #tpu.memory_space<vmem>>, vector<16x256xbf16>,
    return
  }
  func.func @transform_0(%arg0: i32, %arg1: i32) -> (i32, i32) {
    %c0_i32 = arith.constant 0 : i32
    %c0_i32_0 = arith.constant 0 : i32
    return %arg0, %c0_i32 : i32, i32
  }
  func.func @transform_1(%arg0: i32, %arg1: i32) -> (i32, i32) {
    %c0_i32 = arith.constant 0 : i32
    %c0_i32_0 = arith.constant 0 : i32
    return %c0_i32, %arg1 : i32, i32
  }
  func.func @transform_2(%arg0: i32, %arg1: i32) -> (i32, i32) {
    %c0_i32 = arith.constant 0 : i32
    %c0_i32_0 = arith.constant 0 : i32
    return %c0_i32, %arg1 : i32, i32
  }
  func.func @transform_3(%arg0: i32, %arg1: i32) -> (i32, i32) {
    %c0_i32 = arith.constant 0 : i32
    return %arg0, %arg1 : i32, i32
  }
}

module attributes {stable_mosaic.version = 11 : i64} {
  func.func @_layernorm_kernel(%arg0: i32, %arg1: memref<16x256xbf16, #tpu.memory_space<vmem>>, %arg2: memref<1x256xf32, #tpu.memory_space<vmem>>, %arg3: memref<1x256xf32, #tpu.memory_space<vmem>>, %arg4: memref<16x256xbf16, #tpu.memory_space<vmem>>) attributes {dimension_semantics = [#tpu.dimension_semantics<parallel>], iteration_bounds = array<i64: 1>, scalar_prefetch = 0 : i64, scratch_operands = 0 : i64, tpu.core_type = #tpu.core_type<tc>, window_params = [{transform_indices = @transform_0, window_bounds = array<i64: 16, 256>}, {pipeline_mode = #tpu.pipeline_mode<synchronous>, transform_indices = @transform_1, window_bounds = array<i64: 1, 256>}, {pipeline_mode = #tpu.pipeline_mode<synchronous>, transform_indices = @transform_2, window_bounds = array<i64: 1, 256>}, {transform_indices = @transform_3, window_bounds = array<i64: 16, 256>}]} {
    %c0 = arith.constant 0 : index
    %c0_0 = arith.constant 0 : index
    %0 = vector.load %arg1[%c0, %c0_0] : memref<16x256xbf16, #tpu.memory_space<vmem>>, vector<16x256xbf16>
    %1 = arith.extf %0 : vector<16x256xbf16> to vector<16x256xf32>
    %cst = arith.constant dense<0.000000e+00> : vector<16xf32>
    %2 = vector.multi_reduction <add>, %1, %cst [1] : vector<16x256xf32> to vector<16xf32>
    %3 = vector.shape_cast %2 : vector<16xf32> to vector<16x1xf32>
    %cst_1 = arith.constant 2.560000e+02 : f32
    %4 = vector.broadcast %cst_1 : f32 to vector<16x1xf32>
    %5 = arith.divf %3, %4 : vector<16x1xf32>
    %6 = vector.broadcast %5 : vector<16x1xf32> to vector<16x256xf32>
    %7 = arith.subf %1, %6 : vector<16x256xf32>
    %8 = arith.mulf %7, %7 : vector<16x256xf32>
    %cst_2 = arith.constant dense<0.000000e+00> : vector<16xf32>
    %9 = vector.multi_reduction <add>, %8, %cst_2 [1] : vector<16x256xf32> to vector<16xf32>
    %10 = vector.shape_cast %9 : vector<16xf32> to vector<16x1xf32>
    %cst_3 = arith.constant 2.560000e+02 : f32
    %11 = vector.broadcast %cst_3 : f32 to vector<16x1xf32>
    %12 = arith.divf %10, %11 : vector<16x1xf32>
    %13 = vector.broadcast %5 : vector<16x1xf32> to vector<16x256xf32>
    %14 = arith.subf %1, %13 : vector<16x256xf32>
    %cst_4 = arith.constant 9.99999974E-6 : f32
    %15 = vector.broadcast %cst_4 : f32 to vector<16x1xf32>
    %16 = arith.addf %12, %15 : vector<16x1xf32>
    %17 = math.rsqrt %16 : vector<16x1xf32>
    %18 = vector.broadcast %17 : vector<16x1xf32> to vector<16x256xf32>
    %19 = arith.mulf %14, %18 : vector<16x256xf32>
    %c0_5 = arith.constant 0 : index
    %c0_6 = arith.constant 0 : index
    %20 = vector.load %arg2[%c0_5, %c0_6] : memref<1x256xf32, #tpu.memory_space<vmem>>, vector<1x256xf32>
    %21 = vector.broadcast %20 : vector<1x256xf32> to vector<16x256xf32>
    %22 = arith.mulf %19, %21 : vector<16x256xf32>
    %c0_7 = arith.constant 0 : index
    %c0_8 = arith.constant 0 : index
    %23 = vector.load %arg3[%c0_7, %c0_8] : memref<1x256xf32, #tpu.memory_space<vmem>>, vector<1x256xf32>
    %24 = vector.broadcast %23 : vector<1x256xf32> to vector<16x256xf32>
    %25 = arith.addf %22, %24 : vector<16x256xf32>
    %26 = arith.truncf %25 : vector<16x256xf32> to vector<16x256xbf16>
    %c0_9 = arith.constant 0 : index
    %c0_10 = arith.constant 0 : index
    %27 = vector.load %arg4[%c0_9, %c0_10] : memref<16x256xbf16, #tpu.memory_space<vmem>>, vector<16x256xbf16>
    tpu.vector_store %arg4[%c0_9, %c0_10], %26 {strides = array<i32>} : memref<16x256xbf16, #tpu.memory_space<vmem>>, vector<16x256xbf16>,
    return
  }
  func.func @transform_0(%arg0: i32) -> (i32, i32) {
    %c0_i32 = arith.constant 0 : i32
    %c0_i32_0 = arith.constant 0 : i32
    return %arg0, %c0_i32 : i32, i32
  }
  func.func @transform_1(%arg0: i32) -> (i32, i32) {
    %c0_i32 = arith.constant 0 : i32
    %c0_i32_0 = arith.constant 0 : i32
    %c0_i32_1 = arith.constant 0 : i32
    return %c0_i32, %c0_i32_0 : i32, i32
  }
  func.func @transform_2(%arg0: i32) -> (i32, i32) {
    %c0_i32 = arith.constant 0 : i32
    %c0_i32_0 = arith.constant 0 : i32
    %c0_i32_1 = arith.constant 0 : i32
    return %c0_i32, %c0_i32_0 : i32, i32
  }
  func.func @transform_3(%arg0: i32) -> (i32, i32) {
    %c0_i32 = arith.constant 0 : i32
    %c0_i32_0 = arith.constant 0 : i32
    return %arg0, %c0_i32 : i32, i32
  }
}

module attributes {stable_mosaic.version = 11 : i64} {
  func.func @_mha_kernel(%arg0: i32, %arg1: i32, %arg2: i32, %arg3: memref<1x8x256xbf16, #tpu.memory_space<vmem>>, %arg4: memref<1x8x256xbf16, #tpu.memory_space<vmem>>, %arg5: memref<1x8x256xbf16, #tpu.memory_space<vmem>>, %arg6: memref<1x1x8xf32, #tpu.memory_space<vmem>>, %arg7: memref<1x8x256xbf16, #tpu.memory_space<vmem>>) attributes {dimension_semantics = [#tpu.dimension_semantics<parallel>, #tpu.dimension_semantics<parallel>, #tpu.dimension_semantics<parallel>], iteration_bounds = array<i64: 2, 1, 1>, scalar_prefetch = 0 : i64, scratch_operands = 0 : i64, tpu.core_type = #tpu.core_type<tc>, window_params = [{transform_indices = @transform_0, window_bounds = array<i64: 1, 8, 256>}, {transform_indices = @transform_1, window_bounds = array<i64: 1, 8, 256>}, {transform_indices = @transform_2, window_bounds = array<i64: 1, 8, 256>}, {transform_indices = @transform_3, window_bounds = array<i64: 1, 1, 8>}, {transform_indices = @transform_4, window_bounds = array<i64: 1, 8, 256>}]} {
    %c0 = arith.constant 0 : index
    %c0_0 = arith.constant 0 : index
    %c0_1 = arith.constant 0 : index
    %0 = vector.load %arg6[%c0, %c0_0, %c0_1] : memref<1x1x8xf32, #tpu.memory_space<vmem>>, vector<1x1x8xf32>
    %1 = vector.shape_cast %0 : vector<1x1x8xf32> to vector<1x8xf32>
    %c0_2 = arith.constant 0 : index
    %c0_3 = arith.constant 0 : index
    %c0_4 = arith.constant 0 : index
    %2 = vector.load %arg3[%c0_2, %c0_3, %c0_4] : memref<1x8x256xbf16, #tpu.memory_space<vmem>>, vector<1x8x128xbf16>
    %3 = vector.shape_cast %2 : vector<1x8x128xbf16> to vector<8x128xbf16>
    %c0_5 = arith.constant 0 : index
    %c0_6 = arith.constant 0 : index
    %c0_7 = arith.constant 0 : index
    %4 = vector.load %arg4[%c0_5, %c0_6, %c0_7] : memref<1x8x256xbf16, #tpu.memory_space<vmem>>, vector<1x8x128xbf16>
    %5 = vector.shape_cast %4 : vector<1x8x128xbf16> to vector<8x128xbf16>
    %c0_8 = arith.constant 0 : index
    %c0_9 = arith.constant 0 : index
    %c0_10 = arith.constant 0 : index
    %6 = vector.load %arg5[%c0_8, %c0_9, %c0_10] : memref<1x8x256xbf16, #tpu.memory_space<vmem>>, vector<1x8x128xbf16>
    %7 = vector.shape_cast %6 : vector<1x8x128xbf16> to vector<8x128xbf16>
    %cst = arith.constant dense<0.000000e+00> : vector<8x8xf32>
    %8 = tpu.matmul %3, %5, %cst {dimension_numbers = #tpu.dot_dimension_numbers<[1], [1], [0], [0], [0, 0, 1, 0], [], []>} : vector<8x128xbf16>, vector<8x128xbf16>, vector<8x8xf32> -> vector<8x8xf32>
    %cst_11 = arith.constant 0.0883883461 : f32
    %9 = vector.broadcast %cst_11 : f32 to vector<8x8xf32>
    %10 = arith.mulf %8, %9 : vector<8x8xf32>
    %11 = vector.broadcast %1 : vector<1x8xf32> to vector<8x8xf32>
    %12 = arith.addf %10, %11 : vector<8x8xf32>
    %cst_12 = arith.constant dense<0xFF800000> : vector<8xf32>
    %13 = vector.multi_reduction <maximumf>, %12, %cst_12 [1] : vector<8x8xf32> to vector<8xf32>
    %14 = vector.shape_cast %13 : vector<8xf32> to vector<8x1xf32>
    %15 = vector.broadcast %14 : vector<8x1xf32> to vector<8x8xf32>
    %16 = arith.subf %12, %15 : vector<8x8xf32>
    %17 = math.exp %16 : vector<8x8xf32>
    %cst_13 = arith.constant dense<0.000000e+00> : vector<8xf32>
    %18 = vector.multi_reduction <add>, %17, %cst_13 [1] : vector<8x8xf32> to vector<8xf32>
    %19 = vector.shape_cast %18 : vector<8xf32> to vector<8x1xf32>
    %20 = tpu.reciprocal %19 {approx = true} : vector<8x1xf32> -> vector<8x1xf32>
    %21 = vector.broadcast %20 : vector<8x1xf32> to vector<8x8xf32>
    %22 = arith.mulf %17, %21 : vector<8x8xf32>
    %23 = arith.truncf %22 : vector<8x8xf32> to vector<8x8xbf16>
    %cst_14 = arith.constant dense<0.000000e+00> : vector<8x128xf32>
    %24 = tpu.matmul %23, %7, %cst_14 {dimension_numbers = #tpu.dot_dimension_numbers<[1], [0], [0], [1], [0, 0, 1, 1], [], []>} : vector<8x8xbf16>, vector<8x128xbf16>, vector<8x128xf32> -> vector<8x128xf32>
    %25 = arith.truncf %24 : vector<8x128xf32> to vector<8x128xbf16>
    %c0_15 = arith.constant 0 : index
    %c0_16 = arith.constant 0 : index
    %c0_17 = arith.constant 0 : index
    %26 = vector.load %arg7[%c0_15, %c0_16, %c0_17] : memref<1x8x256xbf16, #tpu.memory_space<vmem>>, vector<1x8x128xbf16>
    %27 = vector.shape_cast %26 : vector<1x8x128xbf16> to vector<8x128xbf16>
    %28 = vector.shape_cast %25 : vector<8x128xbf16> to vector<1x8x128xbf16>
    tpu.vector_store %arg7[%c0_15, %c0_16, %c0_17], %28 {strides = array<i32>} : memref<1x8x256xbf16, #tpu.memory_space<vmem>>, vector<1x8x128xbf16>,
    %c0_18 = arith.constant 0 : index
    %c0_19 = arith.constant 0 : index
    %c128 = arith.constant 128 : index
    %29 = vector.load %arg3[%c0_18, %c0_19, %c128] : memref<1x8x256xbf16, #tpu.memory_space<vmem>>, vector<1x8x128xbf16>
    %30 = vector.shape_cast %29 : vector<1x8x128xbf16> to vector<8x128xbf16>
    %c0_20 = arith.constant 0 : index
    %c0_21 = arith.constant 0 : index
    %c128_22 = arith.constant 128 : index
    %31 = vector.load %arg4[%c0_20, %c0_21, %c128_22] : memref<1x8x256xbf16, #tpu.memory_space<vmem>>, vector<1x8x128xbf16>
    %32 = vector.shape_cast %31 : vector<1x8x128xbf16> to vector<8x128xbf16>
    %c0_23 = arith.constant 0 : index
    %c0_24 = arith.constant 0 : index
    %c128_25 = arith.constant 128 : index
    %33 = vector.load %arg5[%c0_23, %c0_24, %c128_25] : memref<1x8x256xbf16, #tpu.memory_space<vmem>>, vector<1x8x128xbf16>
    %34 = vector.shape_cast %33 : vector<1x8x128xbf16> to vector<8x128xbf16>
    %cst_26 = arith.constant dense<0.000000e+00> : vector<8x8xf32>
    %35 = tpu.matmul %30, %32, %cst_26 {dimension_numbers = #tpu.dot_dimension_numbers<[1], [1], [0], [0], [0, 0, 1, 0], [], []>} : vector<8x128xbf16>, vector<8x128xbf16>, vector<8x8xf32> -> vector<8x8xf32>
    %cst_27 = arith.constant 0.0883883461 : f32
    %36 = vector.broadcast %cst_27 : f32 to vector<8x8xf32>
    %37 = arith.mulf %35, %36 : vector<8x8xf32>
    %38 = vector.broadcast %1 : vector<1x8xf32> to vector<8x8xf32>
    %39 = arith.addf %37, %38 : vector<8x8xf32>
    %cst_28 = arith.constant dense<0xFF800000> : vector<8xf32>
    %40 = vector.multi_reduction <maximumf>, %39, %cst_28 [1] : vector<8x8xf32> to vector<8xf32>
    %41 = vector.shape_cast %40 : vector<8xf32> to vector<8x1xf32>
    %42 = vector.broadcast %41 : vector<8x1xf32> to vector<8x8xf32>
    %43 = arith.subf %39, %42 : vector<8x8xf32>
    %44 = math.exp %43 : vector<8x8xf32>
    %cst_29 = arith.constant dense<0.000000e+00> : vector<8xf32>
    %45 = vector.multi_reduction <add>, %44, %cst_29 [1] : vector<8x8xf32> to vector<8xf32>
    %46 = vector.shape_cast %45 : vector<8xf32> to vector<8x1xf32>
    %47 = tpu.reciprocal %46 {approx = true} : vector<8x1xf32> -> vector<8x1xf32>
    %48 = vector.broadcast %47 : vector<8x1xf32> to vector<8x8xf32>
    %49 = arith.mulf %44, %48 : vector<8x8xf32>
    %50 = arith.truncf %49 : vector<8x8xf32> to vector<8x8xbf16>
    %cst_30 = arith.constant dense<0.000000e+00> : vector<8x128xf32>
    %51 = tpu.matmul %50, %34, %cst_30 {dimension_numbers = #tpu.dot_dimension_numbers<[1], [0], [0], [1], [0, 0, 1, 1], [], []>} : vector<8x8xbf16>, vector<8x128xbf16>, vector<8x128xf32> -> vector<8x128xf32>
    %52 = arith.truncf %51 : vector<8x128xf32> to vector<8x128xbf16>
    %c0_31 = arith.constant 0 : index
    %c0_32 = arith.constant 0 : index
    %c128_33 = arith.constant 128 : index
    %53 = vector.load %arg7[%c0_31, %c0_32, %c128_33] : memref<1x8x256xbf16, #tpu.memory_space<vmem>>, vector<1x8x128xbf16>
    %54 = vector.shape_cast %53 : vector<1x8x128xbf16> to vector<8x128xbf16>
    %55 = vector.shape_cast %52 : vector<8x128xbf16> to vector<1x8x128xbf16>
    tpu.vector_store %arg7[%c0_31, %c0_32, %c128_33], %55 {strides = array<i32>} : memref<1x8x256xbf16, #tpu.memory_space<vmem>>, vector<1x8x128xbf16>,
    return
  }
  func.func @transform_0(%arg0: i32, %arg1: i32, %arg2: i32) -> (i32, i32, i32) {
    %c0_i32 = arith.constant 0 : i32
    %0 = arith.addi %arg1, %c0_i32 : i32
    %c0_i32_0 = arith.constant 0 : i32
    return %arg0, %arg2, %0 : i32, i32, i32
  }
  func.func @transform_1(%arg0: i32, %arg1: i32, %arg2: i32) -> (i32, i32, i32) {
    %c1_i32 = arith.constant 1 : i32
    %0 = arith.addi %arg1, %c1_i32 : i32
    %c0_i32 = arith.constant 0 : i32
    %c0_i32_0 = arith.constant 0 : i32
    return %arg0, %c0_i32, %0 : i32, i32, i32
  }
  func.func @transform_2(%arg0: i32, %arg1: i32, %arg2: i32) -> (i32, i32, i32) {
    %c2_i32 = arith.constant 2 : i32
    %0 = arith.addi %arg1, %c2_i32 : i32
    %c0_i32 = arith.constant 0 : i32
    %c0_i32_0 = arith.constant 0 : i32
    return %arg0, %c0_i32, %0 : i32, i32, i32
  }
  func.func @transform_3(%arg0: i32, %arg1: i32, %arg2: i32) -> (i32, i32, i32) {
    %c0_i32 = arith.constant 0 : i32
    %c0_i32_0 = arith.constant 0 : i32
    %c0_i32_1 = arith.constant 0 : i32
    return %arg0, %c0_i32, %c0_i32_0 : i32, i32, i32
  }
  func.func @transform_4(%arg0: i32, %arg1: i32, %arg2: i32) -> (i32, i32, i32) {
    %c0_i32 = arith.constant 0 : i32
    return %arg0, %arg2, %arg1 : i32, i32, i32
  }
}

module attributes {stable_mosaic.version = 11 : i64} {
  func.func @_linear_kernel(%arg0: i32, %arg1: i32, %arg2: memref<16x256xbf16, #tpu.memory_space<vmem>>, %arg3: memref<256x256xbf16, #tpu.memory_space<vmem>>, %arg4: memref<1x256xf32, #tpu.memory_space<vmem>>, %arg5: memref<16x256xbf16, #tpu.memory_space<vmem>>, %arg6: memref<1x256xf32, #tpu.memory_space<vmem>>, %arg7: memref<1x256xf32, #tpu.memory_space<vmem>>, %arg8: memref<16x256xbf16, #tpu.memory_space<vmem>>) attributes {dimension_semantics = [#tpu.dimension_semantics<parallel>, #tpu.dimension_semantics<parallel>], iteration_bounds = array<i64: 1, 1>, scalar_prefetch = 0 : i64, scratch_operands = 0 : i64, tpu.core_type = #tpu.core_type<tc>, window_params = [{transform_indices = @transform_0, window_bounds = array<i64: 16, 256>}, {transform_indices = @transform_1, window_bounds = array<i64: 256, 256>}, {transform_indices = @transform_2, window_bounds = array<i64: 1, 256>}, {transform_indices = @transform_3, window_bounds = array<i64: 16, 256>}, {transform_indices = @transform_4, window_bounds = array<i64: 1, 256>}, {transform_indices = @transform_5, window_bounds = array<i64: 1, 256>}, {transform_indices = @transform_6, window_bounds = array<i64: 16, 256>}]} {
    %c0 = arith.constant 0 : index
    %c0_0 = arith.constant 0 : index
    %0 = vector.load %arg2[%c0, %c0_0] : memref<16x256xbf16, #tpu.memory_space<vmem>>, vector<16x256xbf16>
    %c0_1 = arith.constant 0 : index
    %c0_2 = arith.constant 0 : index
    %1 = vector.load %arg3[%c0_1, %c0_2] : memref<256x256xbf16, #tpu.memory_space<vmem>>, vector<256x256xbf16>
    %cst = arith.constant dense<0.000000e+00> : vector<16x256xf32>
    %2 = tpu.matmul %0, %1, %cst {dimension_numbers = #tpu.dot_dimension_numbers<[1], [0], [0], [1], [0, 0, 1, 1], [], []>} : vector<16x256xbf16>, vector<256x256xbf16>, vector<16x256xf32> -> vector<16x256xf32>
    %c0_3 = arith.constant 0 : index
    %c0_4 = arith.constant 0 : index
    %3 = vector.load %arg4[%c0_3, %c0_4] : memref<1x256xf32, #tpu.memory_space<vmem>>, vector<1x256xf32>
    %4 = vector.broadcast %3 : vector<1x256xf32> to vector<16x256xf32>
    %5 = arith.addf %2, %4 : vector<16x256xf32>
    %c0_5 = arith.constant 0 : index
    %c0_6 = arith.constant 0 : index
    %6 = vector.load %arg5[%c0_5, %c0_6] : memref<16x256xbf16, #tpu.memory_space<vmem>>, vector<16x256xbf16>
    %7 = arith.extf %6 : vector<16x256xbf16> to vector<16x256xf32>
    %8 = arith.addf %5, %7 : vector<16x256xf32>
    %cst_7 = arith.constant dense<0.000000e+00> : vector<16xf32>
    %9 = vector.multi_reduction <add>, %8, %cst_7 [1] : vector<16x256xf32> to vector<16xf32>
    %10 = vector.shape_cast %9 : vector<16xf32> to vector<16x1xf32>
    %cst_8 = arith.constant 2.560000e+02 : f32
    %11 = vector.broadcast %cst_8 : f32 to vector<16x1xf32>
    %12 = arith.divf %10, %11 : vector<16x1xf32>
    %13 = vector.broadcast %12 : vector<16x1xf32> to vector<16x256xf32>
    %14 = arith.subf %8, %13 : vector<16x256xf32>
    %15 = arith.mulf %14, %14 : vector<16x256xf32>
    %cst_9 = arith.constant dense<0.000000e+00> : vector<16xf32>
    %16 = vector.multi_reduction <add>, %15, %cst_9 [1] : vector<16x256xf32> to vector<16xf32>
    %17 = vector.shape_cast %16 : vector<16xf32> to vector<16x1xf32>
    %cst_10 = arith.constant 2.560000e+02 : f32
    %18 = vector.broadcast %cst_10 : f32 to vector<16x1xf32>
    %19 = arith.divf %17, %18 : vector<16x1xf32>
    %20 = vector.broadcast %12 : vector<16x1xf32> to vector<16x256xf32>
    %21 = arith.subf %8, %20 : vector<16x256xf32>
    %cst_11 = arith.constant 9.99999974E-6 : f32
    %22 = vector.broadcast %cst_11 : f32 to vector<16x1xf32>
    %23 = arith.addf %19, %22 : vector<16x1xf32>
    %24 = math.rsqrt %23 : vector<16x1xf32>
    %25 = vector.broadcast %24 : vector<16x1xf32> to vector<16x256xf32>
    %26 = arith.mulf %21, %25 : vector<16x256xf32>
    %c0_12 = arith.constant 0 : index
    %c0_13 = arith.constant 0 : index
    %27 = vector.load %arg6[%c0_12, %c0_13] : memref<1x256xf32, #tpu.memory_space<vmem>>, vector<1x256xf32>
    %28 = vector.broadcast %27 : vector<1x256xf32> to vector<16x256xf32>
    %29 = arith.mulf %26, %28 : vector<16x256xf32>
    %c0_14 = arith.constant 0 : index
    %c0_15 = arith.constant 0 : index
    %30 = vector.load %arg7[%c0_14, %c0_15] : memref<1x256xf32, #tpu.memory_space<vmem>>, vector<1x256xf32>
    %31 = vector.broadcast %30 : vector<1x256xf32> to vector<16x256xf32>
    %32 = arith.addf %29, %31 : vector<16x256xf32>
    %33 = arith.truncf %32 : vector<16x256xf32> to vector<16x256xbf16>
    %c0_16 = arith.constant 0 : index
    %c0_17 = arith.constant 0 : index
    %34 = vector.load %arg8[%c0_16, %c0_17] : memref<16x256xbf16, #tpu.memory_space<vmem>>, vector<16x256xbf16>
    tpu.vector_store %arg8[%c0_16, %c0_17], %33 {strides = array<i32>} : memref<16x256xbf16, #tpu.memory_space<vmem>>, vector<16x256xbf16>,
    return
  }
  func.func @transform_0(%arg0: i32, %arg1: i32) -> (i32, i32) {
    %c0_i32 = arith.constant 0 : i32
    %c0_i32_0 = arith.constant 0 : i32
    return %arg0, %c0_i32 : i32, i32
  }
  func.func @transform_1(%arg0: i32, %arg1: i32) -> (i32, i32) {
    %c0_i32 = arith.constant 0 : i32
    %c0_i32_0 = arith.constant 0 : i32
    return %c0_i32, %arg1 : i32, i32
  }
  func.func @transform_2(%arg0: i32, %arg1: i32) -> (i32, i32) {
    %c0_i32 = arith.constant 0 : i32
    %c0_i32_0 = arith.constant 0 : i32
    return %c0_i32, %arg1 : i32, i32
  }
  func.func @transform_3(%arg0: i32, %arg1: i32) -> (i32, i32) {
    %c0_i32 = arith.constant 0 : i32
    return %arg0, %arg1 : i32, i32
  }
  func.func @transform_4(%arg0: i32, %arg1: i32) -> (i32, i32) {
    %c0_i32 = arith.constant 0 : i32
    %c0_i32_0 = arith.constant 0 : i32
    return %c0_i32, %arg1 : i32, i32
  }
  func.func @transform_5(%arg0: i32, %arg1: i32) -> (i32, i32) {
    %c0_i32 = arith.constant 0 : i32
    %c0_i32_0 = arith.constant 0 : i32
    return %c0_i32, %arg1 : i32, i32
  }
  func.func @transform_6(%arg0: i32, %arg1: i32) -> (i32, i32) {
    %c0_i32 = arith.constant 0 : i32
    return %arg0, %arg1 : i32, i32
  }
}

module attributes {stable_mosaic.version = 11 : i64} {
  func.func @_linear_kernel(%arg0: i32, %arg1: i32, %arg2: memref<16x256xbf16, #tpu.memory_space<vmem>>, %arg3: memref<256x256xbf16, #tpu.memory_space<vmem>>, %arg4: memref<1x256xf32, #tpu.memory_space<vmem>>, %arg5: memref<16x256xbf16, #tpu.memory_space<vmem>>) attributes {dimension_semantics = [#tpu.dimension_semantics<parallel>, #tpu.dimension_semantics<parallel>], iteration_bounds = array<i64: 1, 2>, scalar_prefetch = 0 : i64, scratch_operands = 0 : i64, tpu.core_type = #tpu.core_type<tc>, window_params = [{transform_indices = @transform_0, window_bounds = array<i64: 16, 256>}, {transform_indices = @transform_1, window_bounds = array<i64: 256, 256>}, {transform_indices = @transform_2, window_bounds = array<i64: 1, 256>}, {transform_indices = @transform_3, window_bounds = array<i64: 16, 256>}]} {
    %c0 = arith.constant 0 : index
    %c0_0 = arith.constant 0 : index
    %0 = vector.load %arg2[%c0, %c0_0] : memref<16x256xbf16, #tpu.memory_space<vmem>>, vector<16x256xbf16>
    %c0_1 = arith.constant 0 : index
    %c0_2 = arith.constant 0 : index
    %1 = vector.load %arg3[%c0_1, %c0_2] : memref<256x256xbf16, #tpu.memory_space<vmem>>, vector<256x256xbf16>
    %cst = arith.constant dense<0.000000e+00> : vector<16x256xf32>
    %2 = tpu.matmul %0, %1, %cst {dimension_numbers = #tpu.dot_dimension_numbers<[1], [0], [0], [1], [0, 0, 1, 1], [], []>} : vector<16x256xbf16>, vector<256x256xbf16>, vector<16x256xf32> -> vector<16x256xf32>
    %c0_3 = arith.constant 0 : index
    %c0_4 = arith.constant 0 : index
    %3 = vector.load %arg4[%c0_3, %c0_4] : memref<1x256xf32, #tpu.memory_space<vmem>>, vector<1x256xf32>
    %4 = vector.broadcast %3 : vector<1x256xf32> to vector<16x256xf32>
    %5 = arith.addf %2, %4 : vector<16x256xf32>
    %6 = arith.mulf %5, %5 : vector<16x256xf32>
    %7 = arith.mulf %5, %6 : vector<16x256xf32>
    %cst_5 = arith.constant 4.471500e-02 : f32
    %8 = vector.broadcast %cst_5 : f32 to vector<16x256xf32>
    %9 = arith.mulf %8, %7 : vector<16x256xf32>
    %10 = arith.addf %5, %9 : vector<16x256xf32>
    %cst_6 = arith.constant 0.797884583 : f32
    %11 = vector.broadcast %cst_6 : f32 to vector<16x256xf32>
    %12 = arith.mulf %11, %10 : vector<16x256xf32>
    %13 = math.tanh %12 : vector<16x256xf32>
    %cst_7 = arith.constant 1.000000e+00 : f32
    %14 = vector.broadcast %cst_7 : f32 to vector<16x256xf32>
    %15 = arith.addf %14, %13 : vector<16x256xf32>
    %cst_8 = arith.constant 5.000000e-01 : f32
    %16 = vector.broadcast %cst_8 : f32 to vector<16x256xf32>
    %17 = arith.mulf %16, %15 : vector<16x256xf32>
    %18 = arith.mulf %5, %17 : vector<16x256xf32>
    %19 = arith.truncf %18 : vector<16x256xf32> to vector<16x256xbf16>
    %c0_9 = arith.constant 0 : index
    %c0_10 = arith.constant 0 : index
    %20 = vector.load %arg5[%c0_9, %c0_10] : memref<16x256xbf16, #tpu.memory_space<vmem>>, vector<16x256xbf16>
    tpu.vector_store %arg5[%c0_9, %c0_10], %19 {strides = array<i32>} : memref<16x256xbf16, #tpu.memory_space<vmem>>, vector<16x256xbf16>,
    return
  }
  func.func @transform_0(%arg0: i32, %arg1: i32) -> (i32, i32) {
    %c0_i32 = arith.constant 0 : i32
    %c0_i32_0 = arith.constant 0 : i32
    return %arg0, %c0_i32 : i32, i32
  }
  func.func @transform_1(%arg0: i32, %arg1: i32) -> (i32, i32) {
    %c0_i32 = arith.constant 0 : i32
    %c0_i32_0 = arith.constant 0 : i32
    return %c0_i32, %arg1 : i32, i32
  }
  func.func @transform_2(%arg0: i32, %arg1: i32) -> (i32, i32) {
    %c0_i32 = arith.constant 0 : i32
    %c0_i32_0 = arith.constant 0 : i32
    return %c0_i32, %arg1 : i32, i32
  }
  func.func @transform_3(%arg0: i32, %arg1: i32) -> (i32, i32) {
    %c0_i32 = arith.constant 0 : i32
    return %arg0, %arg1 : i32, i32
  }
}

module attributes {stable_mosaic.version = 11 : i64} {
  func.func @_linear_kernel(%arg0: i32, %arg1: i32, %arg2: memref<16x512xbf16, #tpu.memory_space<vmem>>, %arg3: memref<512x256xbf16, #tpu.memory_space<vmem>>, %arg4: memref<1x256xf32, #tpu.memory_space<vmem>>, %arg5: memref<16x256xbf16, #tpu.memory_space<vmem>>, %arg6: memref<1x256xf32, #tpu.memory_space<vmem>>, %arg7: memref<1x256xf32, #tpu.memory_space<vmem>>, %arg8: memref<16x256xbf16, #tpu.memory_space<vmem>>) attributes {dimension_semantics = [#tpu.dimension_semantics<parallel>, #tpu.dimension_semantics<parallel>], iteration_bounds = array<i64: 1, 1>, scalar_prefetch = 0 : i64, scratch_operands = 0 : i64, tpu.core_type = #tpu.core_type<tc>, window_params = [{transform_indices = @transform_0, window_bounds = array<i64: 16, 512>}, {transform_indices = @transform_1, window_bounds = array<i64: 512, 256>}, {transform_indices = @transform_2, window_bounds = array<i64: 1, 256>}, {transform_indices = @transform_3, window_bounds = array<i64: 16, 256>}, {transform_indices = @transform_4, window_bounds = array<i64: 1, 256>}, {transform_indices = @transform_5, window_bounds = array<i64: 1, 256>}, {transform_indices = @transform_6, window_bounds = array<i64: 16, 256>}]} {
    %c0 = arith.constant 0 : index
    %c0_0 = arith.constant 0 : index
    %0 = vector.load %arg2[%c0, %c0_0] : memref<16x512xbf16, #tpu.memory_space<vmem>>, vector<16x512xbf16>
    %c0_1 = arith.constant 0 : index
    %c0_2 = arith.constant 0 : index
    %1 = vector.load %arg3[%c0_1, %c0_2] : memref<512x256xbf16, #tpu.memory_space<vmem>>, vector<512x256xbf16>
    %cst = arith.constant dense<0.000000e+00> : vector<16x256xf32>
    %2 = tpu.matmul %0, %1, %cst {dimension_numbers = #tpu.dot_dimension_numbers<[1], [0], [0], [1], [0, 0, 1, 1], [], []>} : vector<16x512xbf16>, vector<512x256xbf16>, vector<16x256xf32> -> vector<16x256xf32>
    %c0_3 = arith.constant 0 : index
    %c0_4 = arith.constant 0 : index
    %3 = vector.load %arg4[%c0_3, %c0_4] : memref<1x256xf32, #tpu.memory_space<vmem>>, vector<1x256xf32>
    %4 = vector.broadcast %3 : vector<1x256xf32> to vector<16x256xf32>
    %5 = arith.addf %2, %4 : vector<16x256xf32>
    %c0_5 = arith.constant 0 : index
    %c0_6 = arith.constant 0 : index
    %6 = vector.load %arg5[%c0_5, %c0_6] : memref<16x256xbf16, #tpu.memory_space<vmem>>, vector<16x256xbf16>
    %7 = arith.extf %6 : vector<16x256xbf16> to vector<16x256xf32>
    %8 = arith.addf %5, %7 : vector<16x256xf32>
    %cst_7 = arith.constant dense<0.000000e+00> : vector<16xf32>
    %9 = vector.multi_reduction <add>, %8, %cst_7 [1] : vector<16x256xf32> to vector<16xf32>
    %10 = vector.shape_cast %9 : vector<16xf32> to vector<16x1xf32>
    %cst_8 = arith.constant 2.560000e+02 : f32
    %11 = vector.broadcast %cst_8 : f32 to vector<16x1xf32>
    %12 = arith.divf %10, %11 : vector<16x1xf32>
    %13 = vector.broadcast %12 : vector<16x1xf32> to vector<16x256xf32>
    %14 = arith.subf %8, %13 : vector<16x256xf32>
    %15 = arith.mulf %14, %14 : vector<16x256xf32>
    %cst_9 = arith.constant dense<0.000000e+00> : vector<16xf32>
    %16 = vector.multi_reduction <add>, %15, %cst_9 [1] : vector<16x256xf32> to vector<16xf32>
    %17 = vector.shape_cast %16 : vector<16xf32> to vector<16x1xf32>
    %cst_10 = arith.constant 2.560000e+02 : f32
    %18 = vector.broadcast %cst_10 : f32 to vector<16x1xf32>
    %19 = arith.divf %17, %18 : vector<16x1xf32>
    %20 = vector.broadcast %12 : vector<16x1xf32> to vector<16x256xf32>
    %21 = arith.subf %8, %20 : vector<16x256xf32>
    %cst_11 = arith.constant 9.99999974E-6 : f32
    %22 = vector.broadcast %cst_11 : f32 to vector<16x1xf32>
    %23 = arith.addf %19, %22 : vector<16x1xf32>
    %24 = math.rsqrt %23 : vector<16x1xf32>
    %25 = vector.broadcast %24 : vector<16x1xf32> to vector<16x256xf32>
    %26 = arith.mulf %21, %25 : vector<16x256xf32>
    %c0_12 = arith.constant 0 : index
    %c0_13 = arith.constant 0 : index
    %27 = vector.load %arg6[%c0_12, %c0_13] : memref<1x256xf32, #tpu.memory_space<vmem>>, vector<1x256xf32>
    %28 = vector.broadcast %27 : vector<1x256xf32> to vector<16x256xf32>
    %29 = arith.mulf %26, %28 : vector<16x256xf32>
    %c0_14 = arith.constant 0 : index
    %c0_15 = arith.constant 0 : index
    %30 = vector.load %arg7[%c0_14, %c0_15] : memref<1x256xf32, #tpu.memory_space<vmem>>, vector<1x256xf32>
    %31 = vector.broadcast %30 : vector<1x256xf32> to vector<16x256xf32>
    %32 = arith.addf %29, %31 : vector<16x256xf32>
    %33 = arith.truncf %32 : vector<16x256xf32> to vector<16x256xbf16>
    %c0_16 = arith.constant 0 : index
    %c0_17 = arith.constant 0 : index
    %34 = vector.load %arg8[%c0_16, %c0_17] : memref<16x256xbf16, #tpu.memory_space<vmem>>, vector<16x256xbf16>
    tpu.vector_store %arg8[%c0_16, %c0_17], %33 {strides = array<i32>} : memref<16x256xbf16, #tpu.memory_space<vmem>>, vector<16x256xbf16>,
    return
  }
  func.func @transform_0(%arg0: i32, %arg1: i32) -> (i32, i32) {
    %c0_i32 = arith.constant 0 : i32
    %c0_i32_0 = arith.constant 0 : i32
    return %arg0, %c0_i32 : i32, i32
  }
  func.func @transform_1(%arg0: i32, %arg1: i32) -> (i32, i32) {
    %c0_i32 = arith.constant 0 : i32
    %c0_i32_0 = arith.constant 0 : i32
    return %c0_i32, %arg1 : i32, i32
  }
  func.func @transform_2(%arg0: i32, %arg1: i32) -> (i32, i32) {
    %c0_i32 = arith.constant 0 : i32
    %c0_i32_0 = arith.constant 0 : i32
    return %c0_i32, %arg1 : i32, i32
  }
  func.func @transform_3(%arg0: i32, %arg1: i32) -> (i32, i32) {
    %c0_i32 = arith.constant 0 : i32
    return %arg0, %arg1 : i32, i32
  }
  func.func @transform_4(%arg0: i32, %arg1: i32) -> (i32, i32) {
    %c0_i32 = arith.constant 0 : i32
    %c0_i32_0 = arith.constant 0 : i32
    return %c0_i32, %arg1 : i32, i32
  }
  func.func @transform_5(%arg0: i32, %arg1: i32) -> (i32, i32) {
    %c0_i32 = arith.constant 0 : i32
    %c0_i32_0 = arith.constant 0 : i32
    return %c0_i32, %arg1 : i32, i32
  }
  func.func @transform_6(%arg0: i32, %arg1: i32) -> (i32, i32) {
    %c0_i32 = arith.constant 0 : i32
    return %arg0, %arg1 : i32, i32
  }
}

module attributes {stable_mosaic.version = 11 : i64} {
  func.func @_linear_kernel(%arg0: i32, %arg1: i32, %arg2: memref<16x256xbf16, #tpu.memory_space<vmem>>, %arg3: memref<256x256xbf16, #tpu.memory_space<vmem>>, %arg4: memref<1x256xf32, #tpu.memory_space<vmem>>, %arg5: memref<16x256xbf16, #tpu.memory_space<vmem>>) attributes {dimension_semantics = [#tpu.dimension_semantics<parallel>, #tpu.dimension_semantics<parallel>], iteration_bounds = array<i64: 1, 3>, scalar_prefetch = 0 : i64, scratch_operands = 0 : i64, tpu.core_type = #tpu.core_type<tc>, window_params = [{transform_indices = @transform_0, window_bounds = array<i64: 16, 256>}, {transform_indices = @transform_1, window_bounds = array<i64: 256, 256>}, {transform_indices = @transform_2, window_bounds = array<i64: 1, 256>}, {transform_indices = @transform_3, window_bounds = array<i64: 16, 256>}]} {
    %c0 = arith.constant 0 : index
    %c0_0 = arith.constant 0 : index
    %0 = vector.load %arg2[%c0, %c0_0] : memref<16x256xbf16, #tpu.memory_space<vmem>>, vector<16x256xbf16>
    %c0_1 = arith.constant 0 : index
    %c0_2 = arith.constant 0 : index
    %1 = vector.load %arg3[%c0_1, %c0_2] : memref<256x256xbf16, #tpu.memory_space<vmem>>, vector<256x256xbf16>
    %cst = arith.constant dense<0.000000e+00> : vector<16x256xf32>
    %2 = tpu.matmul %0, %1, %cst {dimension_numbers = #tpu.dot_dimension_numbers<[1], [0], [0], [1], [0, 0, 1, 1], [], []>} : vector<16x256xbf16>, vector<256x256xbf16>, vector<16x256xf32> -> vector<16x256xf32>
    %c0_3 = arith.constant 0 : index
    %c0_4 = arith.constant 0 : index
    %3 = vector.load %arg4[%c0_3, %c0_4] : memref<1x256xf32, #tpu.memory_space<vmem>>, vector<1x256xf32>
    %4 = vector.broadcast %3 : vector<1x256xf32> to vector<16x256xf32>
    %5 = arith.addf %2, %4 : vector<16x256xf32>
    %6 = arith.truncf %5 : vector<16x256xf32> to vector<16x256xbf16>
    %c0_5 = arith.constant 0 : index
    %c0_6 = arith.constant 0 : index
    %7 = vector.load %arg5[%c0_5, %c0_6] : memref<16x256xbf16, #tpu.memory_space<vmem>>, vector<16x256xbf16>
    tpu.vector_store %arg5[%c0_5, %c0_6], %6 {strides = array<i32>} : memref<16x256xbf16, #tpu.memory_space<vmem>>, vector<16x256xbf16>,
    return
  }
  func.func @transform_0(%arg0: i32, %arg1: i32) -> (i32, i32) {
    %c0_i32 = arith.constant 0 : i32
    %c0_i32_0 = arith.constant 0 : i32
    return %arg0, %c0_i32 : i32, i32
  }
  func.func @transform_1(%arg0: i32, %arg1: i32) -> (i32, i32) {
    %c0_i32 = arith.constant 0 : i32
    %c0_i32_0 = arith.constant 0 : i32
    return %c0_i32, %arg1 : i32, i32
  }
  func.func @transform_2(%arg0: i32, %arg1: i32) -> (i32, i32) {
    %c0_i32 = arith.constant 0 : i32
    %c0_i32_0 = arith.constant 0 : i32
    return %c0_i32, %arg1 : i32, i32
  }
  func.func @transform_3(%arg0: i32, %arg1: i32) -> (i32, i32) {
    %c0_i32 = arith.constant 0 : i32
    return %arg0, %arg1 : i32, i32
  }
}

module attributes {stable_mosaic.version = 11 : i64} {
  func.func @_mha_kernel(%arg0: i32, %arg1: i32, %arg2: i32, %arg3: memref<1x8x256xbf16, #tpu.memory_space<vmem>>, %arg4: memref<1x8x256xbf16, #tpu.memory_space<vmem>>, %arg5: memref<1x8x256xbf16, #tpu.memory_space<vmem>>, %arg6: memref<1x8x256xbf16, #tpu.memory_space<vmem>>) attributes {dimension_semantics = [#tpu.dimension_semantics<parallel>, #tpu.dimension_semantics<parallel>, #tpu.dimension_semantics<parallel>], iteration_bounds = array<i64: 2, 1, 1>, scalar_prefetch = 0 : i64, scratch_operands = 0 : i64, tpu.core_type = #tpu.core_type<tc>, window_params = [{transform_indices = @transform_0, window_bounds = array<i64: 1, 8, 256>}, {transform_indices = @transform_1, window_bounds = array<i64: 1, 8, 256>}, {transform_indices = @transform_2, window_bounds = array<i64: 1, 8, 256>}, {transform_indices = @transform_3, window_bounds = array<i64: 1, 8, 256>}]} {
    %c8_i32 = arith.constant 8 : i32
    %0 = arith.muli %arg2, %c8_i32 : i32
    %1 = tpu.iota {dimensions = array<i32: 0>} : vector<8x8xi32>
    %2 = vector.broadcast %0 : i32 to vector<8x8xi32>
    %3 = arith.addi %1, %2 : vector<8x8xi32>
    %4 = tpu.iota {dimensions = array<i32: 1>} : vector<8x8xi32>
    %5 = arith.cmpi sle, %4, %3 : vector<8x8xi32>
    %c0 = arith.constant 0 : index
    %c0_0 = arith.constant 0 : index
    %c0_1 = arith.constant 0 : index
    %6 = vector.load %arg3[%c0, %c0_0, %c0_1] : memref<1x8x256xbf16, #tpu.memory_space<vmem>>, vector<1x8x128xbf16>
    %7 = vector.shape_cast %6 : vector<1x8x128xbf16> to vector<8x128xbf16>
    %c0_2 = arith.constant 0 : index
    %c0_3 = arith.constant 0 : index
    %c0_4 = arith.constant 0 : index
    %8 = vector.load %arg4[%c0_2, %c0_3, %c0_4] : memref<1x8x256xbf16, #tpu.memory_space<vmem>>, vector<1x8x128xbf16>
    %9 = vector.shape_cast %8 : vector<1x8x128xbf16> to vector<8x128xbf16>
    %c0_5 = arith.constant 0 : index
    %c0_6 = arith.constant 0 : index
    %c0_7 = arith.constant 0 : index
    %10 = vector.load %arg5[%c0_5, %c0_6, %c0_7] : memref<1x8x256xbf16, #tpu.memory_space<vmem>>, vector<1x8x128xbf16>
    %11 = vector.shape_cast %10 : vector<1x8x128xbf16> to vector<8x128xbf16>
    %cst = arith.constant dense<0.000000e+00> : vector<8x8xf32>
    %12 = tpu.matmul %7, %9, %cst {dimension_numbers = #tpu.dot_dimension_numbers<[1], [1], [0], [0], [0, 0, 1, 0], [], []>} : vector<8x128xbf16>, vector<8x128xbf16>, vector<8x8xf32> -> vector<8x8xf32>
    %cst_8 = arith.constant 0.0883883461 : f32
    %13 = vector.broadcast %cst_8 : f32 to vector<8x8xf32>
    %14 = arith.mulf %12, %13 : vector<8x8xf32>
    %cst_9 = arith.constant -1.000000e+09 : f32
    %15 = vector.broadcast %cst_9 : f32 to vector<8x8xf32>
    %16 = arith.select %5, %14, %15 : vector<8x8xi1>, vector<8x8xf32>
    %cst_10 = arith.constant dense<0xFF800000> : vector<8xf32>
    %17 = vector.multi_reduction <maximumf>, %16, %cst_10 [1] : vector<8x8xf32> to vector<8xf32>
    %18 = vector.shape_cast %17 : vector<8xf32> to vector<8x1xf32>
    %19 = vector.broadcast %18 : vector<8x1xf32> to vector<8x8xf32>
    %20 = arith.subf %16, %19 : vector<8x8xf32>
    %21 = math.exp %20 : vector<8x8xf32>
    %cst_11 = arith.constant dense<0.000000e+00> : vector<8xf32>
    %22 = vector.multi_reduction <add>, %21, %cst_11 [1] : vector<8x8xf32> to vector<8xf32>
    %23 = vector.shape_cast %22 : vector<8xf32> to vector<8x1xf32>
    %24 = tpu.reciprocal %23 {approx = true} : vector<8x1xf32> -> vector<8x1xf32>
    %25 = vector.broadcast %24 : vector<8x1xf32> to vector<8x8xf32>
    %26 = arith.mulf %21, %25 : vector<8x8xf32>
    %27 = arith.truncf %26 : vector<8x8xf32> to vector<8x8xbf16>
    %cst_12 = arith.constant dense<0.000000e+00> : vector<8x128xf32>
    %28 = tpu.matmul %27, %11, %cst_12 {dimension_numbers = #tpu.dot_dimension_numbers<[1], [0], [0], [1], [0, 0, 1, 1], [], []>} : vector<8x8xbf16>, vector<8x128xbf16>, vector<8x128xf32> -> vector<8x128xf32>
    %29 = arith.truncf %28 : vector<8x128xf32> to vector<8x128xbf16>
    %c0_13 = arith.constant 0 : index
    %c0_14 = arith.constant 0 : index
    %c0_15 = arith.constant 0 : index
    %30 = vector.load %arg6[%c0_13, %c0_14, %c0_15] : memref<1x8x256xbf16, #tpu.memory_space<vmem>>, vector<1x8x128xbf16>
    %31 = vector.shape_cast %30 : vector<1x8x128xbf16> to vector<8x128xbf16>
    %32 = vector.shape_cast %29 : vector<8x128xbf16> to vector<1x8x128xbf16>
    tpu.vector_store %arg6[%c0_13, %c0_14, %c0_15], %32 {strides = array<i32>} : memref<1x8x256xbf16, #tpu.memory_space<vmem>>, vector<1x8x128xbf16>,
    %c0_16 = arith.constant 0 : index
    %c0_17 = arith.constant 0 : index
    %c128 = arith.constant 128 : index
    %33 = vector.load %arg3[%c0_16, %c0_17, %c128] : memref<1x8x256xbf16, #tpu.memory_space<vmem>>, vector<1x8x128xbf16>
    %34 = vector.shape_cast %33 : vector<1x8x128xbf16> to vector<8x128xbf16>
    %c0_18 = arith.constant 0 : index
    %c0_19 = arith.constant 0 : index
    %c128_20 = arith.constant 128 : index
    %35 = vector.load %arg4[%c0_18, %c0_19, %c128_20] : memref<1x8x256xbf16, #tpu.memory_space<vmem>>, vector<1x8x128xbf16>
    %36 = vector.shape_cast %35 : vector<1x8x128xbf16> to vector<8x128xbf16>
    %c0_21 = arith.constant 0 : index
    %c0_22 = arith.constant 0 : index
    %c128_23 = arith.constant 128 : index
    %37 = vector.load %arg5[%c0_21, %c0_22, %c128_23] : memref<1x8x256xbf16, #tpu.memory_space<vmem>>, vector<1x8x128xbf16>
    %38 = vector.shape_cast %37 : vector<1x8x128xbf16> to vector<8x128xbf16>
    %cst_24 = arith.constant dense<0.000000e+00> : vector<8x8xf32>
    %39 = tpu.matmul %34, %36, %cst_24 {dimension_numbers = #tpu.dot_dimension_numbers<[1], [1], [0], [0], [0, 0, 1, 0], [], []>} : vector<8x128xbf16>, vector<8x128xbf16>, vector<8x8xf32> -> vector<8x8xf32>
    %cst_25 = arith.constant 0.0883883461 : f32
    %40 = vector.broadcast %cst_25 : f32 to vector<8x8xf32>
    %41 = arith.mulf %39, %40 : vector<8x8xf32>
    %cst_26 = arith.constant -1.000000e+09 : f32
    %42 = vector.broadcast %cst_26 : f32 to vector<8x8xf32>
    %43 = arith.select %5, %41, %42 : vector<8x8xi1>, vector<8x8xf32>
    %cst_27 = arith.constant dense<0xFF800000> : vector<8xf32>
    %44 = vector.multi_reduction <maximumf>, %43, %cst_27 [1] : vector<8x8xf32> to vector<8xf32>
    %45 = vector.shape_cast %44 : vector<8xf32> to vector<8x1xf32>
    %46 = vector.broadcast %45 : vector<8x1xf32> to vector<8x8xf32>
    %47 = arith.subf %43, %46 : vector<8x8xf32>
    %48 = math.exp %47 : vector<8x8xf32>
    %cst_28 = arith.constant dense<0.000000e+00> : vector<8xf32>
    %49 = vector.multi_reduction <add>, %48, %cst_28 [1] : vector<8x8xf32> to vector<8xf32>
    %50 = vector.shape_cast %49 : vector<8xf32> to vector<8x1xf32>
    %51 = tpu.reciprocal %50 {approx = true} : vector<8x1xf32> -> vector<8x1xf32>
    %52 = vector.broadcast %51 : vector<8x1xf32> to vector<8x8xf32>
    %53 = arith.mulf %48, %52 : vector<8x8xf32>
    %54 = arith.truncf %53 : vector<8x8xf32> to vector<8x8xbf16>
    %cst_29 = arith.constant dense<0.000000e+00> : vector<8x128xf32>
    %55 = tpu.matmul %54, %38, %cst_29 {dimension_numbers = #tpu.dot_dimension_numbers<[1], [0], [0], [1], [0, 0, 1, 1], [], []>} : vector<8x8xbf16>, vector<8x128xbf16>, vector<8x128xf32> -> vector<8x128xf32>
    %56 = arith.truncf %55 : vector<8x128xf32> to vector<8x128xbf16>
    %c0_30 = arith.constant 0 : index
    %c0_31 = arith.constant 0 : index
    %c128_32 = arith.constant 128 : index
    %57 = vector.load %arg6[%c0_30, %c0_31, %c128_32] : memref<1x8x256xbf16, #tpu.memory_space<vmem>>, vector<1x8x128xbf16>
    %58 = vector.shape_cast %57 : vector<1x8x128xbf16> to vector<8x128xbf16>
    %59 = vector.shape_cast %56 : vector<8x128xbf16> to vector<1x8x128xbf16>
    tpu.vector_store %arg6[%c0_30, %c0_31, %c128_32], %59 {strides = array<i32>} : memref<1x8x256xbf16, #tpu.memory_space<vmem>>, vector<1x8x128xbf16>,
    return
  }
  func.func @transform_0(%arg0: i32, %arg1: i32, %arg2: i32) -> (i32, i32, i32) {
    %c0_i32 = arith.constant 0 : i32
    %0 = arith.addi %arg1, %c0_i32 : i32
    %c0_i32_0 = arith.constant 0 : i32
    return %arg0, %arg2, %0 : i32, i32, i32
  }
  func.func @transform_1(%arg0: i32, %arg1: i32, %arg2: i32) -> (i32, i32, i32) {
    %c1_i32 = arith.constant 1 : i32
    %0 = arith.addi %arg1, %c1_i32 : i32
    %c0_i32 = arith.constant 0 : i32
    %c0_i32_0 = arith.constant 0 : i32
    return %arg0, %c0_i32, %0 : i32, i32, i32
  }
  func.func @transform_2(%arg0: i32, %arg1: i32, %arg2: i32) -> (i32, i32, i32) {
    %c2_i32 = arith.constant 2 : i32
    %0 = arith.addi %arg1, %c2_i32 : i32
    %c0_i32 = arith.constant 0 : i32
    %c0_i32_0 = arith.constant 0 : i32
    return %arg0, %c0_i32, %0 : i32, i32, i32
  }
  func.func @transform_3(%arg0: i32, %arg1: i32, %arg2: i32) -> (i32, i32, i32) {
    %c0_i32 = arith.constant 0 : i32
    return %arg0, %arg2, %arg1 : i32, i32, i32
  }
}

module attributes {stable_mosaic.version = 11 : i64} {
  func.func @_linear_kernel(%arg0: i32, %arg1: i32, %arg2: memref<16x256xbf16, #tpu.memory_space<vmem>>, %arg3: memref<256x256xbf16, #tpu.memory_space<vmem>>, %arg4: memref<1x256xf32, #tpu.memory_space<vmem>>, %arg5: memref<16x256xbf16, #tpu.memory_space<vmem>>) attributes {dimension_semantics = [#tpu.dimension_semantics<parallel>, #tpu.dimension_semantics<parallel>], iteration_bounds = array<i64: 1, 1>, scalar_prefetch = 0 : i64, scratch_operands = 0 : i64, tpu.core_type = #tpu.core_type<tc>, window_params = [{transform_indices = @transform_0, window_bounds = array<i64: 16, 256>}, {transform_indices = @transform_1, window_bounds = array<i64: 256, 256>}, {transform_indices = @transform_2, window_bounds = array<i64: 1, 256>}, {transform_indices = @transform_3, window_bounds = array<i64: 16, 256>}]} {
    %c0 = arith.constant 0 : index
    %c0_0 = arith.constant 0 : index
    %0 = vector.load %arg2[%c0, %c0_0] : memref<16x256xbf16, #tpu.memory_space<vmem>>, vector<16x256xbf16>
    %c0_1 = arith.constant 0 : index
    %c0_2 = arith.constant 0 : index
    %1 = vector.load %arg3[%c0_1, %c0_2] : memref<256x256xbf16, #tpu.memory_space<vmem>>, vector<256x256xbf16>
    %cst = arith.constant dense<0.000000e+00> : vector<16x256xf32>
    %2 = tpu.matmul %0, %1, %cst {dimension_numbers = #tpu.dot_dimension_numbers<[1], [0], [0], [1], [0, 0, 1, 1], [], []>} : vector<16x256xbf16>, vector<256x256xbf16>, vector<16x256xf32> -> vector<16x256xf32>
    %c0_3 = arith.constant 0 : index
    %c0_4 = arith.constant 0 : index
    %3 = vector.load %arg4[%c0_3, %c0_4] : memref<1x256xf32, #tpu.memory_space<vmem>>, vector<1x256xf32>
    %4 = vector.broadcast %3 : vector<1x256xf32> to vector<16x256xf32>
    %5 = arith.addf %2, %4 : vector<16x256xf32>
    %6 = arith.truncf %5 : vector<16x256xf32> to vector<16x256xbf16>
    %c0_5 = arith.constant 0 : index
    %c0_6 = arith.constant 0 : index
    %7 = vector.load %arg5[%c0_5, %c0_6] : memref<16x256xbf16, #tpu.memory_space<vmem>>, vector<16x256xbf16>
    tpu.vector_store %arg5[%c0_5, %c0_6], %6 {strides = array<i32>} : memref<16x256xbf16, #tpu.memory_space<vmem>>, vector<16x256xbf16>,
    return
  }
  func.func @transform_0(%arg0: i32, %arg1: i32) -> (i32, i32) {
    %c0_i32 = arith.constant 0 : i32
    %c0_i32_0 = arith.constant 0 : i32
    return %arg0, %c0_i32 : i32, i32
  }
  func.func @transform_1(%arg0: i32, %arg1: i32) -> (i32, i32) {
    %c0_i32 = arith.constant 0 : i32
    %c0_i32_0 = arith.constant 0 : i32
    return %c0_i32, %arg1 : i32, i32
  }
  func.func @transform_2(%arg0: i32, %arg1: i32) -> (i32, i32) {
    %c0_i32 = arith.constant 0 : i32
    %c0_i32_0 = arith.constant 0 : i32
    return %c0_i32, %arg1 : i32, i32
  }
  func.func @transform_3(%arg0: i32, %arg1: i32) -> (i32, i32) {
    %c0_i32 = arith.constant 0 : i32
    return %arg0, %arg1 : i32, i32
  }
}

module attributes {stable_mosaic.version = 11 : i64} {
  func.func @_linear_kernel(%arg0: i32, %arg1: i32, %arg2: memref<16x256xbf16, #tpu.memory_space<vmem>>, %arg3: memref<256x256xbf16, #tpu.memory_space<vmem>>, %arg4: memref<1x256xf32, #tpu.memory_space<vmem>>, %arg5: memref<16x256xbf16, #tpu.memory_space<vmem>>) attributes {dimension_semantics = [#tpu.dimension_semantics<parallel>, #tpu.dimension_semantics<parallel>], iteration_bounds = array<i64: 1, 2>, scalar_prefetch = 0 : i64, scratch_operands = 0 : i64, tpu.core_type = #tpu.core_type<tc>, window_params = [{transform_indices = @transform_0, window_bounds = array<i64: 16, 256>}, {transform_indices = @transform_1, window_bounds = array<i64: 256, 256>}, {transform_indices = @transform_2, window_bounds = array<i64: 1, 256>}, {transform_indices = @transform_3, window_bounds = array<i64: 16, 256>}]} {
    %c0 = arith.constant 0 : index
    %c0_0 = arith.constant 0 : index
    %0 = vector.load %arg2[%c0, %c0_0] : memref<16x256xbf16, #tpu.memory_space<vmem>>, vector<16x256xbf16>
    %c0_1 = arith.constant 0 : index
    %c0_2 = arith.constant 0 : index
    %1 = vector.load %arg3[%c0_1, %c0_2] : memref<256x256xbf16, #tpu.memory_space<vmem>>, vector<256x256xbf16>
    %cst = arith.constant dense<0.000000e+00> : vector<16x256xf32>
    %2 = tpu.matmul %0, %1, %cst {dimension_numbers = #tpu.dot_dimension_numbers<[1], [0], [0], [1], [0, 0, 1, 1], [], []>} : vector<16x256xbf16>, vector<256x256xbf16>, vector<16x256xf32> -> vector<16x256xf32>
    %c0_3 = arith.constant 0 : index
    %c0_4 = arith.constant 0 : index
    %3 = vector.load %arg4[%c0_3, %c0_4] : memref<1x256xf32, #tpu.memory_space<vmem>>, vector<1x256xf32>
    %4 = vector.broadcast %3 : vector<1x256xf32> to vector<16x256xf32>
    %5 = arith.addf %2, %4 : vector<16x256xf32>
    %6 = arith.truncf %5 : vector<16x256xf32> to vector<16x256xbf16>
    %c0_5 = arith.constant 0 : index
    %c0_6 = arith.constant 0 : index
    %7 = vector.load %arg5[%c0_5, %c0_6] : memref<16x256xbf16, #tpu.memory_space<vmem>>, vector<16x256xbf16>
    tpu.vector_store %arg5[%c0_5, %c0_6], %6 {strides = array<i32>} : memref<16x256xbf16, #tpu.memory_space<vmem>>, vector<16x256xbf16>,
    return
  }
  func.func @transform_0(%arg0: i32, %arg1: i32) -> (i32, i32) {
    %c0_i32 = arith.constant 0 : i32
    %c0_i32_0 = arith.constant 0 : i32
    return %arg0, %c0_i32 : i32, i32
  }
  func.func @transform_1(%arg0: i32, %arg1: i32) -> (i32, i32) {
    %c0_i32 = arith.constant 0 : i32
    %c0_i32_0 = arith.constant 0 : i32
    return %c0_i32, %arg1 : i32, i32
  }
  func.func @transform_2(%arg0: i32, %arg1: i32) -> (i32, i32) {
    %c0_i32 = arith.constant 0 : i32
    %c0_i32_0 = arith.constant 0 : i32
    return %c0_i32, %arg1 : i32, i32
  }
  func.func @transform_3(%arg0: i32, %arg1: i32) -> (i32, i32) {
    %c0_i32 = arith.constant 0 : i32
    return %arg0, %arg1 : i32, i32
  }
}

module attributes {stable_mosaic.version = 11 : i64} {
  func.func @_mha_kernel(%arg0: i32, %arg1: i32, %arg2: i32, %arg3: memref<1x8x256xbf16, #tpu.memory_space<vmem>>, %arg4: memref<1x8x256xbf16, #tpu.memory_space<vmem>>, %arg5: memref<1x8x256xbf16, #tpu.memory_space<vmem>>, %arg6: memref<1x1x8xf32, #tpu.memory_space<vmem>>, %arg7: memref<1x8x256xbf16, #tpu.memory_space<vmem>>) attributes {dimension_semantics = [#tpu.dimension_semantics<parallel>, #tpu.dimension_semantics<parallel>, #tpu.dimension_semantics<parallel>], iteration_bounds = array<i64: 2, 1, 1>, scalar_prefetch = 0 : i64, scratch_operands = 0 : i64, tpu.core_type = #tpu.core_type<tc>, window_params = [{transform_indices = @transform_0, window_bounds = array<i64: 1, 8, 256>}, {transform_indices = @transform_1, window_bounds = array<i64: 1, 8, 256>}, {transform_indices = @transform_2, window_bounds = array<i64: 1, 8, 256>}, {transform_indices = @transform_3, window_bounds = array<i64: 1, 1, 8>}, {transform_indices = @transform_4, window_bounds = array<i64: 1, 8, 256>}]} {
    %c0 = arith.constant 0 : index
    %c0_0 = arith.constant 0 : index
    %c0_1 = arith.constant 0 : index
    %0 = vector.load %arg6[%c0, %c0_0, %c0_1] : memref<1x1x8xf32, #tpu.memory_space<vmem>>, vector<1x1x8xf32>
    %1 = vector.shape_cast %0 : vector<1x1x8xf32> to vector<1x8xf32>
    %c0_2 = arith.constant 0 : index
    %c0_3 = arith.constant 0 : index
    %c0_4 = arith.constant 0 : index
    %2 = vector.load %arg3[%c0_2, %c0_3, %c0_4] : memref<1x8x256xbf16, #tpu.memory_space<vmem>>, vector<1x8x128xbf16>
    %3 = vector.shape_cast %2 : vector<1x8x128xbf16> to vector<8x128xbf16>
    %c0_5 = arith.constant 0 : index
    %c0_6 = arith.constant 0 : index
    %c0_7 = arith.constant 0 : index
    %4 = vector.load %arg4[%c0_5, %c0_6, %c0_7] : memref<1x8x256xbf16, #tpu.memory_space<vmem>>, vector<1x8x128xbf16>
    %5 = vector.shape_cast %4 : vector<1x8x128xbf16> to vector<8x128xbf16>
    %c0_8 = arith.constant 0 : index
    %c0_9 = arith.constant 0 : index
    %c0_10 = arith.constant 0 : index
    %6 = vector.load %arg5[%c0_8, %c0_9, %c0_10] : memref<1x8x256xbf16, #tpu.memory_space<vmem>>, vector<1x8x128xbf16>
    %7 = vector.shape_cast %6 : vector<1x8x128xbf16> to vector<8x128xbf16>
    %cst = arith.constant dense<0.000000e+00> : vector<8x8xf32>
    %8 = tpu.matmul %3, %5, %cst {dimension_numbers = #tpu.dot_dimension_numbers<[1], [1], [0], [0], [0, 0, 1, 0], [], []>} : vector<8x128xbf16>, vector<8x128xbf16>, vector<8x8xf32> -> vector<8x8xf32>
    %cst_11 = arith.constant 0.0883883461 : f32
    %9 = vector.broadcast %cst_11 : f32 to vector<8x8xf32>
    %10 = arith.mulf %8, %9 : vector<8x8xf32>
    %11 = vector.broadcast %1 : vector<1x8xf32> to vector<8x8xf32>
    %12 = arith.addf %10, %11 : vector<8x8xf32>
    %cst_12 = arith.constant dense<0xFF800000> : vector<8xf32>
    %13 = vector.multi_reduction <maximumf>, %12, %cst_12 [1] : vector<8x8xf32> to vector<8xf32>
    %14 = vector.shape_cast %13 : vector<8xf32> to vector<8x1xf32>
    %15 = vector.broadcast %14 : vector<8x1xf32> to vector<8x8xf32>
    %16 = arith.subf %12, %15 : vector<8x8xf32>
    %17 = math.exp %16 : vector<8x8xf32>
    %cst_13 = arith.constant dense<0.000000e+00> : vector<8xf32>
    %18 = vector.multi_reduction <add>, %17, %cst_13 [1] : vector<8x8xf32> to vector<8xf32>
    %19 = vector.shape_cast %18 : vector<8xf32> to vector<8x1xf32>
    %20 = tpu.reciprocal %19 {approx = true} : vector<8x1xf32> -> vector<8x1xf32>
    %21 = vector.broadcast %20 : vector<8x1xf32> to vector<8x8xf32>
    %22 = arith.mulf %17, %21 : vector<8x8xf32>
    %23 = arith.truncf %22 : vector<8x8xf32> to vector<8x8xbf16>
    %cst_14 = arith.constant dense<0.000000e+00> : vector<8x128xf32>
    %24 = tpu.matmul %23, %7, %cst_14 {dimension_numbers = #tpu.dot_dimension_numbers<[1], [0], [0], [1], [0, 0, 1, 1], [], []>} : vector<8x8xbf16>, vector<8x128xbf16>, vector<8x128xf32> -> vector<8x128xf32>
    %25 = arith.truncf %24 : vector<8x128xf32> to vector<8x128xbf16>
    %c0_15 = arith.constant 0 : index
    %c0_16 = arith.constant 0 : index
    %c0_17 = arith.constant 0 : index
    %26 = vector.load %arg7[%c0_15, %c0_16, %c0_17] : memref<1x8x256xbf16, #tpu.memory_space<vmem>>, vector<1x8x128xbf16>
    %27 = vector.shape_cast %26 : vector<1x8x128xbf16> to vector<8x128xbf16>
    %28 = vector.shape_cast %25 : vector<8x128xbf16> to vector<1x8x128xbf16>
    tpu.vector_store %arg7[%c0_15, %c0_16, %c0_17], %28 {strides = array<i32>} : memref<1x8x256xbf16, #tpu.memory_space<vmem>>, vector<1x8x128xbf16>,
    %c0_18 = arith.constant 0 : index
    %c0_19 = arith.constant 0 : index
    %c128 = arith.constant 128 : index
    %29 = vector.load %arg3[%c0_18, %c0_19, %c128] : memref<1x8x256xbf16, #tpu.memory_space<vmem>>, vector<1x8x128xbf16>
    %30 = vector.shape_cast %29 : vector<1x8x128xbf16> to vector<8x128xbf16>
    %c0_20 = arith.constant 0 : index
    %c0_21 = arith.constant 0 : index
    %c128_22 = arith.constant 128 : index
    %31 = vector.load %arg4[%c0_20, %c0_21, %c128_22] : memref<1x8x256xbf16, #tpu.memory_space<vmem>>, vector<1x8x128xbf16>
    %32 = vector.shape_cast %31 : vector<1x8x128xbf16> to vector<8x128xbf16>
    %c0_23 = arith.constant 0 : index
    %c0_24 = arith.constant 0 : index
    %c128_25 = arith.constant 128 : index
    %33 = vector.load %arg5[%c0_23, %c0_24, %c128_25] : memref<1x8x256xbf16, #tpu.memory_space<vmem>>, vector<1x8x128xbf16>
    %34 = vector.shape_cast %33 : vector<1x8x128xbf16> to vector<8x128xbf16>
    %cst_26 = arith.constant dense<0.000000e+00> : vector<8x8xf32>
    %35 = tpu.matmul %30, %32, %cst_26 {dimension_numbers = #tpu.dot_dimension_numbers<[1], [1], [0], [0], [0, 0, 1, 0], [], []>} : vector<8x128xbf16>, vector<8x128xbf16>, vector<8x8xf32> -> vector<8x8xf32>
    %cst_27 = arith.constant 0.0883883461 : f32
    %36 = vector.broadcast %cst_27 : f32 to vector<8x8xf32>
    %37 = arith.mulf %35, %36 : vector<8x8xf32>
    %38 = vector.broadcast %1 : vector<1x8xf32> to vector<8x8xf32>
    %39 = arith.addf %37, %38 : vector<8x8xf32>
    %cst_28 = arith.constant dense<0xFF800000> : vector<8xf32>
    %40 = vector.multi_reduction <maximumf>, %39, %cst_28 [1] : vector<8x8xf32> to vector<8xf32>
    %41 = vector.shape_cast %40 : vector<8xf32> to vector<8x1xf32>
    %42 = vector.broadcast %41 : vector<8x1xf32> to vector<8x8xf32>
    %43 = arith.subf %39, %42 : vector<8x8xf32>
    %44 = math.exp %43 : vector<8x8xf32>
    %cst_29 = arith.constant dense<0.000000e+00> : vector<8xf32>
    %45 = vector.multi_reduction <add>, %44, %cst_29 [1] : vector<8x8xf32> to vector<8xf32>
    %46 = vector.shape_cast %45 : vector<8xf32> to vector<8x1xf32>
    %47 = tpu.reciprocal %46 {approx = true} : vector<8x1xf32> -> vector<8x1xf32>
    %48 = vector.broadcast %47 : vector<8x1xf32> to vector<8x8xf32>
    %49 = arith.mulf %44, %48 : vector<8x8xf32>
    %50 = arith.truncf %49 : vector<8x8xf32> to vector<8x8xbf16>
    %cst_30 = arith.constant dense<0.000000e+00> : vector<8x128xf32>
    %51 = tpu.matmul %50, %34, %cst_30 {dimension_numbers = #tpu.dot_dimension_numbers<[1], [0], [0], [1], [0, 0, 1, 1], [], []>} : vector<8x8xbf16>, vector<8x128xbf16>, vector<8x128xf32> -> vector<8x128xf32>
    %52 = arith.truncf %51 : vector<8x128xf32> to vector<8x128xbf16>
    %c0_31 = arith.constant 0 : index
    %c0_32 = arith.constant 0 : index
    %c128_33 = arith.constant 128 : index
    %53 = vector.load %arg7[%c0_31, %c0_32, %c128_33] : memref<1x8x256xbf16, #tpu.memory_space<vmem>>, vector<1x8x128xbf16>
    %54 = vector.shape_cast %53 : vector<1x8x128xbf16> to vector<8x128xbf16>
    %55 = vector.shape_cast %52 : vector<8x128xbf16> to vector<1x8x128xbf16>
    tpu.vector_store %arg7[%c0_31, %c0_32, %c128_33], %55 {strides = array<i32>} : memref<1x8x256xbf16, #tpu.memory_space<vmem>>, vector<1x8x128xbf16>,
    return
  }
  func.func @transform_0(%arg0: i32, %arg1: i32, %arg2: i32) -> (i32, i32, i32) {
    %c0_i32 = arith.constant 0 : i32
    %0 = arith.addi %arg1, %c0_i32 : i32
    %c0_i32_0 = arith.constant 0 : i32
    return %arg0, %arg2, %0 : i32, i32, i32
  }
  func.func @transform_1(%arg0: i32, %arg1: i32, %arg2: i32) -> (i32, i32, i32) {
    %c0_i32 = arith.constant 0 : i32
    %0 = arith.addi %arg1, %c0_i32 : i32
    %c0_i32_0 = arith.constant 0 : i32
    %c0_i32_1 = arith.constant 0 : i32
    return %arg0, %c0_i32_0, %0 : i32, i32, i32
  }
  func.func @transform_2(%arg0: i32, %arg1: i32, %arg2: i32) -> (i32, i32, i32) {
    %c1_i32 = arith.constant 1 : i32
    %0 = arith.addi %arg1, %c1_i32 : i32
    %c0_i32 = arith.constant 0 : i32
    %c0_i32_0 = arith.constant 0 : i32
    return %arg0, %c0_i32, %0 : i32, i32, i32
  }
  func.func @transform_3(%arg0: i32, %arg1: i32, %arg2: i32) -> (i32, i32, i32) {
    %c0_i32 = arith.constant 0 : i32
    %c0_i32_0 = arith.constant 0 : i32
    %c0_i32_1 = arith.constant 0 : i32
    return %arg0, %c0_i32, %c0_i32_0 : i32, i32, i32
  }
  func.func @transform_4(%arg0: i32, %arg1: i32, %arg2: i32) -> (i32, i32, i32) {
    %c0_i32 = arith.constant 0 : i32
    return %arg0, %arg2, %arg1 : i32, i32, i32
  }
}

module attributes {stable_mosaic.version = 11 : i64} {
  func.func @_linear_kernel(%arg0: i32, %arg1: i32, %arg2: memref<16x256xbf16, #tpu.memory_space<vmem>>, %arg3: memref<256x256xbf16, #tpu.memory_space<vmem>>, %arg4: memref<1x256xf32, #tpu.memory_space<vmem>>, %arg5: memref<16x256xf32, #tpu.memory_space<vmem>>) attributes {dimension_semantics = [#tpu.dimension_semantics<parallel>, #tpu.dimension_semantics<parallel>], iteration_bounds = array<i64: 1, 2>, scalar_prefetch = 0 : i64, scratch_operands = 0 : i64, tpu.core_type = #tpu.core_type<tc>, window_params = [{transform_indices = @transform_0, window_bounds = array<i64: 16, 256>}, {transform_indices = @transform_1, window_bounds = array<i64: 256, 256>}, {transform_indices = @transform_2, window_bounds = array<i64: 1, 256>}, {transform_indices = @transform_3, window_bounds = array<i64: 16, 256>}]} {
    %c0 = arith.constant 0 : index
    %c0_0 = arith.constant 0 : index
    %0 = vector.load %arg2[%c0, %c0_0] : memref<16x256xbf16, #tpu.memory_space<vmem>>, vector<16x256xbf16>
    %c0_1 = arith.constant 0 : index
    %c0_2 = arith.constant 0 : index
    %1 = vector.load %arg3[%c0_1, %c0_2] : memref<256x256xbf16, #tpu.memory_space<vmem>>, vector<256x256xbf16>
    %cst = arith.constant dense<0.000000e+00> : vector<16x256xf32>
    %2 = tpu.matmul %0, %1, %cst {dimension_numbers = #tpu.dot_dimension_numbers<[1], [1], [0], [0], [0, 0, 1, 0], [], []>} : vector<16x256xbf16>, vector<256x256xbf16>, vector<16x256xf32> -> vector<16x256xf32>
    %c0_3 = arith.constant 0 : index
    %c0_4 = arith.constant 0 : index
    %3 = vector.load %arg4[%c0_3, %c0_4] : memref<1x256xf32, #tpu.memory_space<vmem>>, vector<1x256xf32>
    %4 = vector.broadcast %3 : vector<1x256xf32> to vector<16x256xf32>
    %5 = arith.addf %2, %4 : vector<16x256xf32>
    %c0_5 = arith.constant 0 : index
    %c0_6 = arith.constant 0 : index
    %6 = vector.load %arg5[%c0_5, %c0_6] : memref<16x256xf32, #tpu.memory_space<vmem>>, vector<16x256xf32>
    tpu.vector_store %arg5[%c0_5, %c0_6], %5 {strides = array<i32>} : memref<16x256xf32, #tpu.memory_space<vmem>>, vector<16x256xf32>,
    return
  }
  func.func @transform_0(%arg0: i32, %arg1: i32) -> (i32, i32) {
    %c0_i32 = arith.constant 0 : i32
    %c0_i32_0 = arith.constant 0 : i32
    return %arg0, %c0_i32 : i32, i32
  }
  func.func @transform_1(%arg0: i32, %arg1: i32) -> (i32, i32) {
    %c0_i32 = arith.constant 0 : i32
    %c0_i32_0 = arith.constant 0 : i32
    return %arg1, %c0_i32 : i32, i32
  }
  func.func @transform_2(%arg0: i32, %arg1: i32) -> (i32, i32) {
    %c0_i32 = arith.constant 0 : i32
    %c0_i32_0 = arith.constant 0 : i32
    return %c0_i32, %arg1 : i32, i32
  }
  func.func @transform_3(%arg0: i32, %arg1: i32) -> (i32, i32) {
    %c0_i32 = arith.constant 0 : i32
    return %arg0, %arg1 : i32, i32
  }
}

</mosaic_0001>

<bundles_post_ra>
// kernel: bart_forward.32
= control target key start
LH: loop header
LB: loop body
LE: loop exit
PB: predicated region body
PF: predicated region fallthrough
CT: control target
= control target key end

     0   :  { %8 = vsyncpa [#allocation3], 0  ;;  %s1117_s0 = inlined_call_operand.vmem [shape: bf16[16,256], index: 0, kind: input, shape index: {}]   ;;  %s1118_s1 = inlined_call_operand.hbm [shape: bf16[256,768], index: 1, kind: input, shape index: {}]   ;;  %s1119_s2 = inlined_call_operand.vmem [shape: f32[1,768], index: 2, kind: input, shape index: {}]   ;;  %s1120_s3 = inlined_call_operand.vmem [shape: bf16[16,768], index: 3, kind: output, shape index: {}]  }
   0x1   :  { %10 = vsyncpa [#allocation3 + $0x1], 0  ;;  %s937_s12 = smov 0   ;;  %s939_s13 = smov 0  }
   0x2   :  { %s941_s14 = smov 0   ;;  %s943_s15 = smov 0  }
   0x3   :  { %s945_s16 = smov 0   ;;  %s947_s17 = smov 0  }
   0x4 LB: > { %s665_s18 = sadd.s32 4294967295, %s911_s17   ;;  %s25_s19 = sadd.s32 1, %s907_s16  ;;  %s911_s17 = sphi %s947_s17, %s16_s17   ;;  %s907_s16 = sphi %s945_s16, %s1131_s16   ;;  %s903_s15 = sphi %s943_s15, %s1130_s15   ;;  %s899_s14 = sphi %s941_s14, %s1129_s14   ;;  %s895_s13 = sphi %s939_s13, %s1128_s13   ;;  %s891_s12 = sphi %s937_s12, %s1127_s12  }
   0x5   : > { %p26_p0 = scmp.ge.s32.totalorder %s25_s19, 3  ;;  %s61_s20 = sadd.s32 1, %s899_s14 }
   0x6   : > { %p68_p1 = scmp.ne.s32.totalorder %s899_s14, %s895_s13  ;;  %p69_p2 = scmp.eq.s32.totalorder %s911_s17, 0 }
   0x7   : > { %s1133_s19 = smov (%p26_p0, %s25_s19), 0  ;;  %p74_p4 = scmp.ne.s32.totalorder %s895_s13, %s891_s12 }
   0x8   : > { %p973_p3 = por %p69_p2, %p68_p1  ;;  %s58_s22 = ssub.s32 %s907_s16, %s1133_s19 }
   0x9   : > { %p75_p5 = scmp.eq.s32.totalorder %s665_s18, 0  ;;  %p59_p6 = scmp.eq.s32.totalorder %s58_s22, 0 }
   0xa   : > { %p126_p7 = scmp.eq.s32.totalorder %s665_s18, 2  ;;  %p728_p10 = scmp.lt.s32.totalorder %s911_s17, 3 }
   0xb   : > { %p980_p8 = por %p75_p5, %p74_p4  ;;  %s162_s26 = sand.u32 1, %s899_s14  }
   0xc   : > { %s985_s24 = scalar_select %p59_p6, %s899_s14, %s61_s20  }
   0xd   : > { %p987_p9 = por %p126_p7, %p68_p1  ;;  %s718_s27 = sshll.u32 %s907_s16, 7 }
   0xe   : > { %s670_s28 = sshll.u32 %s162_s26, 8  ;;  %s997_s4 = scalar_lea.hbm %s1118_s1, %s718_s27 }
   0xf   : > { %s1123_s25 = scalar_select %p987_p9, 1, 0 }
  0x10   : > { %s166_s5 = scalar_lea.vmem [#allocation2], %s670_s28  ;;  %p1001_p11 = pnand %p728_p10, %p973_p3 }
  0x11   : > { %s173_s6 = sshll.u32 %s166_s5, 4  ;;  %s1008_s8 = scalar_lea.sflag [#allocation3], %s162_s26  ;;  %s1005_s6 = int_to_ptr.vmem [resolvable:$true] %s173_s6 }
  0x12   : > { %s831_s9 = scalar_lea.hbm %s997_s4, 4096  ;;  %p833_p0 = pneg %p1001_p11 }
  0x13   : > { %p832_p13 = scmp.ne.s32.totalorder %s997_s4, %s831_s9  ;;  %s836_s12 = scalar_lea.hbm %s1118_s1, 12288 }
  0x14   : > { %p837_p3 = scmp.lt.u32.totalorder %s997_s4, %s1118_s1  ;;  %p838_p4 = scmp.lt.u32.totalorder %s836_s12, %s831_s9 }
  0x15   : > { %p834_p1 = pnand %p833_p0, %p832_p13  ;;  %p840_p6 = scmp.lt.u32.totalorder %s831_s9, %s997_s4 }
  0x16   : > { %p839_p5 = por %p838_p4, %p837_p3 }
  0x17   : > { %p835_p2 = pneg %p834_p1 }
  0x18   : > { %p841_p7 = por %p840_p6, %p839_p5 }
  0x1a   : > { %p842_p10 = pnand %p841_p7, %p835_p2 }
  0x1c   : > { %845 = shalt.err (!%p842_p10)
}
  0x1d   : > { %s846_s21 = scalar_lea.vmem %s1005_s6, 4096  ;;  %s913_s22 = smov [#allocation2]  }
  0x1e   : > { %p847_p13 = scmp.ne.s32.totalorder %s1005_s6, %s846_s21  ;;  %s851_s26 = sshll.u32 %s913_s22, 4  ;;  %s852_s26 = int_to_ptr.vmem [resolvable:$false] %s851_s26 }
  0x1f   : > { %s853_s27 = scalar_lea.vmem %s852_s26, 8192  ;;  %p854_p9 = scmp.lt.s32.totalorder %s1005_s6, %s852_s26 }
  0x20   : > { %p849_p1 = pnand %p847_p13, %p833_p0  ;;  %p855_p3 = scmp.lt.s32.totalorder %s853_s27, %s846_s21 }
  0x22   : > { %p850_p12 = pneg %p849_p1  ;;  %p856_p4 = por %p855_p3, %p854_p9 }
  0x24   : > { %p857_p5 = pnand %p856_p4, %p850_p12 }
  0x26   : > { %860 = shalt.err (!%p857_p5)
}
  0x27   : > { %s914_s28 = smov 384   ;;  %s915_s29 = smov 128  }
  0x28   : > { %s916_s30 = smov 8   ;;  %p189_p0 = scmp.lt.s32.totalorder %s911_s17, 4 }
  0x29   : > { %727 = dma.hbm_to_vmem [thread:$0]  (!%p1001_p11), %s997_s4, 4096, %s1005_s6, %s1008_s8, %s914_s28, %s915_s29, %s916_s30  }
  0x2a   : > { %p1125_p2 = scmp.ge.s32.totalorder %s911_s17, 1 }
  0x2c   : > { %p190_p6 = pnand %p1125_p2, %p189_p0 }
  0x2d   : > { %s1040_s5 = sand.u32 (!%p190_p6), 1, %s895_s13  }
  0x2e   : > { %193 = sbr.rel (%p190_p6) target bundleno = 347 (0x15b), region = 32  ;;  %s674_s9 = sshll.u32 (!%p190_p6), %s1040_s5, 8 }
  0x2f   : > { %s196_s10 = scalar_lea.sflag (!%p190_p6), [#allocation3], %s1040_s5  ;;  %s1044_s11 = scalar_lea.vmem (!%p190_p6), [#allocation2], %s674_s9 }
  0x35   : > { %886 = dma.done.wait (%p980_p8), %s196_s10, 4096  }
  0x36   : > { %888 = vsyncadd (%p980_p8), %s196_s10, 4294963200  ;;  %v780_v0 = vld [vmem:[%s1044_s11 + $0x4] ss:$8 sps:$4 sm:$0xff]   ;;  %v782_v1 = vld [vmem:[%s1044_s11] ss:$8 sps:$4 sm:$0xff]   ;;  %s676_s8 = sshll.u32 %s903_s15, 1  ;;  %v282_v34 = vlaneseq }
  0x37   : > { %462 = vmatprep.subr.bf16.mxu0 %v780_v0  ;;  %v783_v2 = vld [vmem:[%s1044_s11 + $0x14] ss:$8 sps:$4 sm:$0xff]   ;;  %v785_v3 = vld [vmem:[%s1044_s11 + $0x10] ss:$8 sps:$4 sm:$0xff]   ;;  %v786_v4 = vld [vmem:[%s1044_s11 + $0x24] ss:$8 sps:$4 sm:$0xff]  }
  0x38   : > { %463 = vmatpush1.bf16.msra.mxu0 %v782_v1  ;;  %v788_v5 = vld [vmem:[%s1044_s11 + $0x20] ss:$8 sps:$4 sm:$0xff]   ;;  %v789_v6 = vld [vmem:[%s1044_s11 + $0x34] ss:$8 sps:$4 sm:$0xff]   ;;  %v791_v7 = vld [vmem:[%s1044_s11 + $0x30] ss:$8 sps:$4 sm:$0xff]  }
  0x39   : > { %464 = vmatprep.subr.bf16.mxu0 %v783_v2  ;;  %v792_v8 = vld [vmem:[%s1044_s11 + $0x44] ss:$8 sps:$4 sm:$0xff]   ;;  %v794_v9 = vld [vmem:[%s1044_s11 + $0x40] ss:$8 sps:$4 sm:$0xff]   ;;  %v795_v10 = vld [vmem:[%s1044_s11 + $0x54] ss:$8 sps:$4 sm:$0xff]  }
  0x3a   : > { %v797_v11 = vld [vmem:[%s1044_s11 + $0x50] ss:$8 sps:$4 sm:$0xff]   ;;  %v798_v12 = vld [vmem:[%s1044_s11 + $0x64] ss:$8 sps:$4 sm:$0xff]   ;;  %v800_v14 = vld [vmem:[%s1044_s11 + $0x60] ss:$8 sps:$4 sm:$0xff]  }
  0x3b   : > { %v830_v13 = vld [vmem:[%s1117_s0 + $0x4] ss:$8 sps:$4 sm:$0xff]   ;;  %v801_v15 = vld [vmem:[%s1044_s11 + $0x74] ss:$8 sps:$4 sm:$0xff]   ;;  %v803_v16 = vld [vmem:[%s1044_s11 + $0x70] ss:$8 sps:$4 sm:$0xff]  }
  0x3c   : > { %465 = vmatpush1.bf16.msra.mxu0 %v785_v3  ;;  %494 = vmatprep.mubr.bf16.mxu0 %v830_v13  ;;  %v804_v17 = vld [vmem:[%s1044_s11 + $0x84] ss:$8 sps:$4 sm:$0xff]   ;;  %v806_v18 = vld [vmem:[%s1044_s11 + $0x80] ss:$8 sps:$4 sm:$0xff]   ;;  %v807_v19 = vld [vmem:[%s1044_s11 + $0x94] ss:$8 sps:$4 sm:$0xff]  }
  0x3d   : > { %466 = vmatprep.subr.bf16.mxu0 %v786_v4  ;;  %v809_v20 = vld [vmem:[%s1044_s11 + $0x90] ss:$8 sps:$4 sm:$0xff]   ;;  %v810_v21 = vld [vmem:[%s1044_s11 + $0xa4] ss:$8 sps:$4 sm:$0xff]   ;;  %v812_v22 = vld [vmem:[%s1044_s11 + $0xa0] ss:$8 sps:$4 sm:$0xff]  }
  0x3e   : > { %v813_v23 = vld [vmem:[%s1044_s11 + $0xb4] ss:$8 sps:$4 sm:$0xff]   ;;  %v815_v24 = vld [vmem:[%s1044_s11 + $0xb0] ss:$8 sps:$4 sm:$0xff]   ;;  %v816_v25 = vld [vmem:[%s1044_s11 + $0xc4] ss:$8 sps:$4 sm:$0xff]  }
  0x3f   : > { %v818_v26 = vld [vmem:[%s1044_s11 + $0xc0] ss:$8 sps:$4 sm:$0xff]   ;;  %v819_v27 = vld [vmem:[%s1044_s11 + $0xd4] ss:$8 sps:$4 sm:$0xff]   ;;  %v821_v28 = vld [vmem:[%s1044_s11 + $0xd0] ss:$8 sps:$4 sm:$0xff]  }
  0x40   : > { %467 = vmatpush1.bf16.msra.mxu0 %v788_v5  ;;  %v822_v29 = vld [vmem:[%s1044_s11 + $0xe4] ss:$8 sps:$4 sm:$0xff]   ;;  %v824_v30 = vld [vmem:[%s1044_s11 + $0xe0] ss:$8 sps:$4 sm:$0xff]   ;;  %v825_v31 = vld [vmem:[%s1044_s11 + $0xf4] ss:$8 sps:$4 sm:$0xff]  }
  0x41   : > { %468 = vmatprep.subr.bf16.mxu0 %v789_v6  ;;  %v827_v32 = vld [vmem:[%s1044_s11 + $0xf0] ss:$8 sps:$4 sm:$0xff]   ;;  %v828_v33 = vld [vmem:[%s1117_s0] ss:$8 sps:$4 sm:$0xff]   ;;  %p240_p8 = scmp.lt.s32.totalorder %s676_s8, 5  ;;  %v283_v35 = vshrl.u32 %v282_v34, 7 }
  0x42   : > { %s675_s21 = sshll.u32 %s1040_s5, 4  ;;  %p1126_p9 = scmp.ne.s32.totalorder %s1123_s25, 0 }
  0x43   : > { %s1135_s8 = smov (!%p240_p8, %s676_s8), 5  ;;  %v284_v36 = vsub.s32 0, %v283_v35  ;;  %v288_v38 = vsub.s32 1, %v283_v35  ;;  %s230_s22 = scalar_lea.vmem [#allocation4], %s675_s21 }
  0x44   : > { %469 = vmatpush1.bf16.msra.mxu0 %v791_v7  ;;  %s242_s20 = scalar_lea.vmem %s1119_s2, %s1135_s8  ;;  %s721_s26 = sshll.u32 (%p1126_p9), %s903_s15, 3 }
  0x45   : > { %470 = vmatprep.subr.bf16.mxu0 %v792_v8  ;;  %v280_v37 = vld [vmem:[%s242_s20] sm:$0x3]  ;;  %s531_s29 = scalar_lea.vmem (%p1126_p9), %s1120_s3, %s721_s26 }
  0x46   : > { %v285_v39 = vrot.slane %v280_v37, %v284_v36  ;;  %v289_v40 = vrot.slane %v280_v37, %v288_v38 }
  0x48   : > { %471 = vmatpush1.bf16.msra.mxu0 %v794_v9 }
  0x49   : > { %472 = vmatprep.subr.bf16.mxu0 %v795_v10 }
  0x4c   : > { %473 = vmatpush1.bf16.msra.mxu0 %v797_v11 }
  0x4d   : > { %474 = vmatprep.subr.bf16.mxu0 %v798_v12 }
  0x50   : > { %475 = vmatpush1.bf16.msra.mxu0 %v800_v14 }
  0x51   : > { %476 = vmatprep.subr.bf16.mxu0 %v801_v15 }
  0x54   : > { %477 = vmatpush1.bf16.msra.mxu0 %v803_v16 }
  0x55   : > { %478 = vmatprep.subr.bf16.mxu0 %v804_v17 }
  0x58   : > { %479 = vmatpush1.bf16.msra.mxu0 %v806_v18 }
  0x59   : > { %480 = vmatprep.subr.bf16.mxu0 %v807_v19 }
  0x5c   : > { %481 = vmatpush1.bf16.msra.mxu0 %v809_v20 }
  0x5d   : > { %482 = vmatprep.subr.bf16.mxu0 %v810_v21 }
  0x60   : > { %483 = vmatpush1.bf16.msra.mxu0 %v812_v22 }
  0x61   : > { %484 = vmatprep.subr.bf16.mxu0 %v813_v23 }
  0x64   : > { %485 = vmatpush1.bf16.msra.mxu0 %v815_v24 }
  0x65   : > { %486 = vmatprep.subr.bf16.mxu0 %v816_v25 }
  0x68   : > { %487 = vmatpush1.bf16.msra.mxu0 %v818_v26 }
  0x69   : > { %488 = vmatprep.subr.bf16.mxu0 %v819_v27 }
  0x6c   : > { %489 = vmatpush1.bf16.msra.mxu0 %v821_v28 }
  0x6d   : > { %490 = vmatprep.subr.bf16.mxu0 %v822_v29 }
  0x70   : > { %491 = vmatpush1.bf16.msra.mxu0 %v824_v30 }
  0x71   : > { %492 = vmatprep.subr.bf16.mxu0 %v825_v31 }
  0x74   : > { %493 = vmatpush1.bf16.msra.mxu0 %v827_v32 }
  0x77   : > { %495 = vmatmul.mubr.bf16.vlgmr.msra.gmra.mrb[0].mxu0 %v828_v33 }
 0x14a   : > { %v496_v41 = vpop.f32.mrb[0].mxu0 }
 0x14b   : > { %v497_v42 = vadd.f32 %v496_v41, %v285_v39  ;;  %v498_v43 = vpop.f32.mrb[1].mxu0 }
 0x14c   : > { %v499_v44 = vadd.f32 %v498_v43, %v289_v40  ;;  %v500_v45 = vpop.f32.mrb[2].mxu0  ;;  %525 = sbr.rel (!%p1126_p9) target bundleno = 347 (0x15b), region = 40 }
 0x14d   : > { %v501_v46 = vadd.f32 %v500_v45, %v285_v39  ;;  %v502_v47 = vpop.f32.mrb[3].mxu0 }
 0x14e   : > { %v719_v48 = vpack.c.bf16 %v499_v44, %v497_v42  ;;  %v503_v49 = vadd.f32 %v502_v47, %v289_v40 }
 0x150   : > { %517 = vst [vmem:[%s230_s22] sm:$0xff] %v719_v48  ;;  %v720_v50 = vpack.c.bf16 %v503_v49, %v501_v46 }
 0x152   : > { %518 = vst [vmem:[%s230_s22 + $0x8] sm:$0xff] %v720_v50 }
 0x157   : > { %v561_v51 = vld [vmem:[%s230_s22] sm:$0xff] }
 0x158   : > { %562 = vst [vmem:[%s531_s29] sm:$0xff] %v561_v51 }
 0x159   : > { %v563_v52 = vld [vmem:[%s230_s22 + $0x8] sm:$0xff] }
 0x15a   : > { %564 = vst [vmem:[%s531_s29 + $0x18] sm:$0xff] %v563_v52 }
 0x15b PF: > { %s16_s17 = sadd.s32 1, %s911_s17   ;;  %s1127_s12 = smov %s895_s13 }
 0x15c   : > { %p13_p11 = scmp.ge.s32.totalorder %s16_s17, 5   ;;  %s1128_s13 = smov %s899_s14 }
 0x15d   : > { %s1129_s14 = smov %s985_s24  ;;  %s1130_s15 = smov %s907_s16 }
 0x15e   : > { %s1131_s16 = smov %s1133_s19  ;;  %15 = sbr.rel (!%p13_p11) target bundleno = 4 (0x4), region = 116 }
 0x165   :  { %580 = vsyncpa [#allocation3], 1 }
 0x166   :  { %582 = vsyncpa [#allocation3 + $0x1], 1 }

// kernel: bart_forward.31
= control target key start
LH: loop header
LB: loop body
LE: loop exit
PB: predicated region body
PF: predicated region fallthrough
CT: control target
= control target key end

     0   :  { %v55_v24 = vlaneseq  ;;  %s149_s0 = inlined_call_operand.vmem [shape: bf16[16,256], index: 0, kind: input, shape index: {}]   ;;  %s150_s1 = inlined_call_operand.vmem [shape: f32[1,256], index: 1, kind: input, shape index: {}]   ;;  %s151_s2 = inlined_call_operand.vmem [shape: f32[1,256], index: 2, kind: input, shape index: {}]   ;;  %s152_s3 = inlined_call_operand.vmem [shape: bf16[16,256], index: 3, kind: output, shape index: {}]  }
   0x1   :  { %v14_v0 = vld [vmem:[%s149_s0] sm:$0xff]  ;;  %v15_v1 = vld [vmem:[%s149_s0 + $0x8] sm:$0xff] }
   0x2   :  { %v16_v2 = vunpack.c.l.bf16 %v14_v0  ;;  %v17_v3 = vunpack.c.h.bf16 %v14_v0  ;;  %v18_v4 = vunpack.c.l.bf16 %v15_v1  ;;  %v19_v5 = vunpack.c.h.bf16 %v15_v1  ;;  %v53_v32 = vld [vmem:[%s150_s1] sm:$0x3] }
   0x3   :  { %v56_v28 = vshrl.u32 %v55_v24, 7  ;;  %v69_v33 = vld [vmem:[%s151_s2] sm:$0x3] }
   0x4   :  { %v20_v6 = vadd.f32 %v17_v3, %v16_v2  ;;  %v23_v7 = vadd.f32 %v19_v5, %v18_v4 }
   0x5   :  { %v57_v30 = vsub.s32 0, %v56_v28  ;;  %v61_v31 = vsub.s32 1, %v56_v28 }
   0x6   :  { %21 = vadd.xlane.f32.xlu0 %v20_v6 }
   0x7   :  { %v58_v34 = vrot.slane %v53_v32, %v57_v30  ;;  %v62_v35 = vrot.slane %v53_v32, %v61_v31  ;;  %v74_v37 = vrot.slane %v69_v33, %v57_v30  ;;  %v78_v38 = vrot.slane %v69_v33, %v61_v31 }
   0xa   :  { %24 = vadd.xlane.f32.xlu0 %v23_v7 }
  0x93   :  { %v22_v8 = vpop.xlane.xlu0 %21 }
  0x94   :  { %v27_v9 = vmul.f32 0.00390625, %v22_v8 }
  0x96   :  { %v29_v10 = vsub.f32 %v16_v2, %v27_v9  ;;  %v30_v11 = vsub.f32 %v17_v3, %v27_v9 }
  0x97   :  { %v25_v12 = vpop.xlane.xlu0 %24 }
  0x98   :  { %v28_v13 = vmul.f32 0.00390625, %v25_v12  ;;  %v33_v14 = vmul.f32 %v29_v10, %v29_v10  ;;  %v34_v15 = vmul.f32 %v30_v11, %v30_v11 }
  0x9a   :  { %v31_v16 = vsub.f32 %v18_v4, %v28_v13  ;;  %v32_v17 = vsub.f32 %v19_v5, %v28_v13  ;;  %v37_v18 = vadd.f32 %v34_v15, %v33_v14 }
  0x9c   :  { %38 = vadd.xlane.f32.xlu1 %v37_v18  ;;  %v35_v19 = vmul.f32 %v31_v16, %v31_v16  ;;  %v36_v20 = vmul.f32 %v32_v17, %v32_v17 }
  0x9e   :  { %v40_v21 = vadd.f32 %v36_v20, %v35_v19 }
  0xa0   :  { %41 = vadd.xlane.f32.xlu1 %v40_v21 }
 0x129   :  { %v39_v22 = vpop.xlane.xlu1 %38 }
 0x12a   :  { %v43_v23 = vmul.f32 0.00390625, %v39_v22 }
 0x12c   :  { %v45_v25 = vadd.f32 1e-05, %v43_v23 }
 0x12d   :  { %v42_v26 = vpop.xlane.xlu1 %41 }
 0x12e   :  { %107 = vrsqrt.f32 %v45_v25  ;;  %v44_v27 = vmul.f32 0.00390625, %v42_v26 }
 0x130   :  { %v46_v29 = vadd.f32 1e-05, %v44_v27 }
 0x132   :  { %109 = vrsqrt.f32 %v46_v29 }
 0x138   :  { %v108_v36 = vpop.eup %107 }
 0x139   :  { %v49_v39 = vmul.f32 %v108_v36, %v29_v10  ;;  %v50_v40 = vmul.f32 %v108_v36, %v30_v11 }
 0x13b   :  { %v65_v41 = vmul.f32 %v58_v34, %v49_v39  ;;  %v66_v42 = vmul.f32 %v62_v35, %v50_v40 }
 0x13c   :  { %v110_v43 = vpop.eup %109 }
 0x13d   :  { %v81_v44 = vadd.f32 %v74_v37, %v65_v41  ;;  %v82_v45 = vadd.f32 %v78_v38, %v66_v42  ;;  %v51_v46 = vmul.f32 %v110_v43, %v31_v16  ;;  %v52_v47 = vmul.f32 %v110_v43, %v32_v17 }
 0x13f   :  { %v105_v48 = vpack.c.bf16 %v82_v45, %v81_v44  ;;  %v67_v49 = vmul.f32 %v58_v34, %v51_v46  ;;  %v68_v50 = vmul.f32 %v62_v35, %v52_v47 }
 0x141   :  { %97 = vst [vmem:[%s152_s3] sm:$0xff] %v105_v48  ;;  %v83_v51 = vadd.f32 %v74_v37, %v67_v49  ;;  %v84_v52 = vadd.f32 %v78_v38, %v68_v50 }
 0x143   :  { %v106_v53 = vpack.c.bf16 %v84_v52, %v83_v51 }
 0x145   :  { %98 = vst [vmem:[%s152_s3 + $0x8] sm:$0xff] %v106_v53 }

// kernel: bart_forward.33
= control target key start
LH: loop header
LB: loop body
LE: loop exit
PB: predicated region body
PF: predicated region fallthrough
CT: control target
= control target key end

     0   :  { %s885_s15 = smov 0   ;;  %s887_s16 = smov 0   ;;  %s959_s0 = inlined_call_operand.vmem [shape: bf16[2,8,768], index: 0, kind: input, shape index: {}, may-alias: {0,1,2}]   ;;  %s960_s1 = inlined_call_operand.vmem [shape: bf16[2,8,768], index: 1, kind: input, shape index: {}, may-alias: {0,1,2}]   ;;  %s961_s2 = inlined_call_operand.vmem [shape: bf16[2,8,768], index: 2, kind: input, shape index: {}, may-alias: {0,1,2}]   ;;  %s962_s3 = inlined_call_operand.vmem [shape: f32[2,1,8], index: 3, kind: input, shape index: {}]   ;;  %s963_s4 = inlined_call_operand.vmem [shape: bf16[2,8,256], index: 4, kind: output, shape index: {}]  }
   0x1   :  { %s889_s17 = smov 0  }
   0x2 LB: > { %s33_s18 = sadd.s32 1, %s852_s16  ;;  %p749_p0 = scmp.ge.s32.totalorder %s856_s17, 1  ;;  %s856_s17 = sphi %s889_s17, %s14_s17   ;;  %s852_s16 = sphi %s887_s16, %s965_s16   ;;  %s848_s15 = sphi %s885_s15, %s964_s15  }
   0x3   : > { %p35_p1 = scmp.ge.s32.totalorder %s33_s18, 2  ;;  %p248_p2 = scmp.lt.s32.totalorder %s856_s17, 3 }
   0x5   : > { %s967_s18 = smov (%p35_p1, %s33_s18), 0  ;;  %p249_p3 = pnand %p749_p0, %p248_p2 }
   0x6   : > { %p314_p4 = scmp.lt.s32.totalorder (!%p249_p3), %s848_s15, 1  ;;  %v858_v0 = vmov (!%p249_p3), 0.0   ;;  %vm859_vm0 = vmmov (!%p249_p3), 0   ;;  %vm421_vm1 = vcmask (!%p249_p3), 64512   ;;  %vm437_vm2 = vcmask (!%p249_p3), 1043456  }
   0x7   : > { %252 = sbr.rel (%p249_p3) target bundleno = 1314 (0x522), region = 36  ;;  %773 = vmatprep.subr.bf16.mxu0 (!%p249_p3), %v858_v0  ;;  %775 = vmatprep.mubr.msk.bf16.mxu0 (!%p249_p3), %vm859_vm0, %v858_v0 }
   0x8   : > { %779 = vmatprep.subr.bf16.mxu1 (!%p249_p3), %v858_v0  ;;  %781 = vmatprep.mubr.msk.bf16.mxu1 (!%p249_p3), %vm859_vm0, %v858_v0 }
   0xe   : > { %s969_s15 = smov (!%p314_p4, %s848_s15), 1 }
   0xf   : > { %s908_s19 = smul.u32 24, %s969_s15  ;;  %s353_s29 = scalar_lea.vmem %s962_s3, %s969_s15 }
  0x10   : > { %v755_v4 = vld [vmem:[%s353_s29] ss:$0 sm:$0xff]  ;;  %s764_s8 = sshll.u32 %s969_s15, 3 }
  0x11   : > { %s761_s20 = sadd.s32 8, %s908_s19  ;;  %s921_s26 = scalar_lea.vmem %s959_s0, %s908_s19 }
  0x12   : > { %s914_s23 = scalar_lea.vmem %s960_s1, %s761_s20  ;;  %v370_v2 = vld [vmem:[%s921_s26] sm:$0xf]  ;;  %s763_s30 = sadd.s32 16, %s908_s19  ;;  %v483_v25 = vld [vmem:[%s921_s26 + $0x4] sm:$0xf] }
  0x13   : > { %v371_v1 = vld [vmem:[%s914_s23] sm:$0xf]  ;;  %s348_s7 = scalar_lea.vmem %s961_s2, %s763_s30  ;;  %v484_v23 = vld [vmem:[%s914_s23 + $0x4] sm:$0xf]  ;;  %s943_s11 = scalar_lea.vmem %s963_s4, %s764_s8 }
  0x14   : > { %774 = vmatpush3.bf16.xpose.msra.mxu0 %v371_v1  ;;  %v372_v16 = vld [vmem:[%s348_s7] sm:$0xf]  ;;  %v485_v17 = vld [vmem:[%s348_s7 + $0x4] sm:$0xf] }
  0x15   : > { %791 = vmatprep.subr.bf16.mxu0 %v858_v0  ;;  %v439_v18 = vsel %vm437_vm2, %v372_v16, 0  ;;  %v544_v19 = vsel %vm437_vm2, %v485_v17, 0 }
  0x16   : > { %780 = vmatpush3.bf16.msra.mxu1 %v439_v18 }
  0x17   : > { %785 = vmatprep.subr.bf16.mxu1 %v858_v0 }
  0x1b   : > { %776 = vmatmul.mubr.bf16.vlgmr.msra.gmra.mrb[0].mxu0 %v370_v2 }
  0x1c   : > { %793 = vmatprep.mubr.msk.bf16.mxu0 %vm859_vm0, %v858_v0  ;;  %792 = vmatpush3.bf16.msra.mxu0 %v544_v19 }
  0xee   : > { %v407_v3 = vpop.f32.mrb[0].mxu0 }
  0xef   : > { %v413_v5 = vmul.f32 0.088388346, %v407_v3  ;;  %v777_v6 = vpop.f32.mrb[1].mxu0 }
  0xf0   : > { %v410_v7 = vpop.f32.mrb[2].mxu0 }
  0xf1   : > { %v778_v8 = vpop.f32.mrb[3].mxu0  ;;  %v420_v9 = vadd.f32 %v755_v4, %v413_v5 }
  0xf3   : > { %v422_v10 = vsel %vm421_vm1, %v420_v9, -inf }
  0xf4   : > { %423 = vmax.xlane.f32.xlu0 %v422_v10 }
 0x181   : > { %v424_v11 = vpop.xlane.xlu0 %423 }
 0x182   : > { %v425_v12 = vsub.f32 %v420_v9, %v424_v11 }
 0x184   : > { %v426_v13 = vmul.f32 1.442695, %v425_v12 }
 0x186   : > { %826 = vpow2.f32 %v426_v13 }
 0x190   : > { %v827_v14 = vpop.eup %826 }
 0x191   : > { %v428_v15 = vsel %vm421_vm1, %v827_v14, 0.0 }
 0x192   : > { %429 = vadd.xlane.f32.xlu0 %v428_v15 }
 0x21f   : > { %v430_v20 = vpop.xlane.xlu0 %429 }
 0x220   : > { %828 = vrcp.f32 %v430_v20 }
 0x22a   : > { %v829_v21 = vpop.eup %828 }
 0x22b   : > { %v432_v22 = vmul.f32 %v829_v21, %v827_v14 }
 0x22d   : > { %v433_v24 = vpack.c.bf16 %v432_v22, %v432_v22 }
 0x22f   : > { %782 = vmatmul.mubr.msk.bf16.vlgmr.msra.gmra.mrb[0].mxu1 %vm421_vm1, %v433_v24 }
 0x230   : > { %786 = vmatpush3.bf16.xpose.msra.mxu1 %v484_v23  ;;  %787 = vmatprep.mubr.msk.bf16.mxu1 %vm859_vm0, %v858_v0 }
 0x237   : > { %788 = vmatmul.mubr.bf16.vlgmr.msra.gmra.mrb[4].mxu1 %v483_v25 }
 0x302   : > { %v475_v26 = vpop.f32.mrb[0].mxu1 }
 0x303   : > { %v481_v27 = vpack.c.bf16 %v475_v26, %v475_v26  ;;  %v783_v28 = vpop.f32.mrb[1].mxu1 }
 0x304   : > { %v478_v29 = vpop.f32.mrb[2].mxu1 }
 0x305   : > { %482 = vst [vmem:[%s943_s11] sm:$0xf] %v481_v27  ;;  %v784_v30 = vpop.f32.mrb[3].mxu1 }
 0x30a   : > { %v520_v31 = vpop.f32.mrb[4].mxu1 }
 0x30b   : > { %v526_v32 = vmul.f32 0.088388346, %v520_v31  ;;  %v789_v33 = vpop.f32.mrb[5].mxu1 }
 0x30c   : > { %v523_v34 = vpop.f32.mrb[6].mxu1 }
 0x30d   : > { %v790_v35 = vpop.f32.mrb[7].mxu1  ;;  %v527_v36 = vadd.f32 %v755_v4, %v526_v32 }
 0x30f   : > { %v528_v37 = vsel %vm421_vm1, %v527_v36, -inf }
 0x310   : > { %529 = vmax.xlane.f32.xlu1 %v528_v37 }
 0x39d   : > { %v530_v38 = vpop.xlane.xlu1 %529 }
 0x39e   : > { %v531_v39 = vsub.f32 %v527_v36, %v530_v38 }
 0x3a0   : > { %v532_v40 = vmul.f32 1.442695, %v531_v39 }
 0x3a2   : > { %830 = vpow2.f32 %v532_v40 }
 0x3ac   : > { %v831_v41 = vpop.eup %830 }
 0x3ad   : > { %v534_v42 = vsel %vm421_vm1, %v831_v41, 0.0 }
 0x3ae   : > { %535 = vadd.xlane.f32.xlu1 %v534_v42 }
 0x43b   : > { %v536_v43 = vpop.xlane.xlu1 %535 }
 0x43c   : > { %832 = vrcp.f32 %v536_v43 }
 0x446   : > { %v833_v44 = vpop.eup %832 }
 0x447   : > { %v538_v45 = vmul.f32 %v833_v44, %v831_v41 }
 0x449   : > { %v539_v46 = vpack.c.bf16 %v538_v45, %v538_v45 }
 0x44b   : > { %794 = vmatmul.mubr.msk.bf16.vlgmr.msra.gmra.mrb[4].mxu0 %vm421_vm1, %v539_v46 }
 0x51e   : > { %v580_v47 = vpop.f32.mrb[4].mxu0 }
 0x51f   : > { %v586_v48 = vpack.c.bf16 %v580_v47, %v580_v47  ;;  %v795_v49 = vpop.f32.mrb[5].mxu0 }
 0x520   : > { %v583_v50 = vpop.f32.mrb[6].mxu0 }
 0x521   : > { %587 = vst [vmem:[%s943_s11 + $0x4] sm:$0xf] %v586_v48  ;;  %v796_v51 = vpop.f32.mrb[7].mxu0 }
 0x522 PF: > { %s14_s17 = sadd.s32 1, %s856_s17   ;;  %s964_s15 = smov %s852_s16 }
 0x523   : > { %p11_p5 = scmp.ge.s32.totalorder %s14_s17, 4   ;;  %s965_s16 = smov %s967_s18 }
 0x525   :  { %13 = sbr.rel (!%p11_p5) target bundleno = 2 (0x2), region = 75 }

// kernel: bart_forward.34
= control target key start
LH: loop header
LB: loop body
LE: loop exit
PB: predicated region body
PF: predicated region fallthrough
CT: control target
= control target key end

     0   :  { %v59_v34 = vlaneseq  ;;  %s626_s1 = inlined_call_operand.vmem [shape: bf16[256,256], index: 1, kind: input, shape index: {}]   ;;  %s627_s0 = inlined_call_operand.vmem [shape: bf16[16,256], index: 0, kind: input, shape index: {}]   ;;  %s628_s2 = inlined_call_operand.vmem [shape: f32[1,256], index: 2, kind: input, shape index: {}]   ;;  %s629_s3 = inlined_call_operand.vmem [shape: bf16[16,256], index: 3, kind: input, shape index: {}]   ;;  %s630_s4 = inlined_call_operand.vmem [shape: f32[1,256], index: 4, kind: input, shape index: {}]   ;;  %s631_s5 = inlined_call_operand.vmem [shape: f32[1,256], index: 5, kind: input, shape index: {}]   ;;  %s632_s6 = inlined_call_operand.vmem [shape: bf16[16,256], index: 6, kind: output, shape index: {}]  }
   0x1   :  { %v413_v0 = vld [vmem:[%s626_s1 + $0x4] ss:$8 sps:$4 sm:$0xff]   ;;  %v415_v1 = vld [vmem:[%s626_s1] ss:$8 sps:$4 sm:$0xff]   ;;  %v416_v2 = vld [vmem:[%s626_s1 + $0x14] ss:$8 sps:$4 sm:$0xff]  }
   0x2   :  { %239 = vmatprep.subr.bf16.mxu0 %v413_v0  ;;  %v418_v3 = vld [vmem:[%s626_s1 + $0x10] ss:$8 sps:$4 sm:$0xff]   ;;  %v419_v4 = vld [vmem:[%s626_s1 + $0x24] ss:$8 sps:$4 sm:$0xff]   ;;  %v421_v5 = vld [vmem:[%s626_s1 + $0x20] ss:$8 sps:$4 sm:$0xff]  }
   0x3   :  { %240 = vmatpush1.bf16.msra.mxu0 %v415_v1  ;;  %v422_v6 = vld [vmem:[%s626_s1 + $0x34] ss:$8 sps:$4 sm:$0xff]   ;;  %v424_v7 = vld [vmem:[%s626_s1 + $0x30] ss:$8 sps:$4 sm:$0xff]   ;;  %v425_v8 = vld [vmem:[%s626_s1 + $0x44] ss:$8 sps:$4 sm:$0xff]  }
   0x4   :  { %241 = vmatprep.subr.bf16.mxu0 %v416_v2  ;;  %v427_v9 = vld [vmem:[%s626_s1 + $0x40] ss:$8 sps:$4 sm:$0xff]   ;;  %v428_v10 = vld [vmem:[%s626_s1 + $0x54] ss:$8 sps:$4 sm:$0xff]   ;;  %v430_v11 = vld [vmem:[%s626_s1 + $0x50] ss:$8 sps:$4 sm:$0xff]  }
   0x5   :  { %v431_v12 = vld [vmem:[%s626_s1 + $0x64] ss:$8 sps:$4 sm:$0xff]   ;;  %v433_v14 = vld [vmem:[%s626_s1 + $0x60] ss:$8 sps:$4 sm:$0xff]   ;;  %v434_v15 = vld [vmem:[%s626_s1 + $0x74] ss:$8 sps:$4 sm:$0xff]  }
   0x6   :  { %v463_v13 = vld [vmem:[%s627_s0 + $0x4] ss:$8 sps:$4 sm:$0xff]   ;;  %v436_v16 = vld [vmem:[%s626_s1 + $0x70] ss:$8 sps:$4 sm:$0xff]   ;;  %v439_v18 = vld [vmem:[%s626_s1 + $0x80] ss:$8 sps:$4 sm:$0xff]  }
   0x7   :  { %242 = vmatpush1.bf16.msra.mxu0 %v418_v3  ;;  %271 = vmatprep.mubr.bf16.mxu0 %v463_v13  ;;  %v437_v17 = vld [vmem:[%s626_s1 + $0x84] ss:$8 sps:$4 sm:$0xff]   ;;  %v440_v19 = vld [vmem:[%s626_s1 + $0x94] ss:$8 sps:$4 sm:$0xff]   ;;  %v442_v20 = vld [vmem:[%s626_s1 + $0x90] ss:$8 sps:$4 sm:$0xff]  }
   0x8   :  { %243 = vmatprep.subr.bf16.mxu0 %v419_v4  ;;  %v443_v21 = vld [vmem:[%s626_s1 + $0xa4] ss:$8 sps:$4 sm:$0xff]   ;;  %v445_v22 = vld [vmem:[%s626_s1 + $0xa0] ss:$8 sps:$4 sm:$0xff]   ;;  %v446_v23 = vld [vmem:[%s626_s1 + $0xb4] ss:$8 sps:$4 sm:$0xff]  }
   0x9   :  { %v448_v24 = vld [vmem:[%s626_s1 + $0xb0] ss:$8 sps:$4 sm:$0xff]   ;;  %v449_v25 = vld [vmem:[%s626_s1 + $0xc4] ss:$8 sps:$4 sm:$0xff]   ;;  %v451_v26 = vld [vmem:[%s626_s1 + $0xc0] ss:$8 sps:$4 sm:$0xff]  }
   0xa   :  { %v452_v27 = vld [vmem:[%s626_s1 + $0xd4] ss:$8 sps:$4 sm:$0xff]   ;;  %v454_v28 = vld [vmem:[%s626_s1 + $0xd0] ss:$8 sps:$4 sm:$0xff]   ;;  %v455_v29 = vld [vmem:[%s626_s1 + $0xe4] ss:$8 sps:$4 sm:$0xff]  }
   0xb   :  { %244 = vmatpush1.bf16.msra.mxu0 %v421_v5  ;;  %v457_v30 = vld [vmem:[%s626_s1 + $0xe0] ss:$8 sps:$4 sm:$0xff]   ;;  %v458_v31 = vld [vmem:[%s626_s1 + $0xf4] ss:$8 sps:$4 sm:$0xff]   ;;  %v460_v32 = vld [vmem:[%s626_s1 + $0xf0] ss:$8 sps:$4 sm:$0xff]  }
   0xc   :  { %245 = vmatprep.subr.bf16.mxu0 %v422_v6  ;;  %v461_v33 = vld [vmem:[%s627_s0] ss:$8 sps:$4 sm:$0xff]   ;;  %v60_v35 = vshrl.u32 %v59_v34, 7 }
   0xd   :  { %v57_v37 = vld [vmem:[%s628_s2] sm:$0x3]  ;;  %v283_v42 = vld [vmem:[%s629_s3 + $0x8] sm:$0xff] }
   0xe   :  { %v61_v36 = vsub.s32 0, %v60_v35  ;;  %v65_v38 = vsub.s32 1, %v60_v35  ;;  %v282_v39 = vld [vmem:[%s629_s3] sm:$0xff]  ;;  %v286_v50 = vunpack.c.l.bf16 %v283_v42  ;;  %v287_v51 = vunpack.c.h.bf16 %v283_v42 }
   0xf   :  { %246 = vmatpush1.bf16.msra.mxu0 %v424_v7  ;;  %v284_v43 = vunpack.c.l.bf16 %v282_v39  ;;  %v285_v45 = vunpack.c.h.bf16 %v282_v39 }
  0x10   :  { %247 = vmatprep.subr.bf16.mxu0 %v425_v8  ;;  %v62_v40 = vrot.slane %v57_v37, %v61_v36  ;;  %v66_v41 = vrot.slane %v57_v37, %v65_v38 }
  0x13   :  { %248 = vmatpush1.bf16.msra.mxu0 %v427_v9 }
  0x14   :  { %249 = vmatprep.subr.bf16.mxu0 %v428_v10 }
  0x17   :  { %250 = vmatpush1.bf16.msra.mxu0 %v430_v11 }
  0x18   :  { %251 = vmatprep.subr.bf16.mxu0 %v431_v12 }
  0x1b   :  { %252 = vmatpush1.bf16.msra.mxu0 %v433_v14 }
  0x1c   :  { %253 = vmatprep.subr.bf16.mxu0 %v434_v15 }
  0x1f   :  { %254 = vmatpush1.bf16.msra.mxu0 %v436_v16 }
  0x20   :  { %255 = vmatprep.subr.bf16.mxu0 %v437_v17  ;;  %v325_v17 = vld [vmem:[%s630_s4] sm:$0x3] }
  0x23   :  { %256 = vmatpush1.bf16.msra.mxu0 %v439_v18  ;;  %v341_v18 = vld [vmem:[%s631_s5] sm:$0x3] }
  0x24   :  { %257 = vmatprep.subr.bf16.mxu0 %v440_v19  ;;  %v330_v19 = vrot.slane %v325_v17, %v61_v36 }
  0x27   :  { %258 = vmatpush1.bf16.msra.mxu0 %v442_v20  ;;  %v334_v20 = vrot.slane %v325_v17, %v65_v38 }
  0x28   :  { %259 = vmatprep.subr.bf16.mxu0 %v443_v21 }
  0x2b   :  { %260 = vmatpush1.bf16.msra.mxu0 %v445_v22  ;;  %v346_v22 = vrot.slane %v341_v18, %v61_v36 }
  0x2c   :  { %261 = vmatprep.subr.bf16.mxu0 %v446_v23  ;;  %v350_v23 = vrot.slane %v341_v18, %v65_v38 }
  0x2f   :  { %262 = vmatpush1.bf16.msra.mxu0 %v448_v24 }
  0x30   :  { %263 = vmatprep.subr.bf16.mxu0 %v449_v25 }
  0x33   :  { %264 = vmatpush1.bf16.msra.mxu0 %v451_v26 }
  0x34   :  { %265 = vmatprep.subr.bf16.mxu0 %v452_v27 }
  0x37   :  { %266 = vmatpush1.bf16.msra.mxu0 %v454_v28 }
  0x38   :  { %267 = vmatprep.subr.bf16.mxu0 %v455_v29 }
  0x3b   :  { %268 = vmatpush1.bf16.msra.mxu0 %v457_v30 }
  0x3c   :  { %269 = vmatprep.subr.bf16.mxu0 %v458_v31 }
  0x3f   :  { %270 = vmatpush1.bf16.msra.mxu0 %v460_v32 }
  0x42   :  { %272 = vmatmul.mubr.bf16.vlgmr.msra.gmra.mrb[0].mxu0 %v461_v33 }
 0x115   :  { %v273_v44 = vpop.f32.mrb[0].mxu0 }
 0x116   :  { %v274_v46 = vadd.f32 %v273_v44, %v62_v40  ;;  %v275_v47 = vpop.f32.mrb[1].mxu0 }
 0x117   :  { %v276_v48 = vadd.f32 %v275_v47, %v66_v41  ;;  %v277_v49 = vpop.f32.mrb[2].mxu0 }
 0x118   :  { %v278_v52 = vadd.f32 %v277_v49, %v62_v40  ;;  %v279_v53 = vpop.f32.mrb[3].mxu0  ;;  %v288_v54 = vadd.f32 %v284_v43, %v274_v46 }
 0x119   :  { %v280_v55 = vadd.f32 %v279_v53, %v66_v41  ;;  %v289_v56 = vadd.f32 %v285_v45, %v276_v48 }
 0x11a   :  { %v290_v57 = vadd.f32 %v286_v50, %v278_v52 }
 0x11b   :  { %v291_v58 = vadd.f32 %v287_v51, %v280_v55  ;;  %v292_v59 = vadd.f32 %v289_v56, %v288_v54 }
 0x11d   :  { %293 = vadd.xlane.f32.xlu0 %v292_v59  ;;  %v295_v60 = vadd.f32 %v291_v58, %v290_v57 }
 0x121   :  { %296 = vadd.xlane.f32.xlu0 %v295_v60 }
 0x1aa   :  { %v294_v61 = vpop.xlane.xlu0 %293 }
 0x1ab   :  { %v299_v62 = vmul.f32 0.00390625, %v294_v61 }
 0x1ad   :  { %v301_v63 = vsub.f32 %v288_v54, %v299_v62  ;;  %v302_v0 = vsub.f32 %v289_v56, %v299_v62 }
 0x1ae   :  { %v297_v1 = vpop.xlane.xlu0 %296 }
 0x1af   :  { %v300_v2 = vmul.f32 0.00390625, %v297_v1  ;;  %v305_v3 = vmul.f32 %v301_v63, %v301_v63  ;;  %v306_v4 = vmul.f32 %v302_v0, %v302_v0 }
 0x1b1   :  { %v303_v5 = vsub.f32 %v290_v57, %v300_v2  ;;  %v304_v6 = vsub.f32 %v291_v58, %v300_v2  ;;  %v309_v7 = vadd.f32 %v306_v4, %v305_v3 }
 0x1b3   :  { %310 = vadd.xlane.f32.xlu1 %v309_v7  ;;  %v307_v8 = vmul.f32 %v303_v5, %v303_v5  ;;  %v308_v9 = vmul.f32 %v304_v6, %v304_v6 }
 0x1b5   :  { %v312_v10 = vadd.f32 %v308_v9, %v307_v8 }
 0x1b7   :  { %313 = vadd.xlane.f32.xlu1 %v312_v10 }
 0x240   :  { %v311_v11 = vpop.xlane.xlu1 %310 }
 0x241   :  { %v315_v12 = vmul.f32 0.00390625, %v311_v11 }
 0x243   :  { %v317_v13 = vadd.f32 1e-05, %v315_v12 }
 0x244   :  { %v314_v14 = vpop.xlane.xlu1 %313 }
 0x245   :  { %464 = vrsqrt.f32 %v317_v13  ;;  %v316_v15 = vmul.f32 0.00390625, %v314_v14 }
 0x247   :  { %v318_v16 = vadd.f32 1e-05, %v316_v15 }
 0x249   :  { %466 = vrsqrt.f32 %v318_v16 }
 0x24f   :  { %v465_v21 = vpop.eup %464 }
 0x250   :  { %v321_v24 = vmul.f32 %v465_v21, %v301_v63  ;;  %v322_v25 = vmul.f32 %v465_v21, %v302_v0 }
 0x252   :  { %v337_v26 = vmul.f32 %v330_v19, %v321_v24  ;;  %v338_v27 = vmul.f32 %v334_v20, %v322_v25 }
 0x253   :  { %v467_v28 = vpop.eup %466 }
 0x254   :  { %v353_v29 = vadd.f32 %v346_v22, %v337_v26  ;;  %v354_v30 = vadd.f32 %v350_v23, %v338_v27  ;;  %v323_v31 = vmul.f32 %v467_v28, %v303_v5  ;;  %v324_v32 = vmul.f32 %v467_v28, %v304_v6 }
 0x256   :  { %v411_v33 = vpack.c.bf16 %v354_v30, %v353_v29  ;;  %v339_v34 = vmul.f32 %v330_v19, %v323_v31  ;;  %v340_v35 = vmul.f32 %v334_v20, %v324_v32 }
 0x258   :  { %369 = vst [vmem:[%s632_s6] sm:$0xff] %v411_v33  ;;  %v355_v37 = vadd.f32 %v346_v22, %v339_v34  ;;  %v356_v39 = vadd.f32 %v350_v23, %v340_v35 }
 0x25a   :  { %v412_v36 = vpack.c.bf16 %v356_v39, %v355_v37 }
 0x25c   :  { %370 = vst [vmem:[%s632_s6 + $0x8] sm:$0xff] %v412_v36 }

// kernel: bart_forward.35
= control target key start
LH: loop header
LB: loop body
LE: loop exit
PB: predicated region body
PF: predicated region fallthrough
CT: control target
= control target key end

     0   :  { %s1051_s12 = smov 0   ;;  %s1053_s13 = smov 0   ;;  %s1239_s0 = inlined_call_operand.vmem [shape: bf16[16,256], index: 0, kind: input, shape index: {}]   ;;  %s1240_s1 = inlined_call_operand.vmem [shape: bf16[256,512], index: 1, kind: input, shape index: {}]   ;;  %s1241_s2 = inlined_call_operand.vmem [shape: f32[1,512], index: 2, kind: input, shape index: {}]   ;;  %s1242_s3 = inlined_call_operand.vmem [shape: bf16[16,512], index: 3, kind: output, shape index: {}]  }
   0x1   :  { %s1055_s14 = smov 0   ;;  %s1057_s15 = smov 0  }
   0x2   :  { %s1059_s16 = smov 0  }
   0x3 LB: > { %s22_s17 = sadd.s32 1, %s1025_s15  ;;  %s835_s18 = sadd.s32 4294967295, %s1029_s16   ;;  %s1029_s16 = sphi %s1059_s16, %s13_s16   ;;  %s1025_s15 = sphi %s1057_s15, %s1247_s15   ;;  %s1021_s14 = sphi %s1055_s14, %s1246_s14   ;;  %s1017_s13 = sphi %s1053_s13, %s1245_s13   ;;  %s1013_s12 = sphi %s1051_s12, %s1244_s12  }
   0x4   : > { %p23_p0 = scmp.ge.s32.totalorder %s22_s17, 2  ;;  %p65_p1 = scmp.ne.s32.totalorder %s1017_s13, %s1013_s12 }
   0x5   : > { %p66_p2 = scmp.eq.s32.totalorder %s1029_s16, 0  ;;  %p123_p4 = scmp.eq.s32.totalorder %s835_s18, 1 }
   0x6   : > { %s1249_s17 = smov (%p23_p0, %s22_s17), 0  ;;  %s58_s20 = sadd.s32 1, %s1017_s13 }
   0x7   : > { %p67_p3 = por %p66_p2, %p65_p1  ;;  %s55_s19 = ssub.s32 %s1025_s15, %s1249_s17 }
   0x8   : > { %p56_p5 = scmp.eq.s32.totalorder %s55_s19, 0  ;;  %p1086_p6 = por %p123_p4, %p65_p1 }
   0x9   : > { %p839_p7 = scmp.ge.s32.totalorder %s1029_s16, 2 }
   0xa   : > { %s1091_s22 = scalar_select %p56_p5, %s1017_s13, %s58_s20  }
   0xb   : > { %155 = sbr.rel (%p839_p7) target bundleno = 38 (0x26), region = 20 }
  0x12   : > { %158 = sbr.rel (!%p67_p3) target bundleno = 38 (0x26), region = 24  ;;  %s160_s23 = sand.u32 (%p67_p3), 1, %s1017_s13  }
  0x13   : > { %s888_s24 = sshll.u32 (%p67_p3), %s1025_s15, 3  ;;  %s840_s25 = sshll.u32 (%p67_p3), %s160_s23, 8 }
  0x14   : > { %s1099_s28 = scalar_lea.vmem (%p67_p3), %s1240_s1, %s888_s24  ;;  %s1104_s29 = scalar_lea.vmem (%p67_p3), [#allocation2], %s840_s25 }
  0x15   : > { %v255_v0 = vld [vmem:[%s1099_s28] sm:$0xff] (%p67_p3)  ;;  %v257_v1 = vld [vmem:[%s1099_s28 + $0x10] sm:$0xff] (%p67_p3) }
  0x16   : > { %v259_v2 = vld [vmem:[%s1099_s28 + $0x20] sm:$0xff] (%p67_p3)  ;;  %256 = vst [vmem:[%s1104_s29] sm:$0xff] (%p67_p3), %v255_v0  ;;  %258 = vst [vmem:[%s1104_s29 + $0x8] sm:$0xff] (%p67_p3), %v257_v1  ;;  %v261_v3 = vld [vmem:[%s1099_s28 + $0x30] sm:$0xff] (%p67_p3) }
  0x17   : > { %260 = vst [vmem:[%s1104_s29 + $0x10] sm:$0xff] (%p67_p3), %v259_v2  ;;  %v263_v4 = vld [vmem:[%s1099_s28 + $0x40] sm:$0xff] (%p67_p3)  ;;  %v265_v5 = vld [vmem:[%s1099_s28 + $0x50] sm:$0xff] (%p67_p3)  ;;  %262 = vst [vmem:[%s1104_s29 + $0x18] sm:$0xff] (%p67_p3), %v261_v3 }
  0x18   : > { %264 = vst [vmem:[%s1104_s29 + $0x20] sm:$0xff] (%p67_p3), %v263_v4  ;;  %266 = vst [vmem:[%s1104_s29 + $0x28] sm:$0xff] (%p67_p3), %v265_v5  ;;  %v267_v6 = vld [vmem:[%s1099_s28 + $0x60] sm:$0xff] (%p67_p3)  ;;  %v269_v7 = vld [vmem:[%s1099_s28 + $0x70] sm:$0xff] (%p67_p3) }
  0x19   : > { %v271_v8 = vld [vmem:[%s1099_s28 + $0x80] sm:$0xff]  ;;  %268 = vst [vmem:[%s1104_s29 + $0x30] sm:$0xff] %v267_v6  ;;  %270 = vst [vmem:[%s1104_s29 + $0x38] sm:$0xff] %v269_v7  ;;  %v273_v9 = vld [vmem:[%s1099_s28 + $0x90] sm:$0xff] }
  0x1a   : > { %272 = vst [vmem:[%s1104_s29 + $0x40] sm:$0xff] %v271_v8  ;;  %v275_v10 = vld [vmem:[%s1099_s28 + $0xa0] sm:$0xff]  ;;  %v277_v11 = vld [vmem:[%s1099_s28 + $0xb0] sm:$0xff]  ;;  %274 = vst [vmem:[%s1104_s29 + $0x48] sm:$0xff] %v273_v9 }
  0x1b   : > { %276 = vst [vmem:[%s1104_s29 + $0x50] sm:$0xff] %v275_v10  ;;  %278 = vst [vmem:[%s1104_s29 + $0x58] sm:$0xff] %v277_v11  ;;  %v279_v12 = vld [vmem:[%s1099_s28 + $0xc0] sm:$0xff]  ;;  %v281_v13 = vld [vmem:[%s1099_s28 + $0xd0] sm:$0xff] }
  0x1c   : > { %v283_v14 = vld [vmem:[%s1099_s28 + $0xe0] sm:$0xff]  ;;  %280 = vst [vmem:[%s1104_s29 + $0x60] sm:$0xff] %v279_v12  ;;  %282 = vst [vmem:[%s1104_s29 + $0x68] sm:$0xff] %v281_v13  ;;  %v285_v15 = vld [vmem:[%s1099_s28 + $0xf0] sm:$0xff] }
  0x1d   : > { %284 = vst [vmem:[%s1104_s29 + $0x70] sm:$0xff] %v283_v14  ;;  %v287_v16 = vld [vmem:[%s1099_s28 + $0x100] sm:$0xff]  ;;  %v289_v17 = vld [vmem:[%s1099_s28 + $0x110] sm:$0xff]  ;;  %286 = vst [vmem:[%s1104_s29 + $0x78] sm:$0xff] %v285_v15 }
  0x1e   : > { %288 = vst [vmem:[%s1104_s29 + $0x80] sm:$0xff] %v287_v16  ;;  %290 = vst [vmem:[%s1104_s29 + $0x88] sm:$0xff] %v289_v17  ;;  %v291_v18 = vld [vmem:[%s1099_s28 + $0x120] sm:$0xff]  ;;  %v293_v19 = vld [vmem:[%s1099_s28 + $0x130] sm:$0xff] }
  0x1f   : > { %v295_v20 = vld [vmem:[%s1099_s28 + $0x140] sm:$0xff]  ;;  %292 = vst [vmem:[%s1104_s29 + $0x90] sm:$0xff] %v291_v18  ;;  %294 = vst [vmem:[%s1104_s29 + $0x98] sm:$0xff] %v293_v19  ;;  %v297_v21 = vld [vmem:[%s1099_s28 + $0x150] sm:$0xff] }
  0x20   : > { %296 = vst [vmem:[%s1104_s29 + $0xa0] sm:$0xff] %v295_v20  ;;  %v299_v22 = vld [vmem:[%s1099_s28 + $0x160] sm:$0xff]  ;;  %v301_v23 = vld [vmem:[%s1099_s28 + $0x170] sm:$0xff]  ;;  %298 = vst [vmem:[%s1104_s29 + $0xa8] sm:$0xff] %v297_v21 }
  0x21   : > { %300 = vst [vmem:[%s1104_s29 + $0xb0] sm:$0xff] %v299_v22  ;;  %302 = vst [vmem:[%s1104_s29 + $0xb8] sm:$0xff] %v301_v23  ;;  %v303_v24 = vld [vmem:[%s1099_s28 + $0x180] sm:$0xff]  ;;  %v305_v25 = vld [vmem:[%s1099_s28 + $0x190] sm:$0xff] }
  0x22   : > { %v307_v26 = vld [vmem:[%s1099_s28 + $0x1a0] sm:$0xff]  ;;  %304 = vst [vmem:[%s1104_s29 + $0xc0] sm:$0xff] %v303_v24  ;;  %306 = vst [vmem:[%s1104_s29 + $0xc8] sm:$0xff] %v305_v25  ;;  %v309_v27 = vld [vmem:[%s1099_s28 + $0x1b0] sm:$0xff] }
  0x23   : > { %308 = vst [vmem:[%s1104_s29 + $0xd0] sm:$0xff] %v307_v26  ;;  %v311_v28 = vld [vmem:[%s1099_s28 + $0x1c0] sm:$0xff]  ;;  %v313_v29 = vld [vmem:[%s1099_s28 + $0x1d0] sm:$0xff]  ;;  %310 = vst [vmem:[%s1104_s29 + $0xd8] sm:$0xff] %v309_v27 }
  0x24   : > { %312 = vst [vmem:[%s1104_s29 + $0xe0] sm:$0xff] %v311_v28  ;;  %314 = vst [vmem:[%s1104_s29 + $0xe8] sm:$0xff] %v313_v29  ;;  %v315_v30 = vld [vmem:[%s1099_s28 + $0x1e0] sm:$0xff]  ;;  %v317_v31 = vld [vmem:[%s1099_s28 + $0x1f0] sm:$0xff] }
  0x25   : > { %316 = vst [vmem:[%s1104_s29 + $0xf0] sm:$0xff] %v315_v30  ;;  %318 = vst [vmem:[%s1104_s29 + $0xf8] sm:$0xff] %v317_v31 }
  0x26 PF: > { %p843_p8 = scmp.ge.s32.totalorder %s1029_s16, 1  ;;  %p331_p9 = scmp.lt.s32.totalorder %s1029_s16, 3 }
  0x28   : > { %p332_p10 = pnand %p843_p8, %p331_p9 }
  0x29   : > { %s338_s30 = sand.u32 (!%p332_p10), 1, %s1013_s12   ;;  %v982_v32 = vld [vmem:[%s1239_s0 + $0x4] ss:$8 sps:$4 sm:$0xff] (!%p332_p10)   ;;  %v980_v1 = vld [vmem:[%s1239_s0] ss:$8 sps:$4 sm:$0xff] (!%p332_p10)   ;;  %s846_s10 = sshll.u32 (!%p332_p10), %s1021_s14, 1  ;;  %v421_v2 = vlaneseq (!%p332_p10) }
  0x2a   : > { %335 = sbr.rel (%p332_p10) target bundleno = 364 (0x16c), region = 66  ;;  %s844_s4 = sshll.u32 (!%p332_p10), %s338_s30, 8  ;;  %633 = vmatprep.mubr.bf16.mxu0 (!%p332_p10), %v982_v32 }
  0x2b   : > { %s1175_s7 = scalar_lea.vmem (!%p332_p10), [#allocation2], %s844_s4  ;;  %p379_p11 = scmp.lt.s32.totalorder (!%p332_p10), %s846_s10, 3  ;;  %v422_v3 = vshrl.u32 (!%p332_p10), %v421_v2, 7 }
  0x2c   : > { %v932_v33 = vld [vmem:[%s1175_s7 + $0x4] ss:$8 sps:$4 sm:$0xff] (!%p332_p10)   ;;  %v934_v34 = vld [vmem:[%s1175_s7] ss:$8 sps:$4 sm:$0xff] (!%p332_p10)   ;;  %v935_v35 = vld [vmem:[%s1175_s7 + $0x14] ss:$8 sps:$4 sm:$0xff] (!%p332_p10)  }
  0x2d   : > { %601 = vmatprep.subr.bf16.mxu0 (!%p332_p10), %v932_v33  ;;  %v937_v36 = vld [vmem:[%s1175_s7 + $0x10] ss:$8 sps:$4 sm:$0xff] (!%p332_p10)   ;;  %v938_v37 = vld [vmem:[%s1175_s7 + $0x24] ss:$8 sps:$4 sm:$0xff] (!%p332_p10)   ;;  %v940_v38 = vld [vmem:[%s1175_s7 + $0x20] ss:$8 sps:$4 sm:$0xff] (!%p332_p10)  }
  0x2e   : > { %602 = vmatpush1.bf16.msra.mxu0 (!%p332_p10), %v934_v34  ;;  %v941_v39 = vld [vmem:[%s1175_s7 + $0x34] ss:$8 sps:$4 sm:$0xff] (!%p332_p10)   ;;  %v943_v40 = vld [vmem:[%s1175_s7 + $0x30] ss:$8 sps:$4 sm:$0xff] (!%p332_p10)   ;;  %v944_v41 = vld [vmem:[%s1175_s7 + $0x44] ss:$8 sps:$4 sm:$0xff] (!%p332_p10)  }
  0x2f   : > { %603 = vmatprep.subr.bf16.mxu0 (!%p332_p10), %v935_v35  ;;  %v946_v42 = vld [vmem:[%s1175_s7 + $0x40] ss:$8 sps:$4 sm:$0xff] (!%p332_p10)   ;;  %v947_v43 = vld [vmem:[%s1175_s7 + $0x54] ss:$8 sps:$4 sm:$0xff] (!%p332_p10)   ;;  %v949_v44 = vld [vmem:[%s1175_s7 + $0x50] ss:$8 sps:$4 sm:$0xff] (!%p332_p10)  }
  0x30   : > { %v950_v45 = vld [vmem:[%s1175_s7 + $0x64] ss:$8 sps:$4 sm:$0xff] (!%p332_p10)   ;;  %v952_v46 = vld [vmem:[%s1175_s7 + $0x60] ss:$8 sps:$4 sm:$0xff] (!%p332_p10)   ;;  %v953_v47 = vld [vmem:[%s1175_s7 + $0x74] ss:$8 sps:$4 sm:$0xff] (!%p332_p10)  }
  0x31   : > { %v955_v48 = vld [vmem:[%s1175_s7 + $0x70] ss:$8 sps:$4 sm:$0xff]   ;;  %v956_v49 = vld [vmem:[%s1175_s7 + $0x84] ss:$8 sps:$4 sm:$0xff]   ;;  %v958_v50 = vld [vmem:[%s1175_s7 + $0x80] ss:$8 sps:$4 sm:$0xff]  }
  0x32   : > { %604 = vmatpush1.bf16.msra.mxu0 %v937_v36  ;;  %v959_v51 = vld [vmem:[%s1175_s7 + $0x94] ss:$8 sps:$4 sm:$0xff]   ;;  %v961_v52 = vld [vmem:[%s1175_s7 + $0x90] ss:$8 sps:$4 sm:$0xff]   ;;  %v962_v53 = vld [vmem:[%s1175_s7 + $0xa4] ss:$8 sps:$4 sm:$0xff]  }
  0x33   : > { %605 = vmatprep.subr.bf16.mxu0 %v938_v37  ;;  %v964_v54 = vld [vmem:[%s1175_s7 + $0xa0] ss:$8 sps:$4 sm:$0xff]   ;;  %v965_v55 = vld [vmem:[%s1175_s7 + $0xb4] ss:$8 sps:$4 sm:$0xff]   ;;  %v967_v56 = vld [vmem:[%s1175_s7 + $0xb0] ss:$8 sps:$4 sm:$0xff]  }
  0x34   : > { %v968_v57 = vld [vmem:[%s1175_s7 + $0xc4] ss:$8 sps:$4 sm:$0xff]   ;;  %v970_v58 = vld [vmem:[%s1175_s7 + $0xc0] ss:$8 sps:$4 sm:$0xff]   ;;  %v971_v59 = vld [vmem:[%s1175_s7 + $0xd4] ss:$8 sps:$4 sm:$0xff]  }
  0x35   : > { %v973_v60 = vld [vmem:[%s1175_s7 + $0xd0] ss:$8 sps:$4 sm:$0xff]   ;;  %v974_v61 = vld [vmem:[%s1175_s7 + $0xe4] ss:$8 sps:$4 sm:$0xff]   ;;  %v976_v62 = vld [vmem:[%s1175_s7 + $0xe0] ss:$8 sps:$4 sm:$0xff]  }
  0x36   : > { %606 = vmatpush1.bf16.msra.mxu0 %v940_v38  ;;  %v977_v63 = vld [vmem:[%s1175_s7 + $0xf4] ss:$8 sps:$4 sm:$0xff]   ;;  %v979_v0 = vld [vmem:[%s1175_s7 + $0xf0] ss:$8 sps:$4 sm:$0xff]   ;;  %s1251_s10 = smov (!%p379_p11, %s846_s10), 3  ;;  %v423_v4 = vsub.s32 0, %v422_v3 }
  0x37   : > { %607 = vmatprep.subr.bf16.mxu0 %v941_v39  ;;  %s381_s19 = scalar_lea.vmem %s1241_s2, %s1251_s10  ;;  %v427_v6 = vsub.s32 1, %v422_v3  ;;  %s845_s20 = sshll.u32 %s338_s30, 4 }
  0x38   : > { %v419_v5 = vld [vmem:[%s381_s19] sm:$0x3]  ;;  %s369_s23 = scalar_lea.vmem [#allocation3], %s845_s20  ;;  %s891_s24 = sshll.u32 (%p1086_p6), %s1021_s14, 3 }
  0x39   : > { %v424_v7 = vrot.slane %v419_v5, %v423_v4  ;;  %v428_v8 = vrot.slane %v419_v5, %v427_v6  ;;  %s706_s26 = scalar_lea.vmem (%p1086_p6), %s1242_s3, %s891_s24 }
  0x3a   : > { %608 = vmatpush1.bf16.msra.mxu0 %v943_v40 }
  0x3b   : > { %609 = vmatprep.subr.bf16.mxu0 %v944_v41 }
  0x3e   : > { %610 = vmatpush1.bf16.msra.mxu0 %v946_v42 }
  0x3f   : > { %611 = vmatprep.subr.bf16.mxu0 %v947_v43 }
  0x42   : > { %612 = vmatpush1.bf16.msra.mxu0 %v949_v44 }
  0x43   : > { %613 = vmatprep.subr.bf16.mxu0 %v950_v45 }
  0x46   : > { %614 = vmatpush1.bf16.msra.mxu0 %v952_v46 }
  0x47   : > { %615 = vmatprep.subr.bf16.mxu0 %v953_v47 }
  0x4a   : > { %616 = vmatpush1.bf16.msra.mxu0 %v955_v48 }
  0x4b   : > { %617 = vmatprep.subr.bf16.mxu0 %v956_v49 }
  0x4e   : > { %618 = vmatpush1.bf16.msra.mxu0 %v958_v50 }
  0x4f   : > { %619 = vmatprep.subr.bf16.mxu0 %v959_v51 }
  0x52   : > { %620 = vmatpush1.bf16.msra.mxu0 %v961_v52 }
  0x53   : > { %621 = vmatprep.subr.bf16.mxu0 %v962_v53 }
  0x56   : > { %622 = vmatpush1.bf16.msra.mxu0 %v964_v54 }
  0x57   : > { %623 = vmatprep.subr.bf16.mxu0 %v965_v55 }
  0x5a   : > { %624 = vmatpush1.bf16.msra.mxu0 %v967_v56 }
  0x5b   : > { %625 = vmatprep.subr.bf16.mxu0 %v968_v57 }
  0x5e   : > { %626 = vmatpush1.bf16.msra.mxu0 %v970_v58 }
  0x5f   : > { %627 = vmatprep.subr.bf16.mxu0 %v971_v59 }
  0x62   : > { %628 = vmatpush1.bf16.msra.mxu0 %v973_v60 }
  0x63   : > { %629 = vmatprep.subr.bf16.mxu0 %v974_v61 }
  0x66   : > { %630 = vmatpush1.bf16.msra.mxu0 %v976_v62 }
  0x67   : > { %631 = vmatprep.subr.bf16.mxu0 %v977_v63 }
  0x6a   : > { %632 = vmatpush1.bf16.msra.mxu0 %v979_v0 }
  0x6d   : > { %634 = vmatmul.mubr.bf16.vlgmr.msra.gmra.mrb[0].mxu0 %v980_v1 }
 0x140   : > { %v635_v9 = vpop.f32.mrb[0].mxu0 }
 0x141   : > { %v636_v10 = vadd.f32 %v635_v9, %v424_v7  ;;  %v637_v11 = vpop.f32.mrb[1].mxu0 }
 0x142   : > { %v638_v12 = vadd.f32 %v637_v11, %v428_v8  ;;  %v639_v13 = vpop.f32.mrb[2].mxu0 }
 0x143   : > { %v644_v14 = vmul.f32 %v636_v10, %v636_v10  ;;  %v640_v15 = vadd.f32 %v639_v13, %v424_v7  ;;  %v641_v16 = vpop.f32.mrb[3].mxu0 }
 0x144   : > { %v645_v17 = vmul.f32 %v638_v12, %v638_v12  ;;  %v642_v18 = vadd.f32 %v641_v16, %v428_v8 }
 0x145   : > { %v648_v19 = vmul.f32 %v644_v14, %v636_v10  ;;  %v646_v20 = vmul.f32 %v640_v15, %v640_v15 }
 0x146   : > { %v649_v21 = vmul.f32 %v645_v17, %v638_v12  ;;  %v647_v22 = vmul.f32 %v642_v18, %v642_v18 }
 0x147   : > { %v652_v23 = vmul.f32 0.044715, %v648_v19  ;;  %v650_v24 = vmul.f32 %v646_v20, %v640_v15 }
 0x148   : > { %v653_v25 = vmul.f32 0.044715, %v649_v21  ;;  %v651_v26 = vmul.f32 %v647_v22, %v642_v18 }
 0x149   : > { %v656_v27 = vadd.f32 %v652_v23, %v636_v10  ;;  %v654_v28 = vmul.f32 0.044715, %v650_v24 }
 0x14a   : > { %v657_v29 = vadd.f32 %v653_v25, %v638_v12  ;;  %v655_v30 = vmul.f32 0.044715, %v651_v26 }
 0x14b   : > { %v660_v31 = vmul.f32 0.7978846, %v656_v27  ;;  %v658_v32 = vadd.f32 %v654_v28, %v640_v15 }
 0x14c   : > { %v661_v33 = vmul.f32 0.7978846, %v657_v29  ;;  %v659_v34 = vadd.f32 %v655_v30, %v642_v18 }
 0x14d   : > { %983 = vtanh.f32 %v660_v31  ;;  %v662_v35 = vmul.f32 0.7978846, %v658_v32 }
 0x14e   : > { %985 = vtanh.f32 %v661_v33  ;;  %v663_v36 = vmul.f32 0.7978846, %v659_v34 }
 0x14f   : > { %987 = vtanh.f32 %v662_v35 }
 0x150   : > { %989 = vtanh.f32 %v663_v36 }
 0x157   : > { %v984_v37 = vpop.eup %983 }
 0x158   : > { %v986_v38 = vpop.eup %985  ;;  %v668_v39 = vadd.f32 1.0, %v984_v37 }
 0x159   : > { %v988_v40 = vpop.eup %987  ;;  %v669_v41 = vadd.f32 1.0, %v986_v38 }
 0x15a   : > { %v990_v42 = vpop.eup %989  ;;  %v672_v43 = vmul.f32 0.5, %v668_v39  ;;  %v670_v44 = vadd.f32 1.0, %v988_v40 }
 0x15b   : > { %v673_v45 = vmul.f32 0.5, %v669_v41  ;;  %v671_v46 = vadd.f32 1.0, %v990_v42 }
 0x15c   : > { %v676_v47 = vmul.f32 %v672_v43, %v636_v10  ;;  %v674_v48 = vmul.f32 0.5, %v670_v44 }
 0x15d   : > { %v677_v49 = vmul.f32 %v673_v45, %v638_v12  ;;  %v675_v50 = vmul.f32 0.5, %v671_v46  ;;  %700 = sbr.rel (!%p1086_p6) target bundleno = 364 (0x16c), region = 74 }
 0x15e   : > { %v678_v51 = vmul.f32 %v674_v48, %v640_v15 }
 0x15f   : > { %v889_v52 = vpack.c.bf16 %v677_v49, %v676_v47  ;;  %v679_v53 = vmul.f32 %v675_v50, %v642_v18 }
 0x161   : > { %692 = vst [vmem:[%s369_s23] sm:$0xff] %v889_v52  ;;  %v890_v54 = vpack.c.bf16 %v679_v53, %v678_v51 }
 0x163   : > { %693 = vst [vmem:[%s369_s23 + $0x8] sm:$0xff] %v890_v54 }
 0x168   : > { %v736_v55 = vld [vmem:[%s369_s23] sm:$0xff] }
 0x169   : > { %737 = vst [vmem:[%s706_s26] sm:$0xff] %v736_v55 }
 0x16a   : > { %v738_v56 = vld [vmem:[%s369_s23 + $0x8] sm:$0xff] }
 0x16b   : > { %739 = vst [vmem:[%s706_s26 + $0x10] sm:$0xff] %v738_v56 }
 0x16c PF: > { %s13_s16 = sadd.s32 1, %s1029_s16   ;;  %s1244_s12 = smov %s1017_s13 }
 0x16d   : > { %p10_p12 = scmp.ge.s32.totalorder %s13_s16, 4   ;;  %s1245_s13 = smov %s1091_s22 }
 0x16e   : > { %s1246_s14 = smov %s1025_s15  ;;  %s1247_s15 = smov %s1249_s17 }
 0x16f   :  { %12 = sbr.rel (!%p10_p12) target bundleno = 3 (0x3), region = 149 }

// kernel: bart_forward.37
= control target key start
LH: loop header
LB: loop body
LE: loop exit
PB: predicated region body
PF: predicated region fallthrough
CT: control target
= control target key end

     0   :  { %s1007_s12 = smov 0   ;;  %s1009_s13 = smov 0   ;;  %s1195_s0 = inlined_call_operand.vmem [shape: bf16[16,256], index: 0, kind: input, shape index: {}]   ;;  %s1196_s1 = inlined_call_operand.vmem [shape: bf16[256,768], index: 1, kind: input, shape index: {}]   ;;  %s1197_s2 = inlined_call_operand.vmem [shape: f32[1,768], index: 2, kind: input, shape index: {}]   ;;  %s1198_s3 = inlined_call_operand.vmem [shape: bf16[16,768], index: 3, kind: output, shape index: {}]  }
   0x1   :  { %s1011_s14 = smov 0   ;;  %s1013_s15 = smov 0  }
   0x2   :  { %s1015_s16 = smov 0  }
   0x3 LB: > { %s22_s17 = sadd.s32 1, %s981_s15  ;;  %s799_s18 = sadd.s32 4294967295, %s985_s16   ;;  %s985_s16 = sphi %s1015_s16, %s13_s16   ;;  %s981_s15 = sphi %s1013_s15, %s1203_s15   ;;  %s977_s14 = sphi %s1011_s14, %s1202_s14   ;;  %s973_s13 = sphi %s1009_s13, %s1201_s13   ;;  %s969_s12 = sphi %s1007_s12, %s1200_s12  }
   0x4   : > { %p23_p0 = scmp.ge.s32.totalorder %s22_s17, 3  ;;  %p65_p1 = scmp.ne.s32.totalorder %s973_s13, %s969_s12 }
   0x5   : > { %p66_p2 = scmp.eq.s32.totalorder %s985_s16, 0  ;;  %p123_p4 = scmp.eq.s32.totalorder %s799_s18, 2 }
   0x6   : > { %s1205_s17 = smov (%p23_p0, %s22_s17), 0  ;;  %s58_s20 = sadd.s32 1, %s973_s13 }
   0x7   : > { %p67_p3 = por %p66_p2, %p65_p1  ;;  %s55_s19 = ssub.s32 %s981_s15, %s1205_s17 }
   0x8   : > { %p56_p5 = scmp.eq.s32.totalorder %s55_s19, 0  ;;  %p1042_p6 = por %p123_p4, %p65_p1 }
   0x9   : > { %p803_p7 = scmp.ge.s32.totalorder %s985_s16, 3 }
   0xa   : > { %s1047_s22 = scalar_select %p56_p5, %s973_s13, %s58_s20  }
   0xb   : > { %155 = sbr.rel (%p803_p7) target bundleno = 38 (0x26), region = 20 }
  0x12   : > { %158 = sbr.rel (!%p67_p3) target bundleno = 38 (0x26), region = 24  ;;  %s160_s23 = sand.u32 (%p67_p3), 1, %s973_s13  }
  0x13   : > { %s852_s24 = sshll.u32 (%p67_p3), %s981_s15, 3  ;;  %s804_s25 = sshll.u32 (%p67_p3), %s160_s23, 8 }
  0x14   : > { %s1055_s28 = scalar_lea.vmem (%p67_p3), %s1196_s1, %s852_s24  ;;  %s1060_s29 = scalar_lea.vmem (%p67_p3), [#allocation2], %s804_s25 }
  0x15   : > { %v255_v0 = vld [vmem:[%s1055_s28] sm:$0xff] (%p67_p3)  ;;  %v257_v1 = vld [vmem:[%s1055_s28 + $0x18] sm:$0xff] (%p67_p3)  ;;  %v259_v2 = vld [vmem:[%s1055_s28 + $0x30] sm:$0xff] (%p67_p3) }
  0x16   : > { %256 = vst [vmem:[%s1060_s29] sm:$0xff] (%p67_p3), %v255_v0  ;;  %258 = vst [vmem:[%s1060_s29 + $0x8] sm:$0xff] (%p67_p3), %v257_v1  ;;  %v261_v3 = vld [vmem:[%s1055_s28 + $0x48] sm:$0xff] (%p67_p3)  ;;  %v263_v4 = vld [vmem:[%s1055_s28 + $0x60] sm:$0xff] (%p67_p3) }
  0x17   : > { %260 = vst [vmem:[%s1060_s29 + $0x10] sm:$0xff] (%p67_p3), %v259_v2  ;;  %v265_v5 = vld [vmem:[%s1055_s28 + $0x78] sm:$0xff] (%p67_p3)  ;;  %262 = vst [vmem:[%s1060_s29 + $0x18] sm:$0xff] (%p67_p3), %v261_v3  ;;  %v267_v6 = vld [vmem:[%s1055_s28 + $0x90] sm:$0xff] (%p67_p3) }
  0x18   : > { %264 = vst [vmem:[%s1060_s29 + $0x20] sm:$0xff] (%p67_p3), %v263_v4  ;;  %266 = vst [vmem:[%s1060_s29 + $0x28] sm:$0xff] (%p67_p3), %v265_v5  ;;  %v269_v7 = vld [vmem:[%s1055_s28 + $0xa8] sm:$0xff] (%p67_p3)  ;;  %v271_v8 = vld [vmem:[%s1055_s28 + $0xc0] sm:$0xff] (%p67_p3) }
  0x19   : > { %268 = vst [vmem:[%s1060_s29 + $0x30] sm:$0xff] %v267_v6  ;;  %270 = vst [vmem:[%s1060_s29 + $0x38] sm:$0xff] %v269_v7  ;;  %v273_v9 = vld [vmem:[%s1055_s28 + $0xd8] sm:$0xff]  ;;  %v275_v10 = vld [vmem:[%s1055_s28 + $0xf0] sm:$0xff] }
  0x1a   : > { %272 = vst [vmem:[%s1060_s29 + $0x40] sm:$0xff] %v271_v8  ;;  %v277_v11 = vld [vmem:[%s1055_s28 + $0x108] sm:$0xff]  ;;  %274 = vst [vmem:[%s1060_s29 + $0x48] sm:$0xff] %v273_v9  ;;  %v279_v12 = vld [vmem:[%s1055_s28 + $0x120] sm:$0xff] }
  0x1b   : > { %276 = vst [vmem:[%s1060_s29 + $0x50] sm:$0xff] %v275_v10  ;;  %278 = vst [vmem:[%s1060_s29 + $0x58] sm:$0xff] %v277_v11  ;;  %v281_v13 = vld [vmem:[%s1055_s28 + $0x138] sm:$0xff]  ;;  %v283_v14 = vld [vmem:[%s1055_s28 + $0x150] sm:$0xff] }
  0x1c   : > { %280 = vst [vmem:[%s1060_s29 + $0x60] sm:$0xff] %v279_v12  ;;  %282 = vst [vmem:[%s1060_s29 + $0x68] sm:$0xff] %v281_v13  ;;  %v285_v15 = vld [vmem:[%s1055_s28 + $0x168] sm:$0xff]  ;;  %v287_v16 = vld [vmem:[%s1055_s28 + $0x180] sm:$0xff] }
  0x1d   : > { %284 = vst [vmem:[%s1060_s29 + $0x70] sm:$0xff] %v283_v14  ;;  %v289_v17 = vld [vmem:[%s1055_s28 + $0x198] sm:$0xff]  ;;  %286 = vst [vmem:[%s1060_s29 + $0x78] sm:$0xff] %v285_v15  ;;  %v291_v18 = vld [vmem:[%s1055_s28 + $0x1b0] sm:$0xff] }
  0x1e   : > { %288 = vst [vmem:[%s1060_s29 + $0x80] sm:$0xff] %v287_v16  ;;  %290 = vst [vmem:[%s1060_s29 + $0x88] sm:$0xff] %v289_v17  ;;  %v293_v19 = vld [vmem:[%s1055_s28 + $0x1c8] sm:$0xff]  ;;  %v295_v20 = vld [vmem:[%s1055_s28 + $0x1e0] sm:$0xff] }
  0x1f   : > { %292 = vst [vmem:[%s1060_s29 + $0x90] sm:$0xff] %v291_v18  ;;  %294 = vst [vmem:[%s1060_s29 + $0x98] sm:$0xff] %v293_v19  ;;  %v297_v21 = vld [vmem:[%s1055_s28 + $0x1f8] sm:$0xff]  ;;  %v299_v22 = vld [vmem:[%s1055_s28 + $0x210] sm:$0xff] }
  0x20   : > { %296 = vst [vmem:[%s1060_s29 + $0xa0] sm:$0xff] %v295_v20  ;;  %v301_v23 = vld [vmem:[%s1055_s28 + $0x228] sm:$0xff]  ;;  %298 = vst [vmem:[%s1060_s29 + $0xa8] sm:$0xff] %v297_v21  ;;  %v303_v24 = vld [vmem:[%s1055_s28 + $0x240] sm:$0xff] }
  0x21   : > { %300 = vst [vmem:[%s1060_s29 + $0xb0] sm:$0xff] %v299_v22  ;;  %302 = vst [vmem:[%s1060_s29 + $0xb8] sm:$0xff] %v301_v23  ;;  %v305_v25 = vld [vmem:[%s1055_s28 + $0x258] sm:$0xff]  ;;  %v307_v26 = vld [vmem:[%s1055_s28 + $0x270] sm:$0xff] }
  0x22   : > { %304 = vst [vmem:[%s1060_s29 + $0xc0] sm:$0xff] %v303_v24  ;;  %306 = vst [vmem:[%s1060_s29 + $0xc8] sm:$0xff] %v305_v25  ;;  %v309_v27 = vld [vmem:[%s1055_s28 + $0x288] sm:$0xff]  ;;  %v311_v28 = vld [vmem:[%s1055_s28 + $0x2a0] sm:$0xff] }
  0x23   : > { %308 = vst [vmem:[%s1060_s29 + $0xd0] sm:$0xff] %v307_v26  ;;  %v313_v29 = vld [vmem:[%s1055_s28 + $0x2b8] sm:$0xff]  ;;  %310 = vst [vmem:[%s1060_s29 + $0xd8] sm:$0xff] %v309_v27  ;;  %v315_v30 = vld [vmem:[%s1055_s28 + $0x2d0] sm:$0xff] }
  0x24   : > { %312 = vst [vmem:[%s1060_s29 + $0xe0] sm:$0xff] %v311_v28  ;;  %314 = vst [vmem:[%s1060_s29 + $0xe8] sm:$0xff] %v313_v29  ;;  %v317_v31 = vld [vmem:[%s1055_s28 + $0x2e8] sm:$0xff] }
  0x25   : > { %316 = vst [vmem:[%s1060_s29 + $0xf0] sm:$0xff] %v315_v30  ;;  %318 = vst [vmem:[%s1060_s29 + $0xf8] sm:$0xff] %v317_v31 }
  0x26 PF: > { %p807_p8 = scmp.ge.s32.totalorder %s985_s16, 1  ;;  %p331_p9 = scmp.lt.s32.totalorder %s985_s16, 4 }
  0x28   : > { %p332_p10 = pnand %p807_p8, %p331_p9 }
  0x29   : > { %s338_s30 = sand.u32 (!%p332_p10), 1, %s969_s12   ;;  %v946_v32 = vld [vmem:[%s1195_s0 + $0x4] ss:$8 sps:$4 sm:$0xff] (!%p332_p10)   ;;  %v944_v1 = vld [vmem:[%s1195_s0] ss:$8 sps:$4 sm:$0xff] (!%p332_p10)   ;;  %s810_s10 = sshll.u32 (!%p332_p10), %s977_s14, 1  ;;  %v421_v2 = vlaneseq (!%p332_p10) }
  0x2a   : > { %335 = sbr.rel (%p332_p10) target bundleno = 337 (0x151), region = 66  ;;  %s808_s4 = sshll.u32 (!%p332_p10), %s338_s30, 8  ;;  %633 = vmatprep.mubr.bf16.mxu0 (!%p332_p10), %v946_v32 }
  0x2b   : > { %s1131_s7 = scalar_lea.vmem (!%p332_p10), [#allocation2], %s808_s4  ;;  %p379_p11 = scmp.lt.s32.totalorder (!%p332_p10), %s810_s10, 5  ;;  %v422_v3 = vshrl.u32 (!%p332_p10), %v421_v2, 7 }
  0x2c   : > { %v896_v33 = vld [vmem:[%s1131_s7 + $0x4] ss:$8 sps:$4 sm:$0xff] (!%p332_p10)   ;;  %v898_v34 = vld [vmem:[%s1131_s7] ss:$8 sps:$4 sm:$0xff] (!%p332_p10)   ;;  %v899_v35 = vld [vmem:[%s1131_s7 + $0x14] ss:$8 sps:$4 sm:$0xff] (!%p332_p10)  }
  0x2d   : > { %601 = vmatprep.subr.bf16.mxu0 (!%p332_p10), %v896_v33  ;;  %v901_v36 = vld [vmem:[%s1131_s7 + $0x10] ss:$8 sps:$4 sm:$0xff] (!%p332_p10)   ;;  %v902_v37 = vld [vmem:[%s1131_s7 + $0x24] ss:$8 sps:$4 sm:$0xff] (!%p332_p10)   ;;  %v904_v38 = vld [vmem:[%s1131_s7 + $0x20] ss:$8 sps:$4 sm:$0xff] (!%p332_p10)  }
  0x2e   : > { %602 = vmatpush1.bf16.msra.mxu0 (!%p332_p10), %v898_v34  ;;  %v905_v39 = vld [vmem:[%s1131_s7 + $0x34] ss:$8 sps:$4 sm:$0xff] (!%p332_p10)   ;;  %v907_v40 = vld [vmem:[%s1131_s7 + $0x30] ss:$8 sps:$4 sm:$0xff] (!%p332_p10)   ;;  %v908_v41 = vld [vmem:[%s1131_s7 + $0x44] ss:$8 sps:$4 sm:$0xff] (!%p332_p10)  }
  0x2f   : > { %603 = vmatprep.subr.bf16.mxu0 (!%p332_p10), %v899_v35  ;;  %v910_v42 = vld [vmem:[%s1131_s7 + $0x40] ss:$8 sps:$4 sm:$0xff] (!%p332_p10)   ;;  %v911_v43 = vld [vmem:[%s1131_s7 + $0x54] ss:$8 sps:$4 sm:$0xff] (!%p332_p10)   ;;  %v913_v44 = vld [vmem:[%s1131_s7 + $0x50] ss:$8 sps:$4 sm:$0xff] (!%p332_p10)  }
  0x30   : > { %v914_v45 = vld [vmem:[%s1131_s7 + $0x64] ss:$8 sps:$4 sm:$0xff] (!%p332_p10)   ;;  %v916_v46 = vld [vmem:[%s1131_s7 + $0x60] ss:$8 sps:$4 sm:$0xff] (!%p332_p10)   ;;  %v917_v47 = vld [vmem:[%s1131_s7 + $0x74] ss:$8 sps:$4 sm:$0xff] (!%p332_p10)  }
  0x31   : > { %v919_v48 = vld [vmem:[%s1131_s7 + $0x70] ss:$8 sps:$4 sm:$0xff]   ;;  %v920_v49 = vld [vmem:[%s1131_s7 + $0x84] ss:$8 sps:$4 sm:$0xff]   ;;  %v922_v50 = vld [vmem:[%s1131_s7 + $0x80] ss:$8 sps:$4 sm:$0xff]  }
  0x32   : > { %604 = vmatpush1.bf16.msra.mxu0 %v901_v36  ;;  %v923_v51 = vld [vmem:[%s1131_s7 + $0x94] ss:$8 sps:$4 sm:$0xff]   ;;  %v925_v52 = vld [vmem:[%s1131_s7 + $0x90] ss:$8 sps:$4 sm:$0xff]   ;;  %v926_v53 = vld [vmem:[%s1131_s7 + $0xa4] ss:$8 sps:$4 sm:$0xff]  }
  0x33   : > { %605 = vmatprep.subr.bf16.mxu0 %v902_v37  ;;  %v928_v54 = vld [vmem:[%s1131_s7 + $0xa0] ss:$8 sps:$4 sm:$0xff]   ;;  %v929_v55 = vld [vmem:[%s1131_s7 + $0xb4] ss:$8 sps:$4 sm:$0xff]   ;;  %v931_v56 = vld [vmem:[%s1131_s7 + $0xb0] ss:$8 sps:$4 sm:$0xff]  }
  0x34   : > { %v932_v57 = vld [vmem:[%s1131_s7 + $0xc4] ss:$8 sps:$4 sm:$0xff]   ;;  %v934_v58 = vld [vmem:[%s1131_s7 + $0xc0] ss:$8 sps:$4 sm:$0xff]   ;;  %v935_v59 = vld [vmem:[%s1131_s7 + $0xd4] ss:$8 sps:$4 sm:$0xff]  }
  0x35   : > { %v937_v60 = vld [vmem:[%s1131_s7 + $0xd0] ss:$8 sps:$4 sm:$0xff]   ;;  %v938_v61 = vld [vmem:[%s1131_s7 + $0xe4] ss:$8 sps:$4 sm:$0xff]   ;;  %v940_v62 = vld [vmem:[%s1131_s7 + $0xe0] ss:$8 sps:$4 sm:$0xff]  }
  0x36   : > { %606 = vmatpush1.bf16.msra.mxu0 %v904_v38  ;;  %v941_v63 = vld [vmem:[%s1131_s7 + $0xf4] ss:$8 sps:$4 sm:$0xff]   ;;  %v943_v0 = vld [vmem:[%s1131_s7 + $0xf0] ss:$8 sps:$4 sm:$0xff]   ;;  %s1207_s10 = smov (!%p379_p11, %s810_s10), 5  ;;  %v423_v4 = vsub.s32 0, %v422_v3 }
  0x37   : > { %607 = vmatprep.subr.bf16.mxu0 %v905_v39  ;;  %s381_s19 = scalar_lea.vmem %s1197_s2, %s1207_s10  ;;  %v427_v6 = vsub.s32 1, %v422_v3  ;;  %s809_s20 = sshll.u32 %s338_s30, 4 }
  0x38   : > { %v419_v5 = vld [vmem:[%s381_s19] sm:$0x3]  ;;  %s369_s23 = scalar_lea.vmem [#allocation3], %s809_s20  ;;  %s855_s24 = sshll.u32 (%p1042_p6), %s977_s14, 3 }
  0x39   : > { %v424_v7 = vrot.slane %v419_v5, %v423_v4  ;;  %v428_v8 = vrot.slane %v419_v5, %v427_v6  ;;  %s670_s26 = scalar_lea.vmem (%p1042_p6), %s1198_s3, %s855_s24 }
  0x3a   : > { %608 = vmatpush1.bf16.msra.mxu0 %v907_v40 }
  0x3b   : > { %609 = vmatprep.subr.bf16.mxu0 %v908_v41 }
  0x3e   : > { %610 = vmatpush1.bf16.msra.mxu0 %v910_v42 }
  0x3f   : > { %611 = vmatprep.subr.bf16.mxu0 %v911_v43 }
  0x42   : > { %612 = vmatpush1.bf16.msra.mxu0 %v913_v44 }
  0x43   : > { %613 = vmatprep.subr.bf16.mxu0 %v914_v45 }
  0x46   : > { %614 = vmatpush1.bf16.msra.mxu0 %v916_v46 }
  0x47   : > { %615 = vmatprep.subr.bf16.mxu0 %v917_v47 }
  0x4a   : > { %616 = vmatpush1.bf16.msra.mxu0 %v919_v48 }
  0x4b   : > { %617 = vmatprep.subr.bf16.mxu0 %v920_v49 }
  0x4e   : > { %618 = vmatpush1.bf16.msra.mxu0 %v922_v50 }
  0x4f   : > { %619 = vmatprep.subr.bf16.mxu0 %v923_v51 }
  0x52   : > { %620 = vmatpush1.bf16.msra.mxu0 %v925_v52 }
  0x53   : > { %621 = vmatprep.subr.bf16.mxu0 %v926_v53 }
  0x56   : > { %622 = vmatpush1.bf16.msra.mxu0 %v928_v54 }
  0x57   : > { %623 = vmatprep.subr.bf16.mxu0 %v929_v55 }
  0x5a   : > { %624 = vmatpush1.bf16.msra.mxu0 %v931_v56 }
  0x5b   : > { %625 = vmatprep.subr.bf16.mxu0 %v932_v57 }
  0x5e   : > { %626 = vmatpush1.bf16.msra.mxu0 %v934_v58 }
  0x5f   : > { %627 = vmatprep.subr.bf16.mxu0 %v935_v59 }
  0x62   : > { %628 = vmatpush1.bf16.msra.mxu0 %v937_v60 }
  0x63   : > { %629 = vmatprep.subr.bf16.mxu0 %v938_v61 }
  0x66   : > { %630 = vmatpush1.bf16.msra.mxu0 %v940_v62 }
  0x67   : > { %631 = vmatprep.subr.bf16.mxu0 %v941_v63 }
  0x6a   : > { %632 = vmatpush1.bf16.msra.mxu0 %v943_v0 }
  0x6d   : > { %634 = vmatmul.mubr.bf16.vlgmr.msra.gmra.mrb[0].mxu0 %v944_v1 }
 0x140   : > { %v635_v9 = vpop.f32.mrb[0].mxu0 }
 0x141   : > { %v636_v10 = vadd.f32 %v635_v9, %v424_v7  ;;  %v637_v11 = vpop.f32.mrb[1].mxu0 }
 0x142   : > { %v638_v12 = vadd.f32 %v637_v11, %v428_v8  ;;  %v639_v13 = vpop.f32.mrb[2].mxu0  ;;  %664 = sbr.rel (!%p1042_p6) target bundleno = 337 (0x151), region = 74 }
 0x143   : > { %v640_v14 = vadd.f32 %v639_v13, %v424_v7  ;;  %v641_v15 = vpop.f32.mrb[3].mxu0 }
 0x144   : > { %v853_v16 = vpack.c.bf16 %v638_v12, %v636_v10  ;;  %v642_v17 = vadd.f32 %v641_v15, %v428_v8 }
 0x146   : > { %656 = vst [vmem:[%s369_s23] sm:$0xff] %v853_v16  ;;  %v854_v18 = vpack.c.bf16 %v642_v17, %v640_v14 }
 0x148   : > { %657 = vst [vmem:[%s369_s23 + $0x8] sm:$0xff] %v854_v18 }
 0x14d   : > { %v700_v19 = vld [vmem:[%s369_s23] sm:$0xff] }
 0x14e   : > { %701 = vst [vmem:[%s670_s26] sm:$0xff] %v700_v19 }
 0x14f   : > { %v702_v20 = vld [vmem:[%s369_s23 + $0x8] sm:$0xff] }
 0x150   : > { %703 = vst [vmem:[%s670_s26 + $0x18] sm:$0xff] %v702_v20 }
 0x151 PF: > { %s13_s16 = sadd.s32 1, %s985_s16   ;;  %s1200_s12 = smov %s973_s13 }
 0x152   : > { %p10_p12 = scmp.ge.s32.totalorder %s13_s16, 5   ;;  %s1201_s13 = smov %s1047_s22 }
 0x153   : > { %s1202_s14 = smov %s981_s15  ;;  %s1203_s15 = smov %s1205_s17 }
 0x154   :  { %12 = sbr.rel (!%p10_p12) target bundleno = 3 (0x3), region = 149 }

// kernel: bart_forward.36
= control target key start
LH: loop header
LB: loop body
LE: loop exit
PB: predicated region body
PF: predicated region fallthrough
CT: control target
= control target key end

     0   :  { %s1078_s1 = inlined_call_operand.vmem [shape: bf16[512,256], index: 1, kind: input, shape index: {}]   ;;  %s1079_s0 = inlined_call_operand.vmem [shape: bf16[16,512], index: 0, kind: input, shape index: {}]   ;;  %s1080_s2 = inlined_call_operand.vmem [shape: f32[1,256], index: 2, kind: input, shape index: {}]   ;;  %s1081_s3 = inlined_call_operand.vmem [shape: bf16[16,256], index: 3, kind: input, shape index: {}]   ;;  %s1082_s4 = inlined_call_operand.vmem [shape: f32[1,256], index: 4, kind: input, shape index: {}]   ;;  %s1083_s5 = inlined_call_operand.vmem [shape: f32[1,256], index: 5, kind: input, shape index: {}]   ;;  %s1084_s6 = inlined_call_operand.vmem [shape: bf16[16,256], index: 6, kind: output, shape index: {}]  }
   0x1   :  { %v702_v0 = vld [vmem:[%s1078_s1 + $0x4] ss:$8 sps:$4 sm:$0xff]   ;;  %v706_v2 = vld [vmem:[%s1078_s1] ss:$8 sps:$4 sm:$0xff]   ;;  %v708_v4 = vld [vmem:[%s1078_s1 + $0x14] ss:$8 sps:$4 sm:$0xff]  }
   0x2   :  { %v704_v1 = vld [vmem:[%s1078_s1 + $0x104] ss:$8 sps:$4 sm:$0xff]   ;;  %443 = vmatprep.subr.bf16.mxu1 %v702_v0  ;;  %v707_v3 = vld [vmem:[%s1078_s1 + $0x100] ss:$8 sps:$4 sm:$0xff]   ;;  %v710_v5 = vld [vmem:[%s1078_s1 + $0x114] ss:$8 sps:$4 sm:$0xff]  }
   0x3   :  { %486 = vmatprep.subr.bf16.mxu0 %v704_v1  ;;  %444 = vmatpush1.bf16.msra.mxu1 %v706_v2  ;;  %v712_v6 = vld [vmem:[%s1078_s1 + $0x10] ss:$8 sps:$4 sm:$0xff]   ;;  %v714_v8 = vld [vmem:[%s1078_s1 + $0x24] ss:$8 sps:$4 sm:$0xff]   ;;  %v718_v10 = vld [vmem:[%s1078_s1 + $0x20] ss:$8 sps:$4 sm:$0xff]  }
   0x4   :  { %487 = vmatpush1.bf16.msra.mxu0 %v707_v3  ;;  %445 = vmatprep.subr.bf16.mxu1 %v708_v4  ;;  %v713_v7 = vld [vmem:[%s1078_s1 + $0x110] ss:$8 sps:$4 sm:$0xff]   ;;  %v716_v9 = vld [vmem:[%s1078_s1 + $0x124] ss:$8 sps:$4 sm:$0xff]   ;;  %v719_v11 = vld [vmem:[%s1078_s1 + $0x120] ss:$8 sps:$4 sm:$0xff]   ;;  %v93_v4 = vlaneseq }
   0x5   :  { %488 = vmatprep.subr.bf16.mxu0 %v710_v5  ;;  %v720_v12 = vld [vmem:[%s1078_s1 + $0x34] ss:$8 sps:$4 sm:$0xff]   ;;  %v724_v14 = vld [vmem:[%s1078_s1 + $0x30] ss:$8 sps:$4 sm:$0xff]   ;;  %v726_v16 = vld [vmem:[%s1078_s1 + $0x44] ss:$8 sps:$4 sm:$0xff]  }
   0x6   :  { %v722_v13 = vld [vmem:[%s1078_s1 + $0x134] ss:$8 sps:$4 sm:$0xff]   ;;  %v725_v15 = vld [vmem:[%s1078_s1 + $0x130] ss:$8 sps:$4 sm:$0xff]   ;;  %v728_v17 = vld [vmem:[%s1078_s1 + $0x144] ss:$8 sps:$4 sm:$0xff]  }
   0x7   :  { %446 = vmatpush1.bf16.msra.mxu1 %v712_v6  ;;  %v730_v18 = vld [vmem:[%s1078_s1 + $0x40] ss:$8 sps:$4 sm:$0xff]   ;;  %v732_v20 = vld [vmem:[%s1078_s1 + $0x54] ss:$8 sps:$4 sm:$0xff]   ;;  %v736_v22 = vld [vmem:[%s1078_s1 + $0x50] ss:$8 sps:$4 sm:$0xff]  }
   0x8   :  { %489 = vmatpush1.bf16.msra.mxu0 %v713_v7  ;;  %447 = vmatprep.subr.bf16.mxu1 %v714_v8  ;;  %v731_v19 = vld [vmem:[%s1078_s1 + $0x140] ss:$8 sps:$4 sm:$0xff]   ;;  %v734_v21 = vld [vmem:[%s1078_s1 + $0x154] ss:$8 sps:$4 sm:$0xff]   ;;  %v737_v23 = vld [vmem:[%s1078_s1 + $0x150] ss:$8 sps:$4 sm:$0xff]  }
   0x9   :  { %490 = vmatprep.subr.bf16.mxu0 %v716_v9  ;;  %v738_v24 = vld [vmem:[%s1078_s1 + $0x64] ss:$8 sps:$4 sm:$0xff]   ;;  %v742_v26 = vld [vmem:[%s1078_s1 + $0x60] ss:$8 sps:$4 sm:$0xff]   ;;  %v744_v28 = vld [vmem:[%s1078_s1 + $0x74] ss:$8 sps:$4 sm:$0xff]  }
   0xa   :  { %v740_v25 = vld [vmem:[%s1078_s1 + $0x164] ss:$8 sps:$4 sm:$0xff]   ;;  %v743_v27 = vld [vmem:[%s1078_s1 + $0x160] ss:$8 sps:$4 sm:$0xff]   ;;  %v746_v29 = vld [vmem:[%s1078_s1 + $0x174] ss:$8 sps:$4 sm:$0xff]  }
   0xb   :  { %448 = vmatpush1.bf16.msra.mxu1 %v718_v10  ;;  %v748_v30 = vld [vmem:[%s1078_s1 + $0x70] ss:$8 sps:$4 sm:$0xff]   ;;  %v750_v32 = vld [vmem:[%s1078_s1 + $0x84] ss:$8 sps:$4 sm:$0xff]   ;;  %v754_v34 = vld [vmem:[%s1078_s1 + $0x80] ss:$8 sps:$4 sm:$0xff]  }
   0xc   :  { %491 = vmatpush1.bf16.msra.mxu0 %v719_v11  ;;  %449 = vmatprep.subr.bf16.mxu1 %v720_v12  ;;  %v749_v31 = vld [vmem:[%s1078_s1 + $0x170] ss:$8 sps:$4 sm:$0xff]   ;;  %v752_v33 = vld [vmem:[%s1078_s1 + $0x184] ss:$8 sps:$4 sm:$0xff]   ;;  %v755_v35 = vld [vmem:[%s1078_s1 + $0x180] ss:$8 sps:$4 sm:$0xff]  }
   0xd   :  { %492 = vmatprep.subr.bf16.mxu0 %v722_v13  ;;  %v756_v36 = vld [vmem:[%s1078_s1 + $0x94] ss:$8 sps:$4 sm:$0xff]   ;;  %v760_v38 = vld [vmem:[%s1078_s1 + $0x90] ss:$8 sps:$4 sm:$0xff]   ;;  %v762_v40 = vld [vmem:[%s1078_s1 + $0xa4] ss:$8 sps:$4 sm:$0xff]  }
   0xe   :  { %v758_v37 = vld [vmem:[%s1078_s1 + $0x194] ss:$8 sps:$4 sm:$0xff]   ;;  %v761_v39 = vld [vmem:[%s1078_s1 + $0x190] ss:$8 sps:$4 sm:$0xff]   ;;  %v764_v41 = vld [vmem:[%s1078_s1 + $0x1a4] ss:$8 sps:$4 sm:$0xff]  }
   0xf   :  { %450 = vmatpush1.bf16.msra.mxu1 %v724_v14  ;;  %v766_v42 = vld [vmem:[%s1078_s1 + $0xa0] ss:$8 sps:$4 sm:$0xff]   ;;  %v768_v44 = vld [vmem:[%s1078_s1 + $0xb4] ss:$8 sps:$4 sm:$0xff]   ;;  %v772_v46 = vld [vmem:[%s1078_s1 + $0xb0] ss:$8 sps:$4 sm:$0xff]  }
  0x10   :  { %493 = vmatpush1.bf16.msra.mxu0 %v725_v15  ;;  %451 = vmatprep.subr.bf16.mxu1 %v726_v16  ;;  %v767_v43 = vld [vmem:[%s1078_s1 + $0x1a0] ss:$8 sps:$4 sm:$0xff]   ;;  %v770_v45 = vld [vmem:[%s1078_s1 + $0x1b4] ss:$8 sps:$4 sm:$0xff]   ;;  %v773_v48 = vld [vmem:[%s1078_s1 + $0x1b0] ss:$8 sps:$4 sm:$0xff]  }
  0x11   :  { %494 = vmatprep.subr.bf16.mxu0 %v728_v17  ;;  %v800_v47 = vld [vmem:[%s1079_s0 + $0x4] ss:$16 sps:$4 sm:$0xff]   ;;  %v803_v51 = vld [vmem:[%s1079_s0 + $0xc] ss:$16 sps:$4 sm:$0xff]   ;;  %v778_v52 = vld [vmem:[%s1078_s1 + $0xc0] ss:$8 sps:$4 sm:$0xff]  }
  0x12   :  { %v774_v49 = vld [vmem:[%s1078_s1 + $0xc4] ss:$8 sps:$4 sm:$0xff]   ;;  %475 = vmatprep.mubr.bf16.mxu1 %v800_v47  ;;  %518 = vmatprep.mubr.bf16.mxu0 %v803_v51  ;;  %v779_v53 = vld [vmem:[%s1078_s1 + $0x1c0] ss:$8 sps:$4 sm:$0xff]   ;;  %v780_v54 = vld [vmem:[%s1078_s1 + $0xd4] ss:$8 sps:$4 sm:$0xff]  }
  0x13   :  { %452 = vmatpush1.bf16.msra.mxu1 %v730_v18  ;;  %v776_v50 = vld [vmem:[%s1078_s1 + $0x1c4] ss:$8 sps:$4 sm:$0xff]   ;;  %v782_v55 = vld [vmem:[%s1078_s1 + $0x1d4] ss:$8 sps:$4 sm:$0xff]   ;;  %v784_v56 = vld [vmem:[%s1078_s1 + $0xd0] ss:$8 sps:$4 sm:$0xff]  }
  0x14   :  { %495 = vmatpush1.bf16.msra.mxu0 %v731_v19  ;;  %453 = vmatprep.subr.bf16.mxu1 %v732_v20  ;;  %v785_v57 = vld [vmem:[%s1078_s1 + $0x1d0] ss:$8 sps:$4 sm:$0xff]   ;;  %v786_v58 = vld [vmem:[%s1078_s1 + $0xe4] ss:$8 sps:$4 sm:$0xff]   ;;  %v790_v60 = vld [vmem:[%s1078_s1 + $0xe0] ss:$8 sps:$4 sm:$0xff]  }
  0x15   :  { %496 = vmatprep.subr.bf16.mxu0 %v734_v21  ;;  %v788_v59 = vld [vmem:[%s1078_s1 + $0x1e4] ss:$8 sps:$4 sm:$0xff]   ;;  %v791_v61 = vld [vmem:[%s1078_s1 + $0x1e0] ss:$8 sps:$4 sm:$0xff]   ;;  %v792_v62 = vld [vmem:[%s1078_s1 + $0xf4] ss:$8 sps:$4 sm:$0xff]  }
  0x16   :  { %v794_v63 = vld [vmem:[%s1078_s1 + $0x1f4] ss:$8 sps:$4 sm:$0xff]   ;;  %v796_v0 = vld [vmem:[%s1078_s1 + $0xf0] ss:$8 sps:$4 sm:$0xff]   ;;  %v94_v5 = vshrl.u32 %v93_v4, 7  ;;  %v529_v11 = vld [vmem:[%s1081_s3] sm:$0xff] }
  0x17   :  { %454 = vmatpush1.bf16.msra.mxu1 %v736_v22  ;;  %v797_v1 = vld [vmem:[%s1078_s1 + $0x1f0] ss:$8 sps:$4 sm:$0xff]   ;;  %v91_v7 = vld [vmem:[%s1080_s2] sm:$0x3]  ;;  %v530_v17 = vld [vmem:[%s1081_s3 + $0x8] sm:$0xff]  ;;  %v531_v18 = vunpack.c.l.bf16 %v529_v11  ;;  %v532_v22 = vunpack.c.h.bf16 %v529_v11 }
  0x18   :  { %497 = vmatpush1.bf16.msra.mxu0 %v737_v23  ;;  %455 = vmatprep.subr.bf16.mxu1 %v738_v24  ;;  %v798_v2 = vld [vmem:[%s1079_s0] ss:$16 sps:$4 sm:$0xff]   ;;  %v801_v3 = vld [vmem:[%s1079_s0 + $0x8] ss:$16 sps:$4 sm:$0xff]   ;;  %v1047_v6 = vsub.s32 0, %v94_v5  ;;  %v1052_v8 = vsub.s32 1, %v94_v5 }
  0x19   :  { %498 = vmatprep.subr.bf16.mxu0 %v740_v25 }
  0x1a   :  { %v96_v9 = vrot.slane %v91_v7, %v1047_v6  ;;  %v100_v10 = vrot.slane %v91_v7, %v1052_v8 }
  0x1b   :  { %456 = vmatpush1.bf16.msra.mxu1 %v742_v26 }
  0x1c   :  { %499 = vmatpush1.bf16.msra.mxu0 %v743_v27  ;;  %457 = vmatprep.subr.bf16.mxu1 %v744_v28  ;;  %v533_v28 = vunpack.c.l.bf16 %v530_v17 }
  0x1d   :  { %500 = vmatprep.subr.bf16.mxu0 %v746_v29 }
  0x1f   :  { %458 = vmatpush1.bf16.msra.mxu1 %v748_v30  ;;  %v534_v30 = vunpack.c.h.bf16 %v530_v17 }
  0x20   :  { %501 = vmatpush1.bf16.msra.mxu0 %v749_v31  ;;  %459 = vmatprep.subr.bf16.mxu1 %v750_v32 }
  0x21   :  { %502 = vmatprep.subr.bf16.mxu0 %v752_v33 }
  0x23   :  { %460 = vmatpush1.bf16.msra.mxu1 %v754_v34 }
  0x24   :  { %503 = vmatpush1.bf16.msra.mxu0 %v755_v35  ;;  %461 = vmatprep.subr.bf16.mxu1 %v756_v36 }
  0x25   :  { %504 = vmatprep.subr.bf16.mxu0 %v758_v37 }
  0x27   :  { %462 = vmatpush1.bf16.msra.mxu1 %v760_v38 }
  0x28   :  { %505 = vmatpush1.bf16.msra.mxu0 %v761_v39  ;;  %463 = vmatprep.subr.bf16.mxu1 %v762_v40 }
  0x29   :  { %506 = vmatprep.subr.bf16.mxu0 %v764_v41 }
  0x2b   :  { %464 = vmatpush1.bf16.msra.mxu1 %v766_v42 }
  0x2c   :  { %507 = vmatpush1.bf16.msra.mxu0 %v767_v43  ;;  %465 = vmatprep.subr.bf16.mxu1 %v768_v44 }
  0x2d   :  { %508 = vmatprep.subr.bf16.mxu0 %v770_v45 }
  0x2f   :  { %466 = vmatpush1.bf16.msra.mxu1 %v772_v46 }
  0x30   :  { %509 = vmatpush1.bf16.msra.mxu0 %v773_v48  ;;  %467 = vmatprep.subr.bf16.mxu1 %v774_v49 }
  0x31   :  { %510 = vmatprep.subr.bf16.mxu0 %v776_v50 }
  0x33   :  { %468 = vmatpush1.bf16.msra.mxu1 %v778_v52 }
  0x34   :  { %511 = vmatpush1.bf16.msra.mxu0 %v779_v53  ;;  %469 = vmatprep.subr.bf16.mxu1 %v780_v54 }
  0x35   :  { %512 = vmatprep.subr.bf16.mxu0 %v782_v55 }
  0x37   :  { %470 = vmatpush1.bf16.msra.mxu1 %v784_v56 }
  0x38   :  { %513 = vmatpush1.bf16.msra.mxu0 %v785_v57  ;;  %471 = vmatprep.subr.bf16.mxu1 %v786_v58 }
  0x39   :  { %514 = vmatprep.subr.bf16.mxu0 %v788_v59  ;;  %v572_v59 = vld [vmem:[%s1082_s4] sm:$0x3] }
  0x3b   :  { %472 = vmatpush1.bf16.msra.mxu1 %v790_v60  ;;  %v588_v60 = vld [vmem:[%s1083_s5] sm:$0x3] }
  0x3c   :  { %515 = vmatpush1.bf16.msra.mxu0 %v791_v61  ;;  %473 = vmatprep.subr.bf16.mxu1 %v792_v62  ;;  %v577_v61 = vrot.slane %v572_v59, %v1047_v6  ;;  %v581_v62 = vrot.slane %v572_v59, %v1052_v8 }
  0x3d   :  { %516 = vmatprep.subr.bf16.mxu0 %v794_v63 }
  0x3f   :  { %474 = vmatpush1.bf16.msra.mxu1 %v796_v0  ;;  %v593_v0 = vrot.slane %v588_v60, %v1047_v6 }
  0x40   :  { %517 = vmatpush1.bf16.msra.mxu0 %v797_v1  ;;  %v597_v1 = vrot.slane %v588_v60, %v1052_v8 }
  0x42   :  { %476 = vmatmul.mubr.bf16.vlgmr.msra.gmra.mrb[0].mxu1 %v798_v2 }
  0x43   :  { %519 = vmatmul.mubr.bf16.vlgmr.msra.gmra.mrb[0].mxu0 %v801_v3 }
 0x115   :  { %v477_v12 = vpop.f32.mrb[0].mxu1 }
 0x116   :  { %v520_v13 = vpop.f32.mrb[0].mxu0  ;;  %v478_v14 = vadd.f32 %v477_v12, %v96_v9  ;;  %v479_v15 = vpop.f32.mrb[1].mxu1 }
 0x117   :  { %v522_v16 = vpop.f32.mrb[1].mxu0  ;;  %v480_v19 = vadd.f32 %v479_v15, %v100_v10  ;;  %v481_v20 = vpop.f32.mrb[2].mxu1 }
 0x118   :  { %v524_v21 = vpop.f32.mrb[2].mxu0  ;;  %v521_v23 = vadd.f32 %v520_v13, %v478_v14  ;;  %v482_v24 = vadd.f32 %v481_v20, %v96_v9  ;;  %v483_v25 = vpop.f32.mrb[3].mxu1 }
 0x119   :  { %v526_v26 = vpop.f32.mrb[3].mxu0  ;;  %v523_v27 = vadd.f32 %v522_v16, %v480_v19  ;;  %v484_v29 = vadd.f32 %v483_v25, %v100_v10 }
 0x11a   :  { %v525_v31 = vadd.f32 %v524_v21, %v482_v24  ;;  %v535_v32 = vadd.f32 %v531_v18, %v521_v23 }
 0x11b   :  { %v527_v33 = vadd.f32 %v526_v26, %v484_v29  ;;  %v536_v34 = vadd.f32 %v532_v22, %v523_v27 }
 0x11c   :  { %v537_v35 = vadd.f32 %v533_v28, %v525_v31 }
 0x11d   :  { %v538_v36 = vadd.f32 %v534_v30, %v527_v33  ;;  %v539_v37 = vadd.f32 %v536_v34, %v535_v32 }
 0x11f   :  { %540 = vadd.xlane.f32.xlu0 %v539_v37  ;;  %v542_v38 = vadd.f32 %v538_v36, %v537_v35 }
 0x123   :  { %543 = vadd.xlane.f32.xlu0 %v542_v38 }
 0x1ac   :  { %v541_v39 = vpop.xlane.xlu0 %540 }
 0x1ad   :  { %v546_v40 = vmul.f32 0.00390625, %v541_v39 }
 0x1af   :  { %v548_v41 = vsub.f32 %v535_v32, %v546_v40  ;;  %v549_v42 = vsub.f32 %v536_v34, %v546_v40 }
 0x1b0   :  { %v544_v43 = vpop.xlane.xlu0 %543 }
 0x1b1   :  { %v547_v44 = vmul.f32 0.00390625, %v544_v43  ;;  %v552_v45 = vmul.f32 %v548_v41, %v548_v41  ;;  %v553_v46 = vmul.f32 %v549_v42, %v549_v42 }
 0x1b3   :  { %v550_v47 = vsub.f32 %v537_v35, %v547_v44  ;;  %v551_v48 = vsub.f32 %v538_v36, %v547_v44  ;;  %v556_v49 = vadd.f32 %v553_v46, %v552_v45 }
 0x1b5   :  { %557 = vadd.xlane.f32.xlu1 %v556_v49  ;;  %v554_v50 = vmul.f32 %v550_v47, %v550_v47  ;;  %v555_v51 = vmul.f32 %v551_v48, %v551_v48 }
 0x1b7   :  { %v559_v52 = vadd.f32 %v555_v51, %v554_v50 }
 0x1b9   :  { %560 = vadd.xlane.f32.xlu1 %v559_v52 }
 0x242   :  { %v558_v53 = vpop.xlane.xlu1 %557 }
 0x243   :  { %v562_v54 = vmul.f32 0.00390625, %v558_v53 }
 0x245   :  { %v564_v55 = vadd.f32 1e-05, %v562_v54 }
 0x246   :  { %v561_v56 = vpop.xlane.xlu1 %560 }
 0x247   :  { %804 = vrsqrt.f32 %v564_v55  ;;  %v563_v57 = vmul.f32 0.00390625, %v561_v56 }
 0x249   :  { %v565_v58 = vadd.f32 1e-05, %v563_v57 }
 0x24b   :  { %806 = vrsqrt.f32 %v565_v58 }
 0x251   :  { %v805_v63 = vpop.eup %804 }
 0x252   :  { %v568_v2 = vmul.f32 %v805_v63, %v548_v41  ;;  %v569_v3 = vmul.f32 %v805_v63, %v549_v42 }
 0x254   :  { %v584_v4 = vmul.f32 %v577_v61, %v568_v2  ;;  %v585_v5 = vmul.f32 %v581_v62, %v569_v3 }
 0x255   :  { %v807_v7 = vpop.eup %806 }
 0x256   :  { %v600_v9 = vadd.f32 %v593_v0, %v584_v4  ;;  %v601_v10 = vadd.f32 %v597_v1, %v585_v5  ;;  %v570_v11 = vmul.f32 %v807_v7, %v550_v47  ;;  %v571_v12 = vmul.f32 %v807_v7, %v551_v48 }
 0x258   :  { %v692_v13 = vpack.c.bf16 %v601_v10, %v600_v9  ;;  %v586_v14 = vmul.f32 %v577_v61, %v570_v11  ;;  %v587_v15 = vmul.f32 %v581_v62, %v571_v12 }
 0x25a   :  { %616 = vst [vmem:[%s1084_s6] sm:$0xff] %v692_v13  ;;  %v602_v16 = vadd.f32 %v593_v0, %v586_v14  ;;  %v603_v6 = vadd.f32 %v597_v1, %v587_v15 }
 0x25c   :  { %v693_v17 = vpack.c.bf16 %v603_v6, %v602_v16 }
 0x25e   :  { %617 = vst [vmem:[%s1084_s6 + $0x8] sm:$0xff] %v693_v17 }

// kernel: bart_forward.44
= control target key start
LH: loop header
LB: loop body
LE: loop exit
PB: predicated region body
PF: predicated region fallthrough
CT: control target
= control target key end

     0   :  { %s830_s12 = smov 0   ;;  %s832_s13 = smov 0   ;;  %s902_s0 = inlined_call_operand.vmem [shape: bf16[2,8,768], index: 0, kind: input, shape index: {}, may-alias: {0,1,2}]   ;;  %s903_s1 = inlined_call_operand.vmem [shape: bf16[2,8,768], index: 1, kind: input, shape index: {}, may-alias: {0,1,2}]   ;;  %s904_s2 = inlined_call_operand.vmem [shape: bf16[2,8,768], index: 2, kind: input, shape index: {}, may-alias: {0,1,2}]   ;;  %s905_s3 = inlined_call_operand.vmem [shape: bf16[2,8,256], index: 3, kind: output, shape index: {}]  }
   0x1   :  { %s834_s14 = smov 0  }
   0x2 LB: > { %s32_s15 = sadd.s32 1, %s802_s13  ;;  %p700_p0 = scmp.ge.s32.totalorder %s806_s14, 1  ;;  %s806_s14 = sphi %s834_s14, %s13_s14   ;;  %s802_s13 = sphi %s832_s13, %s907_s13   ;;  %s798_s12 = sphi %s830_s12, %s906_s12  }
   0x3   : > { %p34_p1 = scmp.ge.s32.totalorder %s32_s15, 2  ;;  %p215_p2 = scmp.lt.s32.totalorder %s806_s14, 3 }
   0x5   : > { %s909_s15 = smov (%p34_p1, %s32_s15), 0  ;;  %p216_p3 = pnand %p700_p0, %p215_p2 }
   0x6   : > { %p276_p4 = scmp.lt.s32.totalorder (!%p216_p3), %s798_s12, 1  ;;  %v808_v0 = vmov (!%p216_p3), 0.0   ;;  %vm809_vm0 = vmmov (!%p216_p3), 0   ;;  %v329_v3 = vlaneseq (!%p216_p3)  ;;  %vm381_vm2 = vcmask (!%p216_p3), 64512  }
   0x7   : > { %219 = sbr.rel (%p216_p3) target bundleno = 1312 (0x520), region = 32  ;;  %723 = vmatprep.subr.bf16.mxu0 (!%p216_p3), %v808_v0  ;;  %725 = vmatprep.mubr.msk.bf16.mxu0 (!%p216_p3), %vm809_vm0, %v808_v0  ;;  %vm397_vm3 = vcmask (!%p216_p3), 1043456  }
   0x8   : > { %729 = vmatprep.subr.bf16.mxu1 (!%p216_p3), %v808_v0  ;;  %731 = vmatprep.mubr.msk.bf16.mxu1 (!%p216_p3), %vm809_vm0, %v808_v0  ;;  %v330_v4 = vshrl.u32 (!%p216_p3), %v329_v3, 7  ;;  %v334_v5 = vand.u32 (!%p216_p3), 127, %v329_v3 }
   0xa   : > { %vm335_vm1 = vcmp.le.s32.totalorder (!%p216_p3), %v334_v5, %v330_v4 }
   0xe   : > { %s911_s12 = smov (!%p276_p4, %s798_s12), 1 }
   0xf   : > { %s853_s16 = smul.u32 24, %s911_s12  ;;  %s714_s28 = sshll.u32 %s911_s12, 3 }
  0x10   : > { %s885_s4 = scalar_lea.vmem %s905_s3, %s714_s28 }
  0x11   : > { %s711_s17 = sadd.s32 8, %s853_s16  ;;  %s866_s23 = scalar_lea.vmem %s902_s0, %s853_s16 }
  0x12   : > { %s859_s20 = scalar_lea.vmem %s903_s1, %s711_s17  ;;  %v336_v2 = vld [vmem:[%s866_s23] sm:$0xf]  ;;  %s713_s24 = sadd.s32 16, %s853_s16  ;;  %v443_v27 = vld [vmem:[%s866_s23 + $0x4] sm:$0xf] }
  0x13   : > { %v337_v1 = vld [vmem:[%s859_s20] sm:$0xf]  ;;  %s310_s27 = scalar_lea.vmem %s904_s2, %s713_s24  ;;  %v444_v25 = vld [vmem:[%s859_s20 + $0x4] sm:$0xf] }
  0x14   : > { %724 = vmatpush3.bf16.xpose.msra.mxu0 %v337_v1  ;;  %v338_v18 = vld [vmem:[%s310_s27] sm:$0xf]  ;;  %v445_v19 = vld [vmem:[%s310_s27 + $0x4] sm:$0xf] }
  0x15   : > { %741 = vmatprep.subr.bf16.mxu0 %v808_v0  ;;  %v399_v20 = vsel %vm397_vm3, %v338_v18, 0  ;;  %v504_v21 = vsel %vm397_vm3, %v445_v19, 0 }
  0x16   : > { %730 = vmatpush3.bf16.msra.mxu1 %v399_v20 }
  0x17   : > { %735 = vmatprep.subr.bf16.mxu1 %v808_v0 }
  0x1b   : > { %726 = vmatmul.mubr.bf16.vlgmr.msra.gmra.mrb[0].mxu0 %v336_v2 }
  0x1c   : > { %743 = vmatprep.mubr.msk.bf16.mxu0 %vm809_vm0, %v808_v0  ;;  %742 = vmatpush3.bf16.msra.mxu0 %v504_v21 }
  0xee   : > { %v373_v6 = vpop.f32.mrb[0].mxu0 }
  0xef   : > { %v379_v7 = vmul.f32 0.088388346, %v373_v6  ;;  %v727_v8 = vpop.f32.mrb[1].mxu0 }
  0xf0   : > { %v376_v9 = vpop.f32.mrb[2].mxu0 }
  0xf1   : > { %v728_v10 = vpop.f32.mrb[3].mxu0  ;;  %v380_v11 = vsel %vm335_vm1, %v379_v7, -1e+09 }
  0xf2   : > { %v382_v12 = vsel %vm381_vm2, %v380_v11, -inf }
  0xf3   : > { %383 = vmax.xlane.f32.xlu0 %v382_v12 }
 0x180   : > { %v384_v13 = vpop.xlane.xlu0 %383 }
 0x181   : > { %v385_v14 = vsub.f32 %v380_v11, %v384_v13 }
 0x183   : > { %v386_v15 = vmul.f32 1.442695, %v385_v14 }
 0x185   : > { %776 = vpow2.f32 %v386_v15 }
 0x18f   : > { %v777_v16 = vpop.eup %776 }
 0x190   : > { %v388_v17 = vsel %vm381_vm2, %v777_v16, 0.0 }
 0x191   : > { %389 = vadd.xlane.f32.xlu0 %v388_v17 }
 0x21e   : > { %v390_v22 = vpop.xlane.xlu0 %389 }
 0x21f   : > { %778 = vrcp.f32 %v390_v22 }
 0x229   : > { %v779_v23 = vpop.eup %778 }
 0x22a   : > { %v392_v24 = vmul.f32 %v779_v23, %v777_v16 }
 0x22c   : > { %v393_v26 = vpack.c.bf16 %v392_v24, %v392_v24 }
 0x22e   : > { %732 = vmatmul.mubr.msk.bf16.vlgmr.msra.gmra.mrb[0].mxu1 %vm381_vm2, %v393_v26 }
 0x22f   : > { %736 = vmatpush3.bf16.xpose.msra.mxu1 %v444_v25  ;;  %737 = vmatprep.mubr.msk.bf16.mxu1 %vm809_vm0, %v808_v0 }
 0x236   : > { %738 = vmatmul.mubr.bf16.vlgmr.msra.gmra.mrb[4].mxu1 %v443_v27 }
 0x301   : > { %v435_v28 = vpop.f32.mrb[0].mxu1 }
 0x302   : > { %v441_v29 = vpack.c.bf16 %v435_v28, %v435_v28  ;;  %v733_v30 = vpop.f32.mrb[1].mxu1 }
 0x303   : > { %v438_v31 = vpop.f32.mrb[2].mxu1 }
 0x304   : > { %442 = vst [vmem:[%s885_s4] sm:$0xf] %v441_v29  ;;  %v734_v32 = vpop.f32.mrb[3].mxu1 }
 0x309   : > { %v480_v33 = vpop.f32.mrb[4].mxu1 }
 0x30a   : > { %v486_v34 = vmul.f32 0.088388346, %v480_v33  ;;  %v739_v35 = vpop.f32.mrb[5].mxu1 }
 0x30b   : > { %v483_v36 = vpop.f32.mrb[6].mxu1 }
 0x30c   : > { %v740_v37 = vpop.f32.mrb[7].mxu1  ;;  %v487_v38 = vsel %vm335_vm1, %v486_v34, -1e+09 }
 0x30d   : > { %v488_v39 = vsel %vm381_vm2, %v487_v38, -inf }
 0x30e   : > { %489 = vmax.xlane.f32.xlu1 %v488_v39 }
 0x39b   : > { %v490_v40 = vpop.xlane.xlu1 %489 }
 0x39c   : > { %v491_v41 = vsub.f32 %v487_v38, %v490_v40 }
 0x39e   : > { %v492_v42 = vmul.f32 1.442695, %v491_v41 }
 0x3a0   : > { %780 = vpow2.f32 %v492_v42 }
 0x3aa   : > { %v781_v43 = vpop.eup %780 }
 0x3ab   : > { %v494_v44 = vsel %vm381_vm2, %v781_v43, 0.0 }
 0x3ac   : > { %495 = vadd.xlane.f32.xlu1 %v494_v44 }
 0x439   : > { %v496_v45 = vpop.xlane.xlu1 %495 }
 0x43a   : > { %782 = vrcp.f32 %v496_v45 }
 0x444   : > { %v783_v46 = vpop.eup %782 }
 0x445   : > { %v498_v47 = vmul.f32 %v783_v46, %v781_v43 }
 0x447   : > { %v499_v48 = vpack.c.bf16 %v498_v47, %v498_v47 }
 0x449   : > { %744 = vmatmul.mubr.msk.bf16.vlgmr.msra.gmra.mrb[4].mxu0 %vm381_vm2, %v499_v48 }
 0x51c   : > { %v540_v49 = vpop.f32.mrb[4].mxu0 }
 0x51d   : > { %v546_v50 = vpack.c.bf16 %v540_v49, %v540_v49  ;;  %v745_v51 = vpop.f32.mrb[5].mxu0 }
 0x51e   : > { %v543_v52 = vpop.f32.mrb[6].mxu0 }
 0x51f   : > { %547 = vst [vmem:[%s885_s4 + $0x4] sm:$0xf] %v546_v50  ;;  %v746_v53 = vpop.f32.mrb[7].mxu0 }
 0x520 PF: > { %s13_s14 = sadd.s32 1, %s806_s14   ;;  %s906_s12 = smov %s802_s13 }
 0x521   : > { %p10_p5 = scmp.ge.s32.totalorder %s13_s14, 4   ;;  %s907_s13 = smov %s909_s15 }
 0x523   :  { %12 = sbr.rel (!%p10_p5) target bundleno = 2 (0x2), region = 68 }

// kernel: bart_forward.46
= control target key start
LH: loop header
LB: loop body
LE: loop exit
PB: predicated region body
PF: predicated region fallthrough
CT: control target
= control target key end

     0   :  { %v50_v34 = vlaneseq  ;;  %s511_s1 = inlined_call_operand.vmem [shape: bf16[256,256], index: 1, kind: input, shape index: {}]   ;;  %s512_s0 = inlined_call_operand.vmem [shape: bf16[16,256], index: 0, kind: input, shape index: {}]   ;;  %s513_s2 = inlined_call_operand.vmem [shape: f32[1,256], index: 2, kind: input, shape index: {}]   ;;  %s514_s3 = inlined_call_operand.vmem [shape: bf16[16,256], index: 3, kind: output, shape index: {}]  }
   0x1   :  { %v329_v0 = vld [vmem:[%s511_s1 + $0x4] ss:$8 sps:$4 sm:$0xff]   ;;  %v331_v1 = vld [vmem:[%s511_s1] ss:$8 sps:$4 sm:$0xff]   ;;  %v332_v2 = vld [vmem:[%s511_s1 + $0x14] ss:$8 sps:$4 sm:$0xff]  }
   0x2   :  { %230 = vmatprep.subr.bf16.mxu0 %v329_v0  ;;  %v334_v3 = vld [vmem:[%s511_s1 + $0x10] ss:$8 sps:$4 sm:$0xff]   ;;  %v335_v4 = vld [vmem:[%s511_s1 + $0x24] ss:$8 sps:$4 sm:$0xff]   ;;  %v337_v5 = vld [vmem:[%s511_s1 + $0x20] ss:$8 sps:$4 sm:$0xff]  }
   0x3   :  { %231 = vmatpush1.bf16.msra.mxu0 %v331_v1  ;;  %v338_v6 = vld [vmem:[%s511_s1 + $0x34] ss:$8 sps:$4 sm:$0xff]   ;;  %v340_v7 = vld [vmem:[%s511_s1 + $0x30] ss:$8 sps:$4 sm:$0xff]   ;;  %v341_v8 = vld [vmem:[%s511_s1 + $0x44] ss:$8 sps:$4 sm:$0xff]  }
   0x4   :  { %232 = vmatprep.subr.bf16.mxu0 %v332_v2  ;;  %v343_v9 = vld [vmem:[%s511_s1 + $0x40] ss:$8 sps:$4 sm:$0xff]   ;;  %v344_v10 = vld [vmem:[%s511_s1 + $0x54] ss:$8 sps:$4 sm:$0xff]   ;;  %v346_v11 = vld [vmem:[%s511_s1 + $0x50] ss:$8 sps:$4 sm:$0xff]  }
   0x5   :  { %v347_v12 = vld [vmem:[%s511_s1 + $0x64] ss:$8 sps:$4 sm:$0xff]   ;;  %v349_v14 = vld [vmem:[%s511_s1 + $0x60] ss:$8 sps:$4 sm:$0xff]   ;;  %v350_v15 = vld [vmem:[%s511_s1 + $0x74] ss:$8 sps:$4 sm:$0xff]  }
   0x6   :  { %v379_v13 = vld [vmem:[%s512_s0 + $0x4] ss:$8 sps:$4 sm:$0xff]   ;;  %v352_v16 = vld [vmem:[%s511_s1 + $0x70] ss:$8 sps:$4 sm:$0xff]   ;;  %v355_v18 = vld [vmem:[%s511_s1 + $0x80] ss:$8 sps:$4 sm:$0xff]  }
   0x7   :  { %233 = vmatpush1.bf16.msra.mxu0 %v334_v3  ;;  %262 = vmatprep.mubr.bf16.mxu0 %v379_v13  ;;  %v353_v17 = vld [vmem:[%s511_s1 + $0x84] ss:$8 sps:$4 sm:$0xff]   ;;  %v356_v19 = vld [vmem:[%s511_s1 + $0x94] ss:$8 sps:$4 sm:$0xff]   ;;  %v358_v20 = vld [vmem:[%s511_s1 + $0x90] ss:$8 sps:$4 sm:$0xff]  }
   0x8   :  { %234 = vmatprep.subr.bf16.mxu0 %v335_v4  ;;  %v359_v21 = vld [vmem:[%s511_s1 + $0xa4] ss:$8 sps:$4 sm:$0xff]   ;;  %v361_v22 = vld [vmem:[%s511_s1 + $0xa0] ss:$8 sps:$4 sm:$0xff]   ;;  %v362_v23 = vld [vmem:[%s511_s1 + $0xb4] ss:$8 sps:$4 sm:$0xff]  }
   0x9   :  { %v364_v24 = vld [vmem:[%s511_s1 + $0xb0] ss:$8 sps:$4 sm:$0xff]   ;;  %v365_v25 = vld [vmem:[%s511_s1 + $0xc4] ss:$8 sps:$4 sm:$0xff]   ;;  %v367_v26 = vld [vmem:[%s511_s1 + $0xc0] ss:$8 sps:$4 sm:$0xff]  }
   0xa   :  { %v368_v27 = vld [vmem:[%s511_s1 + $0xd4] ss:$8 sps:$4 sm:$0xff]   ;;  %v370_v28 = vld [vmem:[%s511_s1 + $0xd0] ss:$8 sps:$4 sm:$0xff]   ;;  %v371_v29 = vld [vmem:[%s511_s1 + $0xe4] ss:$8 sps:$4 sm:$0xff]  }
   0xb   :  { %235 = vmatpush1.bf16.msra.mxu0 %v337_v5  ;;  %v373_v30 = vld [vmem:[%s511_s1 + $0xe0] ss:$8 sps:$4 sm:$0xff]   ;;  %v374_v31 = vld [vmem:[%s511_s1 + $0xf4] ss:$8 sps:$4 sm:$0xff]   ;;  %v376_v32 = vld [vmem:[%s511_s1 + $0xf0] ss:$8 sps:$4 sm:$0xff]  }
   0xc   :  { %236 = vmatprep.subr.bf16.mxu0 %v338_v6  ;;  %v377_v33 = vld [vmem:[%s512_s0] ss:$8 sps:$4 sm:$0xff]   ;;  %v51_v35 = vshrl.u32 %v50_v34, 7 }
   0xd   :  { %v48_v37 = vld [vmem:[%s513_s2] sm:$0x3] }
   0xe   :  { %v52_v36 = vsub.s32 0, %v51_v35  ;;  %v56_v38 = vsub.s32 1, %v51_v35 }
   0xf   :  { %237 = vmatpush1.bf16.msra.mxu0 %v340_v7 }
  0x10   :  { %238 = vmatprep.subr.bf16.mxu0 %v341_v8  ;;  %v53_v39 = vrot.slane %v48_v37, %v52_v36  ;;  %v57_v40 = vrot.slane %v48_v37, %v56_v38 }
  0x13   :  { %239 = vmatpush1.bf16.msra.mxu0 %v343_v9 }
  0x14   :  { %240 = vmatprep.subr.bf16.mxu0 %v344_v10 }
  0x17   :  { %241 = vmatpush1.bf16.msra.mxu0 %v346_v11 }
  0x18   :  { %242 = vmatprep.subr.bf16.mxu0 %v347_v12 }
  0x1b   :  { %243 = vmatpush1.bf16.msra.mxu0 %v349_v14 }
  0x1c   :  { %244 = vmatprep.subr.bf16.mxu0 %v350_v15 }
  0x1f   :  { %245 = vmatpush1.bf16.msra.mxu0 %v352_v16 }
  0x20   :  { %246 = vmatprep.subr.bf16.mxu0 %v353_v17 }
  0x23   :  { %247 = vmatpush1.bf16.msra.mxu0 %v355_v18 }
  0x24   :  { %248 = vmatprep.subr.bf16.mxu0 %v356_v19 }
  0x27   :  { %249 = vmatpush1.bf16.msra.mxu0 %v358_v20 }
  0x28   :  { %250 = vmatprep.subr.bf16.mxu0 %v359_v21 }
  0x2b   :  { %251 = vmatpush1.bf16.msra.mxu0 %v361_v22 }
  0x2c   :  { %252 = vmatprep.subr.bf16.mxu0 %v362_v23 }
  0x2f   :  { %253 = vmatpush1.bf16.msra.mxu0 %v364_v24 }
  0x30   :  { %254 = vmatprep.subr.bf16.mxu0 %v365_v25 }
  0x33   :  { %255 = vmatpush1.bf16.msra.mxu0 %v367_v26 }
  0x34   :  { %256 = vmatprep.subr.bf16.mxu0 %v368_v27 }
  0x37   :  { %257 = vmatpush1.bf16.msra.mxu0 %v370_v28 }
  0x38   :  { %258 = vmatprep.subr.bf16.mxu0 %v371_v29 }
  0x3b   :  { %259 = vmatpush1.bf16.msra.mxu0 %v373_v30 }
  0x3c   :  { %260 = vmatprep.subr.bf16.mxu0 %v374_v31 }
  0x3f   :  { %261 = vmatpush1.bf16.msra.mxu0 %v376_v32 }
  0x42   :  { %263 = vmatmul.mubr.bf16.vlgmr.msra.gmra.mrb[0].mxu0 %v377_v33 }
 0x115   :  { %v264_v41 = vpop.f32.mrb[0].mxu0 }
 0x116   :  { %v265_v42 = vadd.f32 %v264_v41, %v53_v39  ;;  %v266_v43 = vpop.f32.mrb[1].mxu0 }
 0x117   :  { %v267_v44 = vadd.f32 %v266_v43, %v57_v40  ;;  %v268_v45 = vpop.f32.mrb[2].mxu0 }
 0x118   :  { %v269_v46 = vadd.f32 %v268_v45, %v53_v39  ;;  %v270_v47 = vpop.f32.mrb[3].mxu0 }
 0x119   :  { %v327_v48 = vpack.c.bf16 %v267_v44, %v265_v42  ;;  %v271_v49 = vadd.f32 %v270_v47, %v57_v40 }
 0x11b   :  { %285 = vst [vmem:[%s514_s3] sm:$0xff] %v327_v48  ;;  %v328_v50 = vpack.c.bf16 %v271_v49, %v269_v46 }
 0x11d   :  { %286 = vst [vmem:[%s514_s3 + $0x8] sm:$0xff] %v328_v50 }

// kernel: bart_forward.47
= control target key start
LH: loop header
LB: loop body
LE: loop exit
PB: predicated region body
PF: predicated region fallthrough
CT: control target
= control target key end

     0   :  { %s1007_s12 = smov 0   ;;  %s1009_s13 = smov 0   ;;  %s1195_s0 = inlined_call_operand.vmem [shape: bf16[16,256], index: 0, kind: input, shape index: {}]   ;;  %s1196_s1 = inlined_call_operand.vmem [shape: bf16[256,512], index: 1, kind: input, shape index: {}]   ;;  %s1197_s2 = inlined_call_operand.vmem [shape: f32[1,512], index: 2, kind: input, shape index: {}]   ;;  %s1198_s3 = inlined_call_operand.vmem [shape: bf16[16,512], index: 3, kind: output, shape index: {}]  }
   0x1   :  { %s1011_s14 = smov 0   ;;  %s1013_s15 = smov 0  }
   0x2   :  { %s1015_s16 = smov 0  }
   0x3 LB: > { %s22_s17 = sadd.s32 1, %s981_s15  ;;  %s799_s18 = sadd.s32 4294967295, %s985_s16   ;;  %s985_s16 = sphi %s1015_s16, %s13_s16   ;;  %s981_s15 = sphi %s1013_s15, %s1203_s15   ;;  %s977_s14 = sphi %s1011_s14, %s1202_s14   ;;  %s973_s13 = sphi %s1009_s13, %s1201_s13   ;;  %s969_s12 = sphi %s1007_s12, %s1200_s12  }
   0x4   : > { %p23_p0 = scmp.ge.s32.totalorder %s22_s17, 2  ;;  %p65_p1 = scmp.ne.s32.totalorder %s973_s13, %s969_s12 }
   0x5   : > { %p66_p2 = scmp.eq.s32.totalorder %s985_s16, 0  ;;  %p123_p4 = scmp.eq.s32.totalorder %s799_s18, 1 }
   0x6   : > { %s1205_s17 = smov (%p23_p0, %s22_s17), 0  ;;  %s58_s20 = sadd.s32 1, %s973_s13 }
   0x7   : > { %p67_p3 = por %p66_p2, %p65_p1  ;;  %s55_s19 = ssub.s32 %s981_s15, %s1205_s17 }
   0x8   : > { %p56_p5 = scmp.eq.s32.totalorder %s55_s19, 0  ;;  %p1042_p6 = por %p123_p4, %p65_p1 }
   0x9   : > { %p803_p7 = scmp.ge.s32.totalorder %s985_s16, 2 }
   0xa   : > { %s1047_s22 = scalar_select %p56_p5, %s973_s13, %s58_s20  }
   0xb   : > { %155 = sbr.rel (%p803_p7) target bundleno = 38 (0x26), region = 20 }
  0x12   : > { %158 = sbr.rel (!%p67_p3) target bundleno = 38 (0x26), region = 24  ;;  %s160_s23 = sand.u32 (%p67_p3), 1, %s973_s13  }
  0x13   : > { %s852_s24 = sshll.u32 (%p67_p3), %s981_s15, 3  ;;  %s804_s25 = sshll.u32 (%p67_p3), %s160_s23, 8 }
  0x14   : > { %s1055_s28 = scalar_lea.vmem (%p67_p3), %s1196_s1, %s852_s24  ;;  %s1060_s29 = scalar_lea.vmem (%p67_p3), [#allocation2], %s804_s25 }
  0x15   : > { %v255_v0 = vld [vmem:[%s1055_s28] sm:$0xff] (%p67_p3)  ;;  %v257_v1 = vld [vmem:[%s1055_s28 + $0x10] sm:$0xff] (%p67_p3) }
  0x16   : > { %v259_v2 = vld [vmem:[%s1055_s28 + $0x20] sm:$0xff] (%p67_p3)  ;;  %256 = vst [vmem:[%s1060_s29] sm:$0xff] (%p67_p3), %v255_v0  ;;  %258 = vst [vmem:[%s1060_s29 + $0x8] sm:$0xff] (%p67_p3), %v257_v1  ;;  %v261_v3 = vld [vmem:[%s1055_s28 + $0x30] sm:$0xff] (%p67_p3) }
  0x17   : > { %260 = vst [vmem:[%s1060_s29 + $0x10] sm:$0xff] (%p67_p3), %v259_v2  ;;  %v263_v4 = vld [vmem:[%s1055_s28 + $0x40] sm:$0xff] (%p67_p3)  ;;  %v265_v5 = vld [vmem:[%s1055_s28 + $0x50] sm:$0xff] (%p67_p3)  ;;  %262 = vst [vmem:[%s1060_s29 + $0x18] sm:$0xff] (%p67_p3), %v261_v3 }
  0x18   : > { %264 = vst [vmem:[%s1060_s29 + $0x20] sm:$0xff] (%p67_p3), %v263_v4  ;;  %266 = vst [vmem:[%s1060_s29 + $0x28] sm:$0xff] (%p67_p3), %v265_v5  ;;  %v267_v6 = vld [vmem:[%s1055_s28 + $0x60] sm:$0xff] (%p67_p3)  ;;  %v269_v7 = vld [vmem:[%s1055_s28 + $0x70] sm:$0xff] (%p67_p3) }
  0x19   : > { %v271_v8 = vld [vmem:[%s1055_s28 + $0x80] sm:$0xff]  ;;  %268 = vst [vmem:[%s1060_s29 + $0x30] sm:$0xff] %v267_v6  ;;  %270 = vst [vmem:[%s1060_s29 + $0x38] sm:$0xff] %v269_v7  ;;  %v273_v9 = vld [vmem:[%s1055_s28 + $0x90] sm:$0xff] }
  0x1a   : > { %272 = vst [vmem:[%s1060_s29 + $0x40] sm:$0xff] %v271_v8  ;;  %v275_v10 = vld [vmem:[%s1055_s28 + $0xa0] sm:$0xff]  ;;  %v277_v11 = vld [vmem:[%s1055_s28 + $0xb0] sm:$0xff]  ;;  %274 = vst [vmem:[%s1060_s29 + $0x48] sm:$0xff] %v273_v9 }
  0x1b   : > { %276 = vst [vmem:[%s1060_s29 + $0x50] sm:$0xff] %v275_v10  ;;  %278 = vst [vmem:[%s1060_s29 + $0x58] sm:$0xff] %v277_v11  ;;  %v279_v12 = vld [vmem:[%s1055_s28 + $0xc0] sm:$0xff]  ;;  %v281_v13 = vld [vmem:[%s1055_s28 + $0xd0] sm:$0xff] }
  0x1c   : > { %v283_v14 = vld [vmem:[%s1055_s28 + $0xe0] sm:$0xff]  ;;  %280 = vst [vmem:[%s1060_s29 + $0x60] sm:$0xff] %v279_v12  ;;  %282 = vst [vmem:[%s1060_s29 + $0x68] sm:$0xff] %v281_v13  ;;  %v285_v15 = vld [vmem:[%s1055_s28 + $0xf0] sm:$0xff] }
  0x1d   : > { %284 = vst [vmem:[%s1060_s29 + $0x70] sm:$0xff] %v283_v14  ;;  %v287_v16 = vld [vmem:[%s1055_s28 + $0x100] sm:$0xff]  ;;  %v289_v17 = vld [vmem:[%s1055_s28 + $0x110] sm:$0xff]  ;;  %286 = vst [vmem:[%s1060_s29 + $0x78] sm:$0xff] %v285_v15 }
  0x1e   : > { %288 = vst [vmem:[%s1060_s29 + $0x80] sm:$0xff] %v287_v16  ;;  %290 = vst [vmem:[%s1060_s29 + $0x88] sm:$0xff] %v289_v17  ;;  %v291_v18 = vld [vmem:[%s1055_s28 + $0x120] sm:$0xff]  ;;  %v293_v19 = vld [vmem:[%s1055_s28 + $0x130] sm:$0xff] }
  0x1f   : > { %v295_v20 = vld [vmem:[%s1055_s28 + $0x140] sm:$0xff]  ;;  %292 = vst [vmem:[%s1060_s29 + $0x90] sm:$0xff] %v291_v18  ;;  %294 = vst [vmem:[%s1060_s29 + $0x98] sm:$0xff] %v293_v19  ;;  %v297_v21 = vld [vmem:[%s1055_s28 + $0x150] sm:$0xff] }
  0x20   : > { %296 = vst [vmem:[%s1060_s29 + $0xa0] sm:$0xff] %v295_v20  ;;  %v299_v22 = vld [vmem:[%s1055_s28 + $0x160] sm:$0xff]  ;;  %v301_v23 = vld [vmem:[%s1055_s28 + $0x170] sm:$0xff]  ;;  %298 = vst [vmem:[%s1060_s29 + $0xa8] sm:$0xff] %v297_v21 }
  0x21   : > { %300 = vst [vmem:[%s1060_s29 + $0xb0] sm:$0xff] %v299_v22  ;;  %302 = vst [vmem:[%s1060_s29 + $0xb8] sm:$0xff] %v301_v23  ;;  %v303_v24 = vld [vmem:[%s1055_s28 + $0x180] sm:$0xff]  ;;  %v305_v25 = vld [vmem:[%s1055_s28 + $0x190] sm:$0xff] }
  0x22   : > { %v307_v26 = vld [vmem:[%s1055_s28 + $0x1a0] sm:$0xff]  ;;  %304 = vst [vmem:[%s1060_s29 + $0xc0] sm:$0xff] %v303_v24  ;;  %306 = vst [vmem:[%s1060_s29 + $0xc8] sm:$0xff] %v305_v25  ;;  %v309_v27 = vld [vmem:[%s1055_s28 + $0x1b0] sm:$0xff] }
  0x23   : > { %308 = vst [vmem:[%s1060_s29 + $0xd0] sm:$0xff] %v307_v26  ;;  %v311_v28 = vld [vmem:[%s1055_s28 + $0x1c0] sm:$0xff]  ;;  %v313_v29 = vld [vmem:[%s1055_s28 + $0x1d0] sm:$0xff]  ;;  %310 = vst [vmem:[%s1060_s29 + $0xd8] sm:$0xff] %v309_v27 }
  0x24   : > { %312 = vst [vmem:[%s1060_s29 + $0xe0] sm:$0xff] %v311_v28  ;;  %314 = vst [vmem:[%s1060_s29 + $0xe8] sm:$0xff] %v313_v29  ;;  %v315_v30 = vld [vmem:[%s1055_s28 + $0x1e0] sm:$0xff]  ;;  %v317_v31 = vld [vmem:[%s1055_s28 + $0x1f0] sm:$0xff] }
  0x25   : > { %316 = vst [vmem:[%s1060_s29 + $0xf0] sm:$0xff] %v315_v30  ;;  %318 = vst [vmem:[%s1060_s29 + $0xf8] sm:$0xff] %v317_v31 }
  0x26 PF: > { %p807_p8 = scmp.ge.s32.totalorder %s985_s16, 1  ;;  %p331_p9 = scmp.lt.s32.totalorder %s985_s16, 3 }
  0x28   : > { %p332_p10 = pnand %p807_p8, %p331_p9 }
  0x29   : > { %s338_s30 = sand.u32 (!%p332_p10), 1, %s969_s12   ;;  %v946_v32 = vld [vmem:[%s1195_s0 + $0x4] ss:$8 sps:$4 sm:$0xff] (!%p332_p10)   ;;  %v944_v1 = vld [vmem:[%s1195_s0] ss:$8 sps:$4 sm:$0xff] (!%p332_p10)   ;;  %s810_s10 = sshll.u32 (!%p332_p10), %s977_s14, 1  ;;  %v421_v2 = vlaneseq (!%p332_p10) }
  0x2a   : > { %335 = sbr.rel (%p332_p10) target bundleno = 337 (0x151), region = 66  ;;  %s808_s4 = sshll.u32 (!%p332_p10), %s338_s30, 8  ;;  %633 = vmatprep.mubr.bf16.mxu0 (!%p332_p10), %v946_v32 }
  0x2b   : > { %s1131_s7 = scalar_lea.vmem (!%p332_p10), [#allocation2], %s808_s4  ;;  %p379_p11 = scmp.lt.s32.totalorder (!%p332_p10), %s810_s10, 3  ;;  %v422_v3 = vshrl.u32 (!%p332_p10), %v421_v2, 7 }
  0x2c   : > { %v896_v33 = vld [vmem:[%s1131_s7 + $0x4] ss:$8 sps:$4 sm:$0xff] (!%p332_p10)   ;;  %v898_v34 = vld [vmem:[%s1131_s7] ss:$8 sps:$4 sm:$0xff] (!%p332_p10)   ;;  %v899_v35 = vld [vmem:[%s1131_s7 + $0x14] ss:$8 sps:$4 sm:$0xff] (!%p332_p10)  }
  0x2d   : > { %601 = vmatprep.subr.bf16.mxu0 (!%p332_p10), %v896_v33  ;;  %v901_v36 = vld [vmem:[%s1131_s7 + $0x10] ss:$8 sps:$4 sm:$0xff] (!%p332_p10)   ;;  %v902_v37 = vld [vmem:[%s1131_s7 + $0x24] ss:$8 sps:$4 sm:$0xff] (!%p332_p10)   ;;  %v904_v38 = vld [vmem:[%s1131_s7 + $0x20] ss:$8 sps:$4 sm:$0xff] (!%p332_p10)  }
  0x2e   : > { %602 = vmatpush1.bf16.msra.mxu0 (!%p332_p10), %v898_v34  ;;  %v905_v39 = vld [vmem:[%s1131_s7 + $0x34] ss:$8 sps:$4 sm:$0xff] (!%p332_p10)   ;;  %v907_v40 = vld [vmem:[%s1131_s7 + $0x30] ss:$8 sps:$4 sm:$0xff] (!%p332_p10)   ;;  %v908_v41 = vld [vmem:[%s1131_s7 + $0x44] ss:$8 sps:$4 sm:$0xff] (!%p332_p10)  }
  0x2f   : > { %603 = vmatprep.subr.bf16.mxu0 (!%p332_p10), %v899_v35  ;;  %v910_v42 = vld [vmem:[%s1131_s7 + $0x40] ss:$8 sps:$4 sm:$0xff] (!%p332_p10)   ;;  %v911_v43 = vld [vmem:[%s1131_s7 + $0x54] ss:$8 sps:$4 sm:$0xff] (!%p332_p10)   ;;  %v913_v44 = vld [vmem:[%s1131_s7 + $0x50] ss:$8 sps:$4 sm:$0xff] (!%p332_p10)  }
  0x30   : > { %v914_v45 = vld [vmem:[%s1131_s7 + $0x64] ss:$8 sps:$4 sm:$0xff] (!%p332_p10)   ;;  %v916_v46 = vld [vmem:[%s1131_s7 + $0x60] ss:$8 sps:$4 sm:$0xff] (!%p332_p10)   ;;  %v917_v47 = vld [vmem:[%s1131_s7 + $0x74] ss:$8 sps:$4 sm:$0xff] (!%p332_p10)  }
  0x31   : > { %v919_v48 = vld [vmem:[%s1131_s7 + $0x70] ss:$8 sps:$4 sm:$0xff]   ;;  %v920_v49 = vld [vmem:[%s1131_s7 + $0x84] ss:$8 sps:$4 sm:$0xff]   ;;  %v922_v50 = vld [vmem:[%s1131_s7 + $0x80] ss:$8 sps:$4 sm:$0xff]  }
  0x32   : > { %604 = vmatpush1.bf16.msra.mxu0 %v901_v36  ;;  %v923_v51 = vld [vmem:[%s1131_s7 + $0x94] ss:$8 sps:$4 sm:$0xff]   ;;  %v925_v52 = vld [vmem:[%s1131_s7 + $0x90] ss:$8 sps:$4 sm:$0xff]   ;;  %v926_v53 = vld [vmem:[%s1131_s7 + $0xa4] ss:$8 sps:$4 sm:$0xff]  }
  0x33   : > { %605 = vmatprep.subr.bf16.mxu0 %v902_v37  ;;  %v928_v54 = vld [vmem:[%s1131_s7 + $0xa0] ss:$8 sps:$4 sm:$0xff]   ;;  %v929_v55 = vld [vmem:[%s1131_s7 + $0xb4] ss:$8 sps:$4 sm:$0xff]   ;;  %v931_v56 = vld [vmem:[%s1131_s7 + $0xb0] ss:$8 sps:$4 sm:$0xff]  }
  0x34   : > { %v932_v57 = vld [vmem:[%s1131_s7 + $0xc4] ss:$8 sps:$4 sm:$0xff]   ;;  %v934_v58 = vld [vmem:[%s1131_s7 + $0xc0] ss:$8 sps:$4 sm:$0xff]   ;;  %v935_v59 = vld [vmem:[%s1131_s7 + $0xd4] ss:$8 sps:$4 sm:$0xff]  }
  0x35   : > { %v937_v60 = vld [vmem:[%s1131_s7 + $0xd0] ss:$8 sps:$4 sm:$0xff]   ;;  %v938_v61 = vld [vmem:[%s1131_s7 + $0xe4] ss:$8 sps:$4 sm:$0xff]   ;;  %v940_v62 = vld [vmem:[%s1131_s7 + $0xe0] ss:$8 sps:$4 sm:$0xff]  }
  0x36   : > { %606 = vmatpush1.bf16.msra.mxu0 %v904_v38  ;;  %v941_v63 = vld [vmem:[%s1131_s7 + $0xf4] ss:$8 sps:$4 sm:$0xff]   ;;  %v943_v0 = vld [vmem:[%s1131_s7 + $0xf0] ss:$8 sps:$4 sm:$0xff]   ;;  %s1207_s10 = smov (!%p379_p11, %s810_s10), 3  ;;  %v423_v4 = vsub.s32 0, %v422_v3 }
  0x37   : > { %607 = vmatprep.subr.bf16.mxu0 %v905_v39  ;;  %s381_s19 = scalar_lea.vmem %s1197_s2, %s1207_s10  ;;  %v427_v6 = vsub.s32 1, %v422_v3  ;;  %s809_s20 = sshll.u32 %s338_s30, 4 }
  0x38   : > { %v419_v5 = vld [vmem:[%s381_s19] sm:$0x3]  ;;  %s369_s23 = scalar_lea.vmem [#allocation3], %s809_s20  ;;  %s855_s24 = sshll.u32 (%p1042_p6), %s977_s14, 3 }
  0x39   : > { %v424_v7 = vrot.slane %v419_v5, %v423_v4  ;;  %v428_v8 = vrot.slane %v419_v5, %v427_v6  ;;  %s670_s26 = scalar_lea.vmem (%p1042_p6), %s1198_s3, %s855_s24 }
  0x3a   : > { %608 = vmatpush1.bf16.msra.mxu0 %v907_v40 }
  0x3b   : > { %609 = vmatprep.subr.bf16.mxu0 %v908_v41 }
  0x3e   : > { %610 = vmatpush1.bf16.msra.mxu0 %v910_v42 }
  0x3f   : > { %611 = vmatprep.subr.bf16.mxu0 %v911_v43 }
  0x42   : > { %612 = vmatpush1.bf16.msra.mxu0 %v913_v44 }
  0x43   : > { %613 = vmatprep.subr.bf16.mxu0 %v914_v45 }
  0x46   : > { %614 = vmatpush1.bf16.msra.mxu0 %v916_v46 }
  0x47   : > { %615 = vmatprep.subr.bf16.mxu0 %v917_v47 }
  0x4a   : > { %616 = vmatpush1.bf16.msra.mxu0 %v919_v48 }
  0x4b   : > { %617 = vmatprep.subr.bf16.mxu0 %v920_v49 }
  0x4e   : > { %618 = vmatpush1.bf16.msra.mxu0 %v922_v50 }
  0x4f   : > { %619 = vmatprep.subr.bf16.mxu0 %v923_v51 }
  0x52   : > { %620 = vmatpush1.bf16.msra.mxu0 %v925_v52 }
  0x53   : > { %621 = vmatprep.subr.bf16.mxu0 %v926_v53 }
  0x56   : > { %622 = vmatpush1.bf16.msra.mxu0 %v928_v54 }
  0x57   : > { %623 = vmatprep.subr.bf16.mxu0 %v929_v55 }
  0x5a   : > { %624 = vmatpush1.bf16.msra.mxu0 %v931_v56 }
  0x5b   : > { %625 = vmatprep.subr.bf16.mxu0 %v932_v57 }
  0x5e   : > { %626 = vmatpush1.bf16.msra.mxu0 %v934_v58 }
  0x5f   : > { %627 = vmatprep.subr.bf16.mxu0 %v935_v59 }
  0x62   : > { %628 = vmatpush1.bf16.msra.mxu0 %v937_v60 }
  0x63   : > { %629 = vmatprep.subr.bf16.mxu0 %v938_v61 }
  0x66   : > { %630 = vmatpush1.bf16.msra.mxu0 %v940_v62 }
  0x67   : > { %631 = vmatprep.subr.bf16.mxu0 %v941_v63 }
  0x6a   : > { %632 = vmatpush1.bf16.msra.mxu0 %v943_v0 }
  0x6d   : > { %634 = vmatmul.mubr.bf16.vlgmr.msra.gmra.mrb[0].mxu0 %v944_v1 }
 0x140   : > { %v635_v9 = vpop.f32.mrb[0].mxu0 }
 0x141   : > { %v636_v10 = vadd.f32 %v635_v9, %v424_v7  ;;  %v637_v11 = vpop.f32.mrb[1].mxu0 }
 0x142   : > { %v638_v12 = vadd.f32 %v637_v11, %v428_v8  ;;  %v639_v13 = vpop.f32.mrb[2].mxu0  ;;  %664 = sbr.rel (!%p1042_p6) target bundleno = 337 (0x151), region = 74 }
 0x143   : > { %v640_v14 = vadd.f32 %v639_v13, %v424_v7  ;;  %v641_v15 = vpop.f32.mrb[3].mxu0 }
 0x144   : > { %v853_v16 = vpack.c.bf16 %v638_v12, %v636_v10  ;;  %v642_v17 = vadd.f32 %v641_v15, %v428_v8 }
 0x146   : > { %656 = vst [vmem:[%s369_s23] sm:$0xff] %v853_v16  ;;  %v854_v18 = vpack.c.bf16 %v642_v17, %v640_v14 }
 0x148   : > { %657 = vst [vmem:[%s369_s23 + $0x8] sm:$0xff] %v854_v18 }
 0x14d   : > { %v700_v19 = vld [vmem:[%s369_s23] sm:$0xff] }
 0x14e   : > { %701 = vst [vmem:[%s670_s26] sm:$0xff] %v700_v19 }
 0x14f   : > { %v702_v20 = vld [vmem:[%s369_s23 + $0x8] sm:$0xff] }
 0x150   : > { %703 = vst [vmem:[%s670_s26 + $0x10] sm:$0xff] %v702_v20 }
 0x151 PF: > { %s13_s16 = sadd.s32 1, %s985_s16   ;;  %s1200_s12 = smov %s973_s13 }
 0x152   : > { %p10_p12 = scmp.ge.s32.totalorder %s13_s16, 4   ;;  %s1201_s13 = smov %s1047_s22 }
 0x153   : > { %s1202_s14 = smov %s981_s15  ;;  %s1203_s15 = smov %s1205_s17 }
 0x154   :  { %12 = sbr.rel (!%p10_p12) target bundleno = 3 (0x3), region = 149 }

// kernel: bart_forward.48
= control target key start
LH: loop header
LB: loop body
LE: loop exit
PB: predicated region body
PF: predicated region fallthrough
CT: control target
= control target key end

     0   :  { %s879_s15 = smov 0   ;;  %s881_s16 = smov 0   ;;  %s952_s0 = inlined_call_operand.vmem [shape: bf16[2,8,256], index: 0, kind: input, shape index: {}]   ;;  %s953_s1 = inlined_call_operand.vmem [shape: bf16[2,8,512], index: 1, kind: input, shape index: {}, may-alias: {1,2}]   ;;  %s954_s2 = inlined_call_operand.vmem [shape: bf16[2,8,512], index: 2, kind: input, shape index: {}, may-alias: {1,2}]   ;;  %s955_s3 = inlined_call_operand.vmem [shape: f32[2,1,8], index: 3, kind: input, shape index: {}]   ;;  %s956_s4 = inlined_call_operand.vmem [shape: bf16[2,8,256], index: 4, kind: output, shape index: {}]  }
   0x1   :  { %s883_s17 = smov 0  }
   0x2 LB: > { %s33_s18 = sadd.s32 1, %s846_s16  ;;  %p742_p0 = scmp.ge.s32.totalorder %s850_s17, 1  ;;  %s850_s17 = sphi %s883_s17, %s14_s17   ;;  %s846_s16 = sphi %s881_s16, %s958_s16   ;;  %s842_s15 = sphi %s879_s15, %s957_s15  }
   0x3   : > { %p35_p1 = scmp.ge.s32.totalorder %s33_s18, 2  ;;  %p244_p2 = scmp.lt.s32.totalorder %s850_s17, 3 }
   0x5   : > { %s960_s18 = smov (%p35_p1, %s33_s18), 0  ;;  %p245_p3 = pnand %p742_p0, %p244_p2 }
   0x6   : > { %p309_p4 = scmp.lt.s32.totalorder (!%p245_p3), %s842_s15, 1  ;;  %v852_v0 = vmov (!%p245_p3), 0.0   ;;  %vm853_vm0 = vmmov (!%p245_p3), 0   ;;  %vm414_vm1 = vcmask (!%p245_p3), 64512   ;;  %vm430_vm2 = vcmask (!%p245_p3), 1043456  }
   0x7   : > { %248 = sbr.rel (%p245_p3) target bundleno = 1312 (0x520), region = 36  ;;  %770 = vmatprep.subr.bf16.mxu0 (!%p245_p3), %v852_v0  ;;  %772 = vmatprep.mubr.msk.bf16.mxu0 (!%p245_p3), %vm853_vm0, %v852_v0 }
   0x8   : > { %776 = vmatprep.subr.bf16.mxu1 (!%p245_p3), %v852_v0  ;;  %778 = vmatprep.mubr.msk.bf16.mxu1 (!%p245_p3), %vm853_vm0, %v852_v0 }
   0xe   : > { %s962_s15 = smov (!%p309_p4, %s842_s15), 1 }
   0xf   : > { %s757_s19 = sshll.u32 %s962_s15, 4  ;;  %s756_s23 = sshll.u32 %s962_s15, 3 }
  0x10   : > { %s905_s22 = scalar_lea.vmem %s953_s1, %s757_s19  ;;  %s914_s26 = scalar_lea.vmem %s952_s0, %s756_s23 }
  0x11   : > { %v364_v1 = vld [vmem:[%s905_s22] sm:$0xf]  ;;  %s346_s29 = scalar_lea.vmem %s955_s3, %s962_s15  ;;  %s759_s30 = sadd.s32 8, %s757_s19  ;;  %v477_v23 = vld [vmem:[%s905_s22 + $0x4] sm:$0xf] }
  0x12   : > { %771 = vmatpush3.bf16.xpose.msra.mxu0 %v364_v1  ;;  %v363_v2 = vld [vmem:[%s914_s26] sm:$0xf]  ;;  %s341_s7 = scalar_lea.vmem %s954_s2, %s759_s30  ;;  %v476_v25 = vld [vmem:[%s914_s26 + $0x4] sm:$0xf]  ;;  %s936_s10 = scalar_lea.vmem %s956_s4, %s756_s23 }
  0x13   : > { %788 = vmatprep.subr.bf16.mxu0 %v852_v0  ;;  %v751_v4 = vld [vmem:[%s346_s29] ss:$0 sm:$0xff]  ;;  %v478_v17 = vld [vmem:[%s341_s7 + $0x4] sm:$0xf] }
  0x14   : > { %v365_v16 = vld [vmem:[%s341_s7] sm:$0xf]  ;;  %v537_v19 = vsel %vm430_vm2, %v478_v17, 0 }
  0x15   : > { %v432_v18 = vsel %vm430_vm2, %v365_v16, 0 }
  0x16   : > { %777 = vmatpush3.bf16.msra.mxu1 %v432_v18 }
  0x17   : > { %782 = vmatprep.subr.bf16.mxu1 %v852_v0 }
  0x19   : > { %773 = vmatmul.mubr.bf16.vlgmr.msra.gmra.mrb[0].mxu0 %v363_v2 }
  0x1a   : > { %790 = vmatprep.mubr.msk.bf16.mxu0 %vm853_vm0, %v852_v0  ;;  %789 = vmatpush3.bf16.msra.mxu0 %v537_v19 }
  0xec   : > { %v400_v3 = vpop.f32.mrb[0].mxu0 }
  0xed   : > { %v406_v5 = vmul.f32 0.088388346, %v400_v3  ;;  %v774_v6 = vpop.f32.mrb[1].mxu0 }
  0xee   : > { %v403_v7 = vpop.f32.mrb[2].mxu0 }
  0xef   : > { %v775_v8 = vpop.f32.mrb[3].mxu0  ;;  %v413_v9 = vadd.f32 %v751_v4, %v406_v5 }
  0xf1   : > { %v415_v10 = vsel %vm414_vm1, %v413_v9, -inf }
  0xf2   : > { %416 = vmax.xlane.f32.xlu0 %v415_v10 }
 0x17f   : > { %v417_v11 = vpop.xlane.xlu0 %416 }
 0x180   : > { %v418_v12 = vsub.f32 %v413_v9, %v417_v11 }
 0x182   : > { %v419_v13 = vmul.f32 1.442695, %v418_v12 }
 0x184   : > { %820 = vpow2.f32 %v419_v13 }
 0x18e   : > { %v821_v14 = vpop.eup %820 }
 0x18f   : > { %v421_v15 = vsel %vm414_vm1, %v821_v14, 0.0 }
 0x190   : > { %422 = vadd.xlane.f32.xlu0 %v421_v15 }
 0x21d   : > { %v423_v20 = vpop.xlane.xlu0 %422 }
 0x21e   : > { %822 = vrcp.f32 %v423_v20 }
 0x228   : > { %v823_v21 = vpop.eup %822 }
 0x229   : > { %v425_v22 = vmul.f32 %v823_v21, %v821_v14 }
 0x22b   : > { %v426_v24 = vpack.c.bf16 %v425_v22, %v425_v22 }
 0x22d   : > { %779 = vmatmul.mubr.msk.bf16.vlgmr.msra.gmra.mrb[0].mxu1 %vm414_vm1, %v426_v24 }
 0x22e   : > { %783 = vmatpush3.bf16.xpose.msra.mxu1 %v477_v23  ;;  %784 = vmatprep.mubr.msk.bf16.mxu1 %vm853_vm0, %v852_v0 }
 0x235   : > { %785 = vmatmul.mubr.bf16.vlgmr.msra.gmra.mrb[4].mxu1 %v476_v25 }
 0x300   : > { %v468_v26 = vpop.f32.mrb[0].mxu1 }
 0x301   : > { %v474_v27 = vpack.c.bf16 %v468_v26, %v468_v26  ;;  %v780_v28 = vpop.f32.mrb[1].mxu1 }
 0x302   : > { %v471_v29 = vpop.f32.mrb[2].mxu1 }
 0x303   : > { %475 = vst [vmem:[%s936_s10] sm:$0xf] %v474_v27  ;;  %v781_v30 = vpop.f32.mrb[3].mxu1 }
 0x308   : > { %v513_v31 = vpop.f32.mrb[4].mxu1 }
 0x309   : > { %v519_v32 = vmul.f32 0.088388346, %v513_v31  ;;  %v786_v33 = vpop.f32.mrb[5].mxu1 }
 0x30a   : > { %v516_v34 = vpop.f32.mrb[6].mxu1 }
 0x30b   : > { %v787_v35 = vpop.f32.mrb[7].mxu1  ;;  %v520_v36 = vadd.f32 %v751_v4, %v519_v32 }
 0x30d   : > { %v521_v37 = vsel %vm414_vm1, %v520_v36, -inf }
 0x30e   : > { %522 = vmax.xlane.f32.xlu1 %v521_v37 }
 0x39b   : > { %v523_v38 = vpop.xlane.xlu1 %522 }
 0x39c   : > { %v524_v39 = vsub.f32 %v520_v36, %v523_v38 }
 0x39e   : > { %v525_v40 = vmul.f32 1.442695, %v524_v39 }
 0x3a0   : > { %824 = vpow2.f32 %v525_v40 }
 0x3aa   : > { %v825_v41 = vpop.eup %824 }
 0x3ab   : > { %v527_v42 = vsel %vm414_vm1, %v825_v41, 0.0 }
 0x3ac   : > { %528 = vadd.xlane.f32.xlu1 %v527_v42 }
 0x439   : > { %v529_v43 = vpop.xlane.xlu1 %528 }
 0x43a   : > { %826 = vrcp.f32 %v529_v43 }
 0x444   : > { %v827_v44 = vpop.eup %826 }
 0x445   : > { %v531_v45 = vmul.f32 %v827_v44, %v825_v41 }
 0x447   : > { %v532_v46 = vpack.c.bf16 %v531_v45, %v531_v45 }
 0x449   : > { %791 = vmatmul.mubr.msk.bf16.vlgmr.msra.gmra.mrb[4].mxu0 %vm414_vm1, %v532_v46 }
 0x51c   : > { %v573_v47 = vpop.f32.mrb[4].mxu0 }
 0x51d   : > { %v579_v48 = vpack.c.bf16 %v573_v47, %v573_v47  ;;  %v792_v49 = vpop.f32.mrb[5].mxu0 }
 0x51e   : > { %v576_v50 = vpop.f32.mrb[6].mxu0 }
 0x51f   : > { %580 = vst [vmem:[%s936_s10 + $0x4] sm:$0xf] %v579_v48  ;;  %v793_v51 = vpop.f32.mrb[7].mxu0 }
 0x520 PF: > { %s14_s17 = sadd.s32 1, %s850_s17   ;;  %s957_s15 = smov %s846_s16 }
 0x521   : > { %p11_p5 = scmp.ge.s32.totalorder %s14_s17, 4   ;;  %s958_s16 = smov %s960_s18 }
 0x523   :  { %13 = sbr.rel (!%p11_p5) target bundleno = 2 (0x2), region = 75 }

// kernel: bart_forward.61
= control target key start
LH: loop header
LB: loop body
LE: loop exit
PB: predicated region body
PF: predicated region fallthrough
CT: control target
= control target key end

     0   :  { %8 = vsyncpa [#allocation3], 0  ;;  %s1034_s0 = inlined_call_operand.vmem [shape: bf16[16,256], index: 0, kind: input, shape index: {}]   ;;  %s1035_s1 = inlined_call_operand.vmem [shape: bf16[512,256], index: 1, kind: input, shape index: {}]   ;;  %s1036_s2 = inlined_call_operand.vmem [shape: f32[1,512], index: 2, kind: input, shape index: {}]   ;;  %s1037_s3 = inlined_call_operand.hbm [shape: f32[16,512], index: 3, kind: output, shape index: {}]  }
   0x1   :  { %10 = vsyncpa [#allocation3 + $0x1], 0  ;;  %s876_s12 = smov 0   ;;  %s878_s13 = smov 0  }
   0x2   :  { %s880_s14 = smov 0   ;;  %s882_s15 = smov 0  }
   0x3   :  { %s884_s16 = smov 0   ;;  %s886_s17 = smov 0  }
   0x4 LB: > { %s611_s18 = sadd.s32 4294967295, %s850_s17   ;;  %s612_s19 = sadd.s32 4294967294, %s850_s17   ;;  %s850_s17 = sphi %s886_s17, %s16_s17   ;;  %s846_s16 = sphi %s884_s16, %s1044_s16   ;;  %s842_s15 = sphi %s882_s15, %s1043_s15   ;;  %s838_s14 = sphi %s880_s14, %s1042_s14   ;;  %s834_s13 = sphi %s878_s13, %s1041_s13   ;;  %s830_s12 = sphi %s876_s12, %s1040_s12  }
   0x5   : > { %s25_s20 = sadd.s32 1, %s846_s16  ;;  %s115_s21 = sadd.s32 1, %s838_s14 }
   0x6   : > { %p26_p0 = scmp.ge.s32.totalorder %s25_s20, 2  ;;  %p125_p1 = scmp.ne.s32.totalorder %s838_s14, %s834_s13 }
   0x7   : > { %p126_p2 = scmp.eq.s32.totalorder %s611_s18, 1  ;;  %p131_p3 = scmp.ne.s32.totalorder %s834_s13, %s830_s12 }
   0x8   : > { %s1046_s20 = smov (%p26_p0, %s25_s20), 0  ;;  %p132_p5 = scmp.eq.s32.totalorder %s612_s19, 1 }
   0x9   : > { %p916_p4 = por %p126_p2, %p125_p1  ;;  %s111_s23 = ssub.s32 %s846_s16, %s1046_s20 }
   0xa   : > { %p616_p6 = scmp.ge.s32.totalorder %s850_s17, 1  ;;  %p113_p7 = scmp.eq.s32.totalorder %s111_s23, 0 }
   0xb   : > { %p923_p8 = por %p132_p5, %p131_p3  ;;  %p178_p9 = scmp.lt.s32.totalorder %s850_s17, 3 }
   0xc   : > { %s929_s25 = scalar_select %p113_p7, %s838_s14, %s115_s21  }
   0xd   : > { %p179_p10 = pnand %p616_p6, %p178_p9 }
   0xe   : > { %s618_s26 = sshll.u32 (!%p179_p10), %s842_s15, 5  ;;  %v771_v0 = vld [vmem:[%s1034_s0 + $0x4] ss:$8 sps:$4 sm:$0xff] (!%p179_p10)   ;;  %v769_v33 = vld [vmem:[%s1034_s0] ss:$8 sps:$4 sm:$0xff] (!%p179_p10)   ;;  %s621_s8 = sshll.u32 (!%p179_p10), %s842_s15, 1  ;;  %v270_v34 = vlaneseq (!%p179_p10) }
   0xf   : > { %182 = sbr.rel (%p179_p10) target bundleno = 387 (0x183), region = 32  ;;  %p221_p11 = scmp.lt.s32.totalorder (!%p179_p10), %s618_s26, 63  ;;  %482 = vmatprep.mubr.bf16.mxu0 (!%p179_p10), %v771_v0 }
  0x10   : > { %p228_p12 = scmp.lt.s32.totalorder (!%p179_p10), %s621_s8, 3  ;;  %v271_v35 = vshrl.u32 (!%p179_p10), %v270_v34, 7  ;;  %s210_s18 = sand.u32 (!%p179_p10), 1, %s834_s13  }
  0x11   : > { %s617_s19 = sshll.u32 (!%p179_p10), %s210_s18, 5  ;;  %s852_s4 = smov (!%p179_p10), [#allocation2]  }
  0x12   : > { %v272_v36 = vsub.s32 (!%p179_p10), 0, %v271_v35  ;;  %v276_v38 = vsub.s32 (!%p179_p10), 1, %v271_v35  ;;  %s212_s21 = scalar_lea.vmem (!%p179_p10), [#allocation2], %s617_s19 }
  0x13   : > { %s514_s23 = sshll.u32 (!%p179_p10), %s212_s21, 4  ;;  %s981_s23 = int_to_ptr.vmem [resolvable:$true] %s514_s23 }
  0x14   : > { %s772_s30 = scalar_lea.vmem (!%p179_p10), %s981_s23, 512 }
  0x15   : > { %p773_p13 = scmp.ne.s32.totalorder (!%p179_p10), %s981_s23, %s772_s30 }
  0x16   : > { %s1048_s26 = smov (!%p221_p11, %s618_s26), 63  ;;  %s1050_s8 = smov (!%p228_p12, %s621_s8), 3 }
  0x17   : > { %s661_s29 = sshll.u32 %s1048_s26, 3  ;;  %s230_s11 = scalar_lea.vmem %s1036_s2, %s1050_s8 }
  0x18   : > { %s938_s5 = scalar_lea.vmem %s1035_s1, %s661_s29  ;;  %v268_v37 = vld [vmem:[%s230_s11] sm:$0x3]  ;;  %s662_s26 = sshll.u32 %s842_s15, 8 }
  0x19   : > { %v721_v1 = vld [vmem:[%s938_s5 + $0x4] ss:$8 sps:$4 sm:$0xff]   ;;  %v723_v2 = vld [vmem:[%s938_s5] ss:$8 sps:$4 sm:$0xff]   ;;  %v724_v3 = vld [vmem:[%s938_s5 + $0x14] ss:$8 sps:$4 sm:$0xff]   ;;  %v273_v39 = vrot.slane %v268_v37, %v272_v36  ;;  %v277_v40 = vrot.slane %v268_v37, %v276_v38  ;;  %s986_s29 = scalar_lea.hbm %s1037_s3, %s662_s26  ;;  %p774_p0 = pnand %p773_p13, %p916_p4 }
  0x1a   : > { %450 = vmatprep.subr.bf16.mxu0 %v721_v1  ;;  %v726_v4 = vld [vmem:[%s938_s5 + $0x10] ss:$8 sps:$4 sm:$0xff]   ;;  %v727_v5 = vld [vmem:[%s938_s5 + $0x24] ss:$8 sps:$4 sm:$0xff]   ;;  %v729_v6 = vld [vmem:[%s938_s5 + $0x20] ss:$8 sps:$4 sm:$0xff]  }
  0x1b   : > { %451 = vmatpush1.bf16.xpose.msra.mxu0 %v723_v2  ;;  %v730_v7 = vld [vmem:[%s938_s5 + $0x34] ss:$8 sps:$4 sm:$0xff]   ;;  %v732_v8 = vld [vmem:[%s938_s5 + $0x30] ss:$8 sps:$4 sm:$0xff]   ;;  %v733_v9 = vld [vmem:[%s938_s5 + $0x44] ss:$8 sps:$4 sm:$0xff]   ;;  %p775_p1 = pneg %p774_p0 }
  0x1c   : > { %452 = vmatprep.subr.bf16.mxu0 %v724_v3  ;;  %v735_v10 = vld [vmem:[%s938_s5 + $0x40] ss:$8 sps:$4 sm:$0xff]   ;;  %v736_v11 = vld [vmem:[%s938_s5 + $0x54] ss:$8 sps:$4 sm:$0xff]   ;;  %v738_v12 = vld [vmem:[%s938_s5 + $0x50] ss:$8 sps:$4 sm:$0xff]  }
  0x1d   : > { %v739_v13 = vld [vmem:[%s938_s5 + $0x64] ss:$8 sps:$4 sm:$0xff]   ;;  %v741_v14 = vld [vmem:[%s938_s5 + $0x60] ss:$8 sps:$4 sm:$0xff]   ;;  %v742_v15 = vld [vmem:[%s938_s5 + $0x74] ss:$8 sps:$4 sm:$0xff]  }
  0x1e   : > { %v744_v16 = vld [vmem:[%s938_s5 + $0x70] ss:$8 sps:$4 sm:$0xff]   ;;  %v745_v17 = vld [vmem:[%s938_s5 + $0x84] ss:$8 sps:$4 sm:$0xff]   ;;  %v747_v18 = vld [vmem:[%s938_s5 + $0x80] ss:$8 sps:$4 sm:$0xff]  }
  0x1f   : > { %v748_v19 = vld [vmem:[%s938_s5 + $0x94] ss:$8 sps:$4 sm:$0xff]   ;;  %v750_v20 = vld [vmem:[%s938_s5 + $0x90] ss:$8 sps:$4 sm:$0xff]   ;;  %v751_v21 = vld [vmem:[%s938_s5 + $0xa4] ss:$8 sps:$4 sm:$0xff]  }
  0x20   : > { %v753_v22 = vld [vmem:[%s938_s5 + $0xa0] ss:$8 sps:$4 sm:$0xff]   ;;  %v754_v23 = vld [vmem:[%s938_s5 + $0xb4] ss:$8 sps:$4 sm:$0xff]   ;;  %v756_v24 = vld [vmem:[%s938_s5 + $0xb0] ss:$8 sps:$4 sm:$0xff]  }
  0x21   : > { %v757_v25 = vld [vmem:[%s938_s5 + $0xc4] ss:$8 sps:$4 sm:$0xff]   ;;  %v759_v26 = vld [vmem:[%s938_s5 + $0xc0] ss:$8 sps:$4 sm:$0xff]   ;;  %v760_v27 = vld [vmem:[%s938_s5 + $0xd4] ss:$8 sps:$4 sm:$0xff]  }
  0x22   : > { %v762_v28 = vld [vmem:[%s938_s5 + $0xd0] ss:$8 sps:$4 sm:$0xff]   ;;  %v763_v29 = vld [vmem:[%s938_s5 + $0xe4] ss:$8 sps:$4 sm:$0xff]   ;;  %v765_v30 = vld [vmem:[%s938_s5 + $0xe0] ss:$8 sps:$4 sm:$0xff]  }
  0x23   : > { %453 = vmatpush1.bf16.xpose.msra.mxu0 %v726_v4  ;;  %v766_v31 = vld [vmem:[%s938_s5 + $0xf4] ss:$8 sps:$4 sm:$0xff]   ;;  %v768_v32 = vld [vmem:[%s938_s5 + $0xf0] ss:$8 sps:$4 sm:$0xff]   ;;  %s988_s15 = scalar_lea.sflag [#allocation3], %s210_s18  ;;  %s776_s5 = sshll.u32 %s852_s4, 4  ;;  %s777_s5 = int_to_ptr.vmem [resolvable:$false] %s776_s5 }
  0x24   : > { %454 = vmatprep.subr.bf16.mxu0 %v727_v5  ;;  %s778_s6 = scalar_lea.vmem %s777_s5, 1024  ;;  %p779_p2 = scmp.lt.s32.totalorder %s981_s23, %s777_s5 }
  0x25   : > { %p780_p3 = scmp.lt.s32.totalorder %s778_s6, %s772_s30 }
  0x27   : > { %p781_p5 = por %p780_p3, %p779_p2 }
  0x29   : > { %p782_p6 = pnand %p781_p5, %p775_p1 }
  0x2b   : > { %455 = vmatpush1.bf16.xpose.msra.mxu0 %v729_v6 }
  0x2c   : > { %456 = vmatprep.subr.bf16.mxu0 %v730_v7 }
  0x33   : > { %457 = vmatpush1.bf16.xpose.msra.mxu0 %v732_v8 }
  0x34   : > { %458 = vmatprep.subr.bf16.mxu0 %v733_v9 }
  0x3b   : > { %459 = vmatpush1.bf16.xpose.msra.mxu0 %v735_v10 }
  0x3c   : > { %460 = vmatprep.subr.bf16.mxu0 %v736_v11 }
  0x43   : > { %461 = vmatpush1.bf16.xpose.msra.mxu0 %v738_v12 }
  0x44   : > { %462 = vmatprep.subr.bf16.mxu0 %v739_v13 }
  0x4b   : > { %463 = vmatpush1.bf16.xpose.msra.mxu0 %v741_v14 }
  0x4c   : > { %464 = vmatprep.subr.bf16.mxu0 %v742_v15 }
  0x53   : > { %465 = vmatpush1.bf16.xpose.msra.mxu0 %v744_v16 }
  0x54   : > { %466 = vmatprep.subr.bf16.mxu0 %v745_v17 }
  0x5b   : > { %467 = vmatpush1.bf16.xpose.msra.mxu0 %v747_v18 }
  0x5c   : > { %468 = vmatprep.subr.bf16.mxu0 %v748_v19 }
  0x63   : > { %469 = vmatpush1.bf16.xpose.msra.mxu0 %v750_v20 }
  0x64   : > { %470 = vmatprep.subr.bf16.mxu0 %v751_v21 }
  0x6b   : > { %471 = vmatpush1.bf16.xpose.msra.mxu0 %v753_v22 }
  0x6c   : > { %472 = vmatprep.subr.bf16.mxu0 %v754_v23 }
  0x73   : > { %473 = vmatpush1.bf16.xpose.msra.mxu0 %v756_v24 }
  0x74   : > { %474 = vmatprep.subr.bf16.mxu0 %v757_v25 }
  0x7b   : > { %475 = vmatpush1.bf16.xpose.msra.mxu0 %v759_v26 }
  0x7c   : > { %476 = vmatprep.subr.bf16.mxu0 %v760_v27 }
  0x83   : > { %477 = vmatpush1.bf16.xpose.msra.mxu0 %v762_v28 }
  0x84   : > { %478 = vmatprep.subr.bf16.mxu0 %v763_v29 }
  0x8b   : > { %479 = vmatpush1.bf16.xpose.msra.mxu0 %v765_v30 }
  0x8c   : > { %480 = vmatprep.subr.bf16.mxu0 %v766_v31 }
  0x93   : > { %481 = vmatpush1.bf16.xpose.msra.mxu0 %v768_v32 }
  0x9a   : > { %483 = vmatmul.mubr.bf16.vlgmr.msra.gmra.mrb[0].mxu0 %v769_v33 }
 0x16d   : > { %v484_v41 = vpop.f32.mrb[0].mxu0 }
 0x16e   : > { %v485_v42 = vadd.f32 %v484_v41, %v273_v39  ;;  %v486_v43 = vpop.f32.mrb[1].mxu0 }
 0x16f   : > { %v487_v44 = vadd.f32 %v486_v43, %v277_v40  ;;  %v488_v45 = vpop.f32.mrb[2].mxu0 }
 0x170   : > { %493 = vst [vmem:[%s212_s21] sm:$0xff] %v485_v42  ;;  %v489_v46 = vadd.f32 %v488_v45, %v273_v39  ;;  %v490_v47 = vpop.f32.mrb[3].mxu0 }
 0x171   : > { %494 = vst [vmem:[%s212_s21 + $0x8] sm:$0xff] %v487_v44  ;;  %v491_v48 = vadd.f32 %v490_v47, %v277_v40 }
 0x172   : > { %495 = vst [vmem:[%s212_s21 + $0x10] sm:$0xff] %v489_v46 }
 0x173   : > { %496 = vst [vmem:[%s212_s21 + $0x18] sm:$0xff] %v491_v48 }
 0x174   : > { %785 = shalt.err (!%p782_p6)
}
 0x175   : > { %s786_s7 = scalar_lea.hbm %s986_s29, 512  ;;  %s790_s10 = scalar_lea.hbm %s1037_s3, 1024 }
 0x176   : > { %p787_p7 = scmp.ne.s32.totalorder %s986_s29, %s786_s7  ;;  %p791_p11 = scmp.lt.u32.totalorder %s986_s29, %s1037_s3 }
 0x177   : > { %p792_p12 = scmp.lt.u32.totalorder %s790_s10, %s786_s7  ;;  %p794_p0 = scmp.lt.u32.totalorder %s786_s7, %s986_s29 }
 0x178   : > { %p788_p9 = pnand %p787_p7, %p916_p4 }
 0x179   : > { %p793_p13 = por %p792_p12, %p791_p11 }
 0x17a   : > { %p789_p10 = pneg %p788_p9 }
 0x17b   : > { %p795_p1 = por %p794_p0, %p793_p13 }
 0x17d   : > { %p796_p2 = pnand %p795_p1, %p789_p10 }
 0x17f   : > { %799 = shalt.err (!%p796_p2)
}
 0x180   : > { %s853_s19 = smov 256   ;;  %s854_s21 = smov 512  }
 0x181   : > { %s855_s26 = smov 16  }
 0x182   : > { %663 = dma.vmem_to_hbm [thread:$0]  (%p916_p4), %s981_s23, 512, %s986_s29, %s988_s15, %s853_s19, %s854_s21, %s855_s26  }
 0x183 PF: > { %p669_p3 = scmp.ge.s32.totalorder %s850_s17, 2  ;;  %s529_s27 = sand.u32 1, %s830_s12  }
 0x184   : > { %s530_s28 = scalar_lea.sflag [#allocation3], %s529_s27 }
 0x185   : > { %p666_p5 = pnand %p669_p3, %p923_p8 }
 0x187   : > { %825 = dma.done.wait (!%p666_p5), %s530_s28, 512  }
 0x188   : > { %827 = vsyncadd (!%p666_p5), %s530_s28, 4294966784  ;;  %s16_s17 = sadd.s32 1, %s850_s17   ;;  %s1040_s12 = smov %s834_s13 }
 0x189   : > { %p13_p6 = scmp.ge.s32.totalorder %s16_s17, 4   ;;  %s1041_s13 = smov %s838_s14 }
 0x18a   : > { %s1042_s14 = smov %s929_s25  ;;  %s1043_s15 = smov %s846_s16 }
 0x18b   : > { %s1044_s16 = smov %s1046_s20  ;;  %15 = sbr.rel (!%p13_p6) target bundleno = 4 (0x4), region = 73 }
 0x192   :  { %535 = vsyncpa [#allocation3], 1 }
 0x193   :  { %537 = vsyncpa [#allocation3 + $0x1], 1 }

</bundles_post_ra>
